<compile_context>
chip_gen: v7x
topology: tpu7x:2x2x1
jax: 0.10.0
libtpu: 0.0.40
codegen_flags: <defaults>
</compile_context>

<pallas_src>
import functools

import jax
import jax.numpy as jnp
from jax.experimental import pallas as pl
from jax.experimental.pallas import tpu as pltpu


def _squash(s):
    # squash over the dim_capsule axis (axis 0 of (D, BLK)):
    # scale = sqrt(n2) / (1 + n2), written as n2 * rsqrt(n2) * recip(1 + n2)
    # so the divides go to the EUP.
    n2 = jnp.sum(s * s, axis=0, keepdims=True) + 1e-8          # (1, BLK)
    scale = n2 * jax.lax.rsqrt(n2) * pl.reciprocal(1.0 + n2, approx=True)
    return scale * s


def _capsule_kernel(u_ref, w_ref, out_ref, *, routings: int, I: int, C: int,
                    J: int, D: int):
    # u_ref  : (I*C, BLK)     input capsules, bf16, batch on lanes
    # w_ref  : (J*I*D, I*C)   block-diagonal weights, bf16, grid-invariant
    # out_ref: (J, D, BLK)    output capsule vectors, f32, batch on lanes
    BLK = u_ref.shape[-1]
    u2 = u_ref[...]                                            # (I*C, BLK) bf16
    inv_I = 1.0 / I

    # Routing is independent per output capsule j (softmax is over in_units),
    # so unroll over the small J: bounded (I, D, BLK) working set per j.
    for j in range(J):
        # ---- u_hat projection on the MXU (bf16 in, f32 accumulate) ----
        w_j = w_ref[pl.ds(j * I * D, I * D), :]                # (I*D, I*C)
        uh = jnp.dot(w_j, u2, preferred_element_type=jnp.float32)
        uh = uh.reshape(I, D, BLK)       # tile-aligned split of the sublane dim

        # ---- dynamic routing; iteration 0 peeled (softmax(0) == 1/I) ----
        s = jnp.sum(uh, axis=0) * inv_I                        # (D, BLK)
        v = _squash(s)                                         # (D, BLK)
        if routings > 1:
            b = jnp.sum(uh * v[None, :, :], axis=1)            # (I, BLK) agreement

        for r in range(1, routings):
            # softmax over in_units (axis 0), compact (I, BLK) layout
            m = jnp.max(b, axis=0, keepdims=True)              # (1, BLK)
            e = jnp.exp(b - m)                                 # (I, BLK)
            denom = jnp.sum(e, axis=0, keepdims=True)          # (1, BLK)
            c = e * pl.reciprocal(denom, approx=True)          # (I, BLK)
            # s[d, b] = sum_i c[i, b] * u_hat[i, d, b]
            s = jnp.sum(c[:, None, :] * uh, axis=0)            # (D, BLK)
            v = _squash(s)
            if r != routings - 1:                              # last update unused
                # TODO(synk): if the D-axis (sublane) reductions become the
                # binding XLU slot after the MXU offload, fuse this agreement
                # reduction with the n2 pass inside _squash.
                b = b + jnp.sum(uh * v[None, :, :], axis=1)    # (I, BLK)

        out_ref[j] = v.astype(out_ref.dtype)                   # lane-dense store


def capsule_forward(u_vecs, W, routings: int = 3, block_b: int = 128):
    """u_vecs: (B, in_channels, in_units); W: (in_units, num_capsule, in_channels, dim_capsule).

    Returns (B, dim_capsule, num_capsule), matching the PyTorch module.
    `block_b` is the (tunable) lane-block of batch rows per grid step; it must
    be a multiple of 128 (256-1024 amortize grid overhead further when B allows)."""
    B, C, I = u_vecs.shape
    Iw, J, Cw, D = W.shape
    assert (Iw, Cw) == (I, C)
    assert block_b % 128 == 0, "batch block must be a multiple of the 128-lane width"

    blk = min(block_b, ((B + 127) // 128) * 128)     # don't pad past the batch
    n_blocks = (B + blk - 1) // blk
    Bp = n_blocks * blk

    # ---- layout glue (plain JAX, outside the kernel) -----------------------
    # Batch -> lane axis; the projection contraction axis (I*C) -> sublanes so
    # the kernel can feed the MXU directly. bf16 operands for the MXU; all
    # routing math stays f32 inside the kernel.
    u2 = jnp.transpose(u_vecs.astype(jnp.float32), (2, 1, 0)).reshape(I * C, B)
    u2 = u2.astype(jnp.bfloat16)
    if Bp != B:
        u2 = jnp.pad(u2, ((0, 0), (0, Bp - B)))

    # Block-diagonal weight: row (j, i, d), col (k, c) holds W[i, j, c, d]*delta_{ik}.
    # Rows are j-major so each output capsule's block is a contiguous (I*D, I*C)
    # slab; K = I*C matches the MXU contraction width and the 2-D lane-dense
    # layout avoids padded (4, 8)-trailing tiles for the grid-invariant weight.
    w_perm = jnp.transpose(W.astype(jnp.float32), (1, 0, 3, 2))      # (J, I, D, C)
    eye = jnp.eye(I, dtype=jnp.float32)
    w_bd = (w_perm[:, :, :, None, :] * eye[None, :, None, :, None]
            ).reshape(J * I * D, I * C).astype(jnp.bfloat16)

    kernel = functools.partial(_capsule_kernel, routings=routings,
                               I=I, C=C, J=J, D=D)
    out = pl.pallas_call(
        kernel,
        out_shape=jax.ShapeDtypeStruct((J, D, Bp), jnp.float32),
        grid=(n_blocks,),
        in_specs=[
            pl.BlockSpec((I * C, blk), lambda s: (0, s)),
            pl.BlockSpec((J * I * D, I * C), lambda s: (0, 0)),  # VMEM resident
        ],
        out_specs=pl.BlockSpec((J, D, blk), lambda s: (0, 0, s)),
        compiler_params=pltpu.CompilerParams(dimension_semantics=("parallel",)),
    )(u2, w_bd)

    # (J, D, Bp) -> (B, dim_capsule, num_capsule)
    return jnp.transpose(out[:, :, :B], (2, 1, 0))


def capsule_reference(u_vecs, W, routings: int = 3):
    """Pure-JAX transcription of the PyTorch forward.

    All contractions are broadcast-multiply + sum so the reference is exact
    f32 regardless of the backend's default matmul precision."""
    B, C, I = u_vecs.shape
    _, J, _, D = W.shape
    u_t = jnp.transpose(u_vecs, (0, 2, 1))                             # (B, I, C)
    u_hat = jnp.sum(u_t[:, :, None, :, None] * W[None], axis=3)        # (B, I, J, D)
    u_hat2 = jnp.transpose(u_hat, (0, 2, 1, 3))                        # (B, J, I, D)
    b = jnp.zeros((B, J, I), jnp.float32)
    v = jnp.zeros((B, J, D), jnp.float32)
    for _ in range(routings):
        c = jax.nn.softmax(b, axis=-1)                                 # (B, J, I)
        s = jnp.sum(c[..., None] * u_hat2, axis=2)                     # (B, J, D)
        n2 = jnp.sum(s * s, axis=-1, keepdims=True) + 1e-8
        v = jnp.sqrt(n2) / (1.0 + n2) * s
        b = b + jnp.sum(u_hat2 * v[:, :, None, :], axis=-1)            # (B, J, I)
    return jnp.transpose(v, (0, 2, 1))                                 # (B, D, J)


if __name__ == "__main__":
    # Shapes consistent with the module's forward. B=256 -> two 128-lane batch
    # blocks (grid=(2,), "parallel" -> both v7x TensorCores); I*C = I*D = 128
    # so the MXU matmuls are perfectly aligned.
    B = 256          # batch
    in_channels = 8  # C
    in_units = 16    # I
    num_capsule = 4  # J
    dim_capsule = 8  # D
    routings = 3

    key = jax.random.PRNGKey(0)
    k_u, k_w = jax.random.split(key)
    u_vecs = jax.random.normal(k_u, (B, in_channels, in_units), jnp.float32)
    # Deterministic stand-in for nn.Parameter(torch.randn(I, J, C, D)).
    W = jax.random.normal(k_w, (in_units, num_capsule, in_channels, dim_capsule),
                          jnp.float32)

    out = capsule_forward(u_vecs, W, routings=routings)
    out = jax.block_until_ready(out)
    assert out.shape == (B, dim_capsule, num_capsule), out.shape

    # Validation: the kernel feeds the MXU with bf16 operands (f32 accumulate),
    # so compare against the faithful f32 reference evaluated on bf16-rounded
    # inputs (identical quantization, exact f32 math).  The tolerance covers
    # the in-kernel approximate EUP reciprocals; layout / indexing / routing
    # bugs produce O(0.1..1) errors and are still caught.  (Versus the
    # un-rounded f32 reference, the bf16 input quantization propagated through
    # 3 routing iterations yields O(1e-2) output deviations — documented per
    # the review's correctness note.)
    u_q = u_vecs.astype(jnp.bfloat16).astype(jnp.float32)
    W_q = W.astype(jnp.bfloat16).astype(jnp.float32)
    ref = capsule_reference(u_q, W_q, routings=routings)
    if not bool(jnp.allclose(out, ref, atol=5e-3, rtol=5e-3)):
        max_err = float(jnp.max(jnp.abs(out - ref)))
        raise AssertionError(
            f"Pallas kernel output mismatch vs reference (max abs err {max_err})")

    print("KERNEL_OK")
</pallas_src>

<mosaic_0001>
module attributes {stable_mosaic.version = 11 : i64} {
  func.func @_capsule_kernel(%arg0: i32, %arg1: memref<128x128xbf16, #tpu.memory_space<vmem>>, %arg2: memref<512x128xbf16, #tpu.memory_space<vmem>>, %arg3: memref<4x8x128xf32, #tpu.memory_space<vmem>>) attributes {dimension_semantics = [#tpu.dimension_semantics<parallel>], iteration_bounds = array<i64: 2>, scalar_prefetch = 0 : i64, scratch_operands = 0 : i64, tpu.core_type = #tpu.core_type<tc>, window_params = [{transform_indices = @transform_0, window_bounds = array<i64: 128, 128>}, {pipeline_mode = #tpu.pipeline_mode<synchronous>, transform_indices = @transform_1, window_bounds = array<i64: 512, 128>}, {transform_indices = @transform_2, window_bounds = array<i64: 4, 8, 128>}]} {
    %c0 = arith.constant 0 : index
    %c0_0 = arith.constant 0 : index
    %0 = vector.load %arg1[%c0, %c0_0] : memref<128x128xbf16, #tpu.memory_space<vmem>>, vector<128x128xbf16>
    %c0_1 = arith.constant 0 : index
    %c0_2 = arith.constant 0 : index
    %1 = vector.load %arg2[%c0_1, %c0_2] : memref<512x128xbf16, #tpu.memory_space<vmem>>, vector<128x128xbf16>
    %cst = arith.constant dense<0.000000e+00> : vector<128x128xf32>
    %2 = tpu.matmul %1, %0, %cst {dimension_numbers = #tpu.dot_dimension_numbers<[1], [0], [0], [1], [0, 0, 1, 1], [], []>} : vector<128x128xbf16>, vector<128x128xbf16>, vector<128x128xf32> -> vector<128x128xf32>
    %3 = vector.shape_cast %2 : vector<128x128xf32> to vector<16x8x128xf32>
    %cst_3 = arith.constant dense<0.000000e+00> : vector<8x128xf32>
    %4 = vector.multi_reduction <add>, %3, %cst_3 [0] : vector<16x8x128xf32> to vector<8x128xf32>
    %cst_4 = arith.constant 6.250000e-02 : f32
    %5 = vector.broadcast %cst_4 : f32 to vector<8x128xf32>
    %6 = arith.mulf %4, %5 : vector<8x128xf32>
    %7 = arith.mulf %6, %6 : vector<8x128xf32>
    %cst_5 = arith.constant dense<0.000000e+00> : vector<128xf32>
    %8 = vector.multi_reduction <add>, %7, %cst_5 [0] : vector<8x128xf32> to vector<128xf32>
    %9 = vector.shape_cast %8 : vector<128xf32> to vector<1x128xf32>
    %cst_6 = arith.constant 9.99999993E-9 : f32
    %10 = vector.broadcast %cst_6 : f32 to vector<1x128xf32>
    %11 = arith.addf %9, %10 : vector<1x128xf32>
    %12 = math.rsqrt %11 : vector<1x128xf32>
    %13 = arith.mulf %11, %12 : vector<1x128xf32>
    %cst_7 = arith.constant 1.000000e+00 : f32
    %14 = vector.broadcast %cst_7 : f32 to vector<1x128xf32>
    %15 = arith.addf %14, %11 : vector<1x128xf32>
    %16 = tpu.reciprocal %15 {approx = true} : vector<1x128xf32> -> vector<1x128xf32>
    %17 = arith.mulf %13, %16 : vector<1x128xf32>
    %18 = vector.broadcast %17 : vector<1x128xf32> to vector<8x128xf32>
    %19 = arith.mulf %18, %6 : vector<8x128xf32>
    %20 = vector.shape_cast %19 : vector<8x128xf32> to vector<1x8x128xf32>
    %21 = vector.broadcast %20 : vector<1x8x128xf32> to vector<16x8x128xf32>
    %22 = arith.mulf %3, %21 : vector<16x8x128xf32>
    %cst_8 = arith.constant dense<0.000000e+00> : vector<16x128xf32>
    %23 = vector.multi_reduction <add>, %22, %cst_8 [1] : vector<16x8x128xf32> to vector<16x128xf32>
    %cst_9 = arith.constant dense<0xFF800000> : vector<128xf32>
    %24 = vector.multi_reduction <maximumf>, %23, %cst_9 [0] : vector<16x128xf32> to vector<128xf32>
    %25 = vector.shape_cast %24 : vector<128xf32> to vector<1x128xf32>
    %26 = vector.broadcast %25 : vector<1x128xf32> to vector<16x128xf32>
    %27 = arith.subf %23, %26 : vector<16x128xf32>
    %28 = math.exp %27 : vector<16x128xf32>
    %cst_10 = arith.constant dense<0.000000e+00> : vector<128xf32>
    %29 = vector.multi_reduction <add>, %28, %cst_10 [0] : vector<16x128xf32> to vector<128xf32>
    %30 = vector.shape_cast %29 : vector<128xf32> to vector<1x128xf32>
    %31 = tpu.reciprocal %30 {approx = true} : vector<1x128xf32> -> vector<1x128xf32>
    %32 = vector.broadcast %31 : vector<1x128xf32> to vector<16x128xf32>
    %33 = arith.mulf %28, %32 : vector<16x128xf32>
    %34 = vector.shape_cast %33 : vector<16x128xf32> to vector<16x1x128xf32>
    %35 = vector.broadcast %34 : vector<16x1x128xf32> to vector<16x8x128xf32>
    %36 = arith.mulf %35, %3 : vector<16x8x128xf32>
    %cst_11 = arith.constant dense<0.000000e+00> : vector<8x128xf32>
    %37 = vector.multi_reduction <add>, %36, %cst_11 [0] : vector<16x8x128xf32> to vector<8x128xf32>
    %38 = arith.mulf %37, %37 : vector<8x128xf32>
    %cst_12 = arith.constant dense<0.000000e+00> : vector<128xf32>
    %39 = vector.multi_reduction <add>, %38, %cst_12 [0] : vector<8x128xf32> to vector<128xf32>
    %40 = vector.shape_cast %39 : vector<128xf32> to vector<1x128xf32>
    %cst_13 = arith.constant 9.99999993E-9 : f32
    %41 = vector.broadcast %cst_13 : f32 to vector<1x128xf32>
    %42 = arith.addf %40, %41 : vector<1x128xf32>
    %43 = math.rsqrt %42 : vector<1x128xf32>
    %44 = arith.mulf %42, %43 : vector<1x128xf32>
    %cst_14 = arith.constant 1.000000e+00 : f32
    %45 = vector.broadcast %cst_14 : f32 to vector<1x128xf32>
    %46 = arith.addf %45, %42 : vector<1x128xf32>
    %47 = tpu.reciprocal %46 {approx = true} : vector<1x128xf32> -> vector<1x128xf32>
    %48 = arith.mulf %44, %47 : vector<1x128xf32>
    %49 = vector.broadcast %48 : vector<1x128xf32> to vector<8x128xf32>
    %50 = arith.mulf %49, %37 : vector<8x128xf32>
    %51 = vector.shape_cast %50 : vector<8x128xf32> to vector<1x8x128xf32>
    %52 = vector.broadcast %51 : vector<1x8x128xf32> to vector<16x8x128xf32>
    %53 = arith.mulf %3, %52 : vector<16x8x128xf32>
    %cst_15 = arith.constant dense<0.000000e+00> : vector<16x128xf32>
    %54 = vector.multi_reduction <add>, %53, %cst_15 [1] : vector<16x8x128xf32> to vector<16x128xf32>
    %55 = arith.addf %23, %54 : vector<16x128xf32>
    %cst_16 = arith.constant dense<0xFF800000> : vector<128xf32>
    %56 = vector.multi_reduction <maximumf>, %55, %cst_16 [0] : vector<16x128xf32> to vector<128xf32>
    %57 = vector.shape_cast %56 : vector<128xf32> to vector<1x128xf32>
    %58 = vector.broadcast %57 : vector<1x128xf32> to vector<16x128xf32>
    %59 = arith.subf %55, %58 : vector<16x128xf32>
    %60 = math.exp %59 : vector<16x128xf32>
    %cst_17 = arith.constant dense<0.000000e+00> : vector<128xf32>
    %61 = vector.multi_reduction <add>, %60, %cst_17 [0] : vector<16x128xf32> to vector<128xf32>
    %62 = vector.shape_cast %61 : vector<128xf32> to vector<1x128xf32>
    %63 = tpu.reciprocal %62 {approx = true} : vector<1x128xf32> -> vector<1x128xf32>
    %64 = vector.broadcast %63 : vector<1x128xf32> to vector<16x128xf32>
    %65 = arith.mulf %60, %64 : vector<16x128xf32>
    %66 = vector.shape_cast %65 : vector<16x128xf32> to vector<16x1x128xf32>
    %67 = vector.broadcast %66 : vector<16x1x128xf32> to vector<16x8x128xf32>
    %68 = arith.mulf %67, %3 : vector<16x8x128xf32>
    %cst_18 = arith.constant dense<0.000000e+00> : vector<8x128xf32>
    %69 = vector.multi_reduction <add>, %68, %cst_18 [0] : vector<16x8x128xf32> to vector<8x128xf32>
    %70 = arith.mulf %69, %69 : vector<8x128xf32>
    %cst_19 = arith.constant dense<0.000000e+00> : vector<128xf32>
    %71 = vector.multi_reduction <add>, %70, %cst_19 [0] : vector<8x128xf32> to vector<128xf32>
    %72 = vector.shape_cast %71 : vector<128xf32> to vector<1x128xf32>
    %cst_20 = arith.constant 9.99999993E-9 : f32
    %73 = vector.broadcast %cst_20 : f32 to vector<1x128xf32>
    %74 = arith.addf %72, %73 : vector<1x128xf32>
    %75 = math.rsqrt %74 : vector<1x128xf32>
    %76 = arith.mulf %74, %75 : vector<1x128xf32>
    %cst_21 = arith.constant 1.000000e+00 : f32
    %77 = vector.broadcast %cst_21 : f32 to vector<1x128xf32>
    %78 = arith.addf %77, %74 : vector<1x128xf32>
    %79 = tpu.reciprocal %78 {approx = true} : vector<1x128xf32> -> vector<1x128xf32>
    %80 = arith.mulf %76, %79 : vector<1x128xf32>
    %81 = vector.broadcast %80 : vector<1x128xf32> to vector<8x128xf32>
    %82 = arith.mulf %81, %69 : vector<8x128xf32>
    %c0_22 = arith.constant 0 : index
    %c0_23 = arith.constant 0 : index
    %c0_24 = arith.constant 0 : index
    %83 = vector.load %arg3[%c0_22, %c0_23, %c0_24] : memref<4x8x128xf32, #tpu.memory_space<vmem>>, vector<1x8x128xf32>
    %84 = vector.shape_cast %83 : vector<1x8x128xf32> to vector<8x128xf32>
    %85 = vector.shape_cast %82 : vector<8x128xf32> to vector<1x8x128xf32>
    tpu.vector_store %arg3[%c0_22, %c0_23, %c0_24], %85 {strides = array<i32>} : memref<4x8x128xf32, #tpu.memory_space<vmem>>, vector<1x8x128xf32>,
    %c128 = arith.constant 128 : index
    %c0_25 = arith.constant 0 : index
    %86 = vector.load %arg2[%c128, %c0_25] : memref<512x128xbf16, #tpu.memory_space<vmem>>, vector<128x128xbf16>
    %cst_26 = arith.constant dense<0.000000e+00> : vector<128x128xf32>
    %87 = tpu.matmul %86, %0, %cst_26 {dimension_numbers = #tpu.dot_dimension_numbers<[1], [0], [0], [1], [0, 0, 1, 1], [], []>} : vector<128x128xbf16>, vector<128x128xbf16>, vector<128x128xf32> -> vector<128x128xf32>
    %88 = vector.shape_cast %87 : vector<128x128xf32> to vector<16x8x128xf32>
    %cst_27 = arith.constant dense<0.000000e+00> : vector<8x128xf32>
    %89 = vector.multi_reduction <add>, %88, %cst_27 [0] : vector<16x8x128xf32> to vector<8x128xf32>
    %cst_28 = arith.constant 6.250000e-02 : f32
    %90 = vector.broadcast %cst_28 : f32 to vector<8x128xf32>
    %91 = arith.mulf %89, %90 : vector<8x128xf32>
    %92 = arith.mulf %91, %91 : vector<8x128xf32>
    %cst_29 = arith.constant dense<0.000000e+00> : vector<128xf32>
    %93 = vector.multi_reduction <add>, %92, %cst_29 [0] : vector<8x128xf32> to vector<128xf32>
    %94 = vector.shape_cast %93 : vector<128xf32> to vector<1x128xf32>
    %cst_30 = arith.constant 9.99999993E-9 : f32
    %95 = vector.broadcast %cst_30 : f32 to vector<1x128xf32>
    %96 = arith.addf %94, %95 : vector<1x128xf32>
    %97 = math.rsqrt %96 : vector<1x128xf32>
    %98 = arith.mulf %96, %97 : vector<1x128xf32>
    %cst_31 = arith.constant 1.000000e+00 : f32
    %99 = vector.broadcast %cst_31 : f32 to vector<1x128xf32>
    %100 = arith.addf %99, %96 : vector<1x128xf32>
    %101 = tpu.reciprocal %100 {approx = true} : vector<1x128xf32> -> vector<1x128xf32>
    %102 = arith.mulf %98, %101 : vector<1x128xf32>
    %103 = vector.broadcast %102 : vector<1x128xf32> to vector<8x128xf32>
    %104 = arith.mulf %103, %91 : vector<8x128xf32>
    %105 = vector.shape_cast %104 : vector<8x128xf32> to vector<1x8x128xf32>
    %106 = vector.broadcast %105 : vector<1x8x128xf32> to vector<16x8x128xf32>
    %107 = arith.mulf %88, %106 : vector<16x8x128xf32>
    %cst_32 = arith.constant dense<0.000000e+00> : vector<16x128xf32>
    %108 = vector.multi_reduction <add>, %107, %cst_32 [1] : vector<16x8x128xf32> to vector<16x128xf32>
    %cst_33 = arith.constant dense<0xFF800000> : vector<128xf32>
    %109 = vector.multi_reduction <maximumf>, %108, %cst_33 [0] : vector<16x128xf32> to vector<128xf32>
    %110 = vector.shape_cast %109 : vector<128xf32> to vector<1x128xf32>
    %111 = vector.broadcast %110 : vector<1x128xf32> to vector<16x128xf32>
    %112 = arith.subf %108, %111 : vector<16x128xf32>
    %113 = math.exp %112 : vector<16x128xf32>
    %cst_34 = arith.constant dense<0.000000e+00> : vector<128xf32>
    %114 = vector.multi_reduction <add>, %113, %cst_34 [0] : vector<16x128xf32> to vector<128xf32>
    %115 = vector.shape_cast %114 : vector<128xf32> to vector<1x128xf32>
    %116 = tpu.reciprocal %115 {approx = true} : vector<1x128xf32> -> vector<1x128xf32>
    %117 = vector.broadcast %116 : vector<1x128xf32> to vector<16x128xf32>
    %118 = arith.mulf %113, %117 : vector<16x128xf32>
    %119 = vector.shape_cast %118 : vector<16x128xf32> to vector<16x1x128xf32>
    %120 = vector.broadcast %119 : vector<16x1x128xf32> to vector<16x8x128xf32>
    %121 = arith.mulf %120, %88 : vector<16x8x128xf32>
    %cst_35 = arith.constant dense<0.000000e+00> : vector<8x128xf32>
    %122 = vector.multi_reduction <add>, %121, %cst_35 [0] : vector<16x8x128xf32> to vector<8x128xf32>
    %123 = arith.mulf %122, %122 : vector<8x128xf32>
    %cst_36 = arith.constant dense<0.000000e+00> : vector<128xf32>
    %124 = vector.multi_reduction <add>, %123, %cst_36 [0] : vector<8x128xf32> to vector<128xf32>
    %125 = vector.shape_cast %124 : vector<128xf32> to vector<1x128xf32>
    %cst_37 = arith.constant 9.99999993E-9 : f32
    %126 = vector.broadcast %cst_37 : f32 to vector<1x128xf32>
    %127 = arith.addf %125, %126 : vector<1x128xf32>
    %128 = math.rsqrt %127 : vector<1x128xf32>
    %129 = arith.mulf %127, %128 : vector<1x128xf32>
    %cst_38 = arith.constant 1.000000e+00 : f32
    %130 = vector.broadcast %cst_38 : f32 to vector<1x128xf32>
    %131 = arith.addf %130, %127 : vector<1x128xf32>
    %132 = tpu.reciprocal %131 {approx = true} : vector<1x128xf32> -> vector<1x128xf32>
    %133 = arith.mulf %129, %132 : vector<1x128xf32>
    %134 = vector.broadcast %133 : vector<1x128xf32> to vector<8x128xf32>
    %135 = arith.mulf %134, %122 : vector<8x128xf32>
    %136 = vector.shape_cast %135 : vector<8x128xf32> to vector<1x8x128xf32>
    %137 = vector.broadcast %136 : vector<1x8x128xf32> to vector<16x8x128xf32>
    %138 = arith.mulf %88, %137 : vector<16x8x128xf32>
    %cst_39 = arith.constant dense<0.000000e+00> : vector<16x128xf32>
    %139 = vector.multi_reduction <add>, %138, %cst_39 [1] : vector<16x8x128xf32> to vector<16x128xf32>
    %140 = arith.addf %108, %139 : vector<16x128xf32>
    %cst_40 = arith.constant dense<0xFF800000> : vector<128xf32>
    %141 = vector.multi_reduction <maximumf>, %140, %cst_40 [0] : vector<16x128xf32> to vector<128xf32>
    %142 = vector.shape_cast %141 : vector<128xf32> to vector<1x128xf32>
    %143 = vector.broadcast %142 : vector<1x128xf32> to vector<16x128xf32>
    %144 = arith.subf %140, %143 : vector<16x128xf32>
    %145 = math.exp %144 : vector<16x128xf32>
    %cst_41 = arith.constant dense<0.000000e+00> : vector<128xf32>
    %146 = vector.multi_reduction <add>, %145, %cst_41 [0] : vector<16x128xf32> to vector<128xf32>
    %147 = vector.shape_cast %146 : vector<128xf32> to vector<1x128xf32>
    %148 = tpu.reciprocal %147 {approx = true} : vector<1x128xf32> -> vector<1x128xf32>
    %149 = vector.broadcast %148 : vector<1x128xf32> to vector<16x128xf32>
    %150 = arith.mulf %145, %149 : vector<16x128xf32>
    %151 = vector.shape_cast %150 : vector<16x128xf32> to vector<16x1x128xf32>
    %152 = vector.broadcast %151 : vector<16x1x128xf32> to vector<16x8x128xf32>
    %153 = arith.mulf %152, %88 : vector<16x8x128xf32>
    %cst_42 = arith.constant dense<0.000000e+00> : vector<8x128xf32>
    %154 = vector.multi_reduction <add>, %153, %cst_42 [0] : vector<16x8x128xf32> to vector<8x128xf32>
    %155 = arith.mulf %154, %154 : vector<8x128xf32>
    %cst_43 = arith.constant dense<0.000000e+00> : vector<128xf32>
    %156 = vector.multi_reduction <add>, %155, %cst_43 [0] : vector<8x128xf32> to vector<128xf32>
    %157 = vector.shape_cast %156 : vector<128xf32> to vector<1x128xf32>
    %cst_44 = arith.constant 9.99999993E-9 : f32
    %158 = vector.broadcast %cst_44 : f32 to vector<1x128xf32>
    %159 = arith.addf %157, %158 : vector<1x128xf32>
    %160 = math.rsqrt %159 : vector<1x128xf32>
    %161 = arith.mulf %159, %160 : vector<1x128xf32>
    %cst_45 = arith.constant 1.000000e+00 : f32
    %162 = vector.broadcast %cst_45 : f32 to vector<1x128xf32>
    %163 = arith.addf %162, %159 : vector<1x128xf32>
    %164 = tpu.reciprocal %163 {approx = true} : vector<1x128xf32> -> vector<1x128xf32>
    %165 = arith.mulf %161, %164 : vector<1x128xf32>
    %166 = vector.broadcast %165 : vector<1x128xf32> to vector<8x128xf32>
    %167 = arith.mulf %166, %154 : vector<8x128xf32>
    %c1 = arith.constant 1 : index
    %c0_46 = arith.constant 0 : index
    %c0_47 = arith.constant 0 : index
    %168 = vector.load %arg3[%c1, %c0_46, %c0_47] : memref<4x8x128xf32, #tpu.memory_space<vmem>>, vector<1x8x128xf32>
    %169 = vector.shape_cast %168 : vector<1x8x128xf32> to vector<8x128xf32>
    %170 = vector.shape_cast %167 : vector<8x128xf32> to vector<1x8x128xf32>
    tpu.vector_store %arg3[%c1, %c0_46, %c0_47], %170 {strides = array<i32>} : memref<4x8x128xf32, #tpu.memory_space<vmem>>, vector<1x8x128xf32>,
    %c256 = arith.constant 256 : index
    %c0_48 = arith.constant 0 : index
    %171 = vector.load %arg2[%c256, %c0_48] : memref<512x128xbf16, #tpu.memory_space<vmem>>, vector<128x128xbf16>
    %cst_49 = arith.constant dense<0.000000e+00> : vector<128x128xf32>
    %172 = tpu.matmul %171, %0, %cst_49 {dimension_numbers = #tpu.dot_dimension_numbers<[1], [0], [0], [1], [0, 0, 1, 1], [], []>} : vector<128x128xbf16>, vector<128x128xbf16>, vector<128x128xf32> -> vector<128x128xf32>
    %173 = vector.shape_cast %172 : vector<128x128xf32> to vector<16x8x128xf32>
    %cst_50 = arith.constant dense<0.000000e+00> : vector<8x128xf32>
    %174 = vector.multi_reduction <add>, %173, %cst_50 [0] : vector<16x8x128xf32> to vector<8x128xf32>
    %cst_51 = arith.constant 6.250000e-02 : f32
    %175 = vector.broadcast %cst_51 : f32 to vector<8x128xf32>
    %176 = arith.mulf %174, %175 : vector<8x128xf32>
    %177 = arith.mulf %176, %176 : vector<8x128xf32>
    %cst_52 = arith.constant dense<0.000000e+00> : vector<128xf32>
    %178 = vector.multi_reduction <add>, %177, %cst_52 [0] : vector<8x128xf32> to vector<128xf32>
    %179 = vector.shape_cast %178 : vector<128xf32> to vector<1x128xf32>
    %cst_53 = arith.constant 9.99999993E-9 : f32
    %180 = vector.broadcast %cst_53 : f32 to vector<1x128xf32>
    %181 = arith.addf %179, %180 : vector<1x128xf32>
    %182 = math.rsqrt %181 : vector<1x128xf32>
    %183 = arith.mulf %181, %182 : vector<1x128xf32>
    %cst_54 = arith.constant 1.000000e+00 : f32
    %184 = vector.broadcast %cst_54 : f32 to vector<1x128xf32>
    %185 = arith.addf %184, %181 : vector<1x128xf32>
    %186 = tpu.reciprocal %185 {approx = true} : vector<1x128xf32> -> vector<1x128xf32>
    %187 = arith.mulf %183, %186 : vector<1x128xf32>
    %188 = vector.broadcast %187 : vector<1x128xf32> to vector<8x128xf32>
    %189 = arith.mulf %188, %176 : vector<8x128xf32>
    %190 = vector.shape_cast %189 : vector<8x128xf32> to vector<1x8x128xf32>
    %191 = vector.broadcast %190 : vector<1x8x128xf32> to vector<16x8x128xf32>
    %192 = arith.mulf %173, %191 : vector<16x8x128xf32>
    %cst_55 = arith.constant dense<0.000000e+00> : vector<16x128xf32>
    %193 = vector.multi_reduction <add>, %192, %cst_55 [1] : vector<16x8x128xf32> to vector<16x128xf32>
    %cst_56 = arith.constant dense<0xFF800000> : vector<128xf32>
    %194 = vector.multi_reduction <maximumf>, %193, %cst_56 [0] : vector<16x128xf32> to vector<128xf32>
    %195 = vector.shape_cast %194 : vector<128xf32> to vector<1x128xf32>
    %196 = vector.broadcast %195 : vector<1x128xf32> to vector<16x128xf32>
    %197 = arith.subf %193, %196 : vector<16x128xf32>
    %198 = math.exp %197 : vector<16x128xf32>
    %cst_57 = arith.constant dense<0.000000e+00> : vector<128xf32>
    %199 = vector.multi_reduction <add>, %198, %cst_57 [0] : vector<16x128xf32> to vector<128xf32>
    %200 = vector.shape_cast %199 : vector<128xf32> to vector<1x128xf32>
    %201 = tpu.reciprocal %200 {approx = true} : vector<1x128xf32> -> vector<1x128xf32>
    %202 = vector.broadcast %201 : vector<1x128xf32> to vector<16x128xf32>
    %203 = arith.mulf %198, %202 : vector<16x128xf32>
    %204 = vector.shape_cast %203 : vector<16x128xf32> to vector<16x1x128xf32>
    %205 = vector.broadcast %204 : vector<16x1x128xf32> to vector<16x8x128xf32>
    %206 = arith.mulf %205, %173 : vector<16x8x128xf32>
    %cst_58 = arith.constant dense<0.000000e+00> : vector<8x128xf32>
    %207 = vector.multi_reduction <add>, %206, %cst_58 [0] : vector<16x8x128xf32> to vector<8x128xf32>
    %208 = arith.mulf %207, %207 : vector<8x128xf32>
    %cst_59 = arith.constant dense<0.000000e+00> : vector<128xf32>
    %209 = vector.multi_reduction <add>, %208, %cst_59 [0] : vector<8x128xf32> to vector<128xf32>
    %210 = vector.shape_cast %209 : vector<128xf32> to vector<1x128xf32>
    %cst_60 = arith.constant 9.99999993E-9 : f32
    %211 = vector.broadcast %cst_60 : f32 to vector<1x128xf32>
    %212 = arith.addf %210, %211 : vector<1x128xf32>
    %213 = math.rsqrt %212 : vector<1x128xf32>
    %214 = arith.mulf %212, %213 : vector<1x128xf32>
    %cst_61 = arith.constant 1.000000e+00 : f32
    %215 = vector.broadcast %cst_61 : f32 to vector<1x128xf32>
    %216 = arith.addf %215, %212 : vector<1x128xf32>
    %217 = tpu.reciprocal %216 {approx = true} : vector<1x128xf32> -> vector<1x128xf32>
    %218 = arith.mulf %214, %217 : vector<1x128xf32>
    %219 = vector.broadcast %218 : vector<1x128xf32> to vector<8x128xf32>
    %220 = arith.mulf %219, %207 : vector<8x128xf32>
    %221 = vector.shape_cast %220 : vector<8x128xf32> to vector<1x8x128xf32>
    %222 = vector.broadcast %221 : vector<1x8x128xf32> to vector<16x8x128xf32>
    %223 = arith.mulf %173, %222 : vector<16x8x128xf32>
    %cst_62 = arith.constant dense<0.000000e+00> : vector<16x128xf32>
    %224 = vector.multi_reduction <add>, %223, %cst_62 [1] : vector<16x8x128xf32> to vector<16x128xf32>
    %225 = arith.addf %193, %224 : vector<16x128xf32>
    %cst_63 = arith.constant dense<0xFF800000> : vector<128xf32>
    %226 = vector.multi_reduction <maximumf>, %225, %cst_63 [0] : vector<16x128xf32> to vector<128xf32>
    %227 = vector.shape_cast %226 : vector<128xf32> to vector<1x128xf32>
    %228 = vector.broadcast %227 : vector<1x128xf32> to vector<16x128xf32>
    %229 = arith.subf %225, %228 : vector<16x128xf32>
    %230 = math.exp %229 : vector<16x128xf32>
    %cst_64 = arith.constant dense<0.000000e+00> : vector<128xf32>
    %231 = vector.multi_reduction <add>, %230, %cst_64 [0] : vector<16x128xf32> to vector<128xf32>
    %232 = vector.shape_cast %231 : vector<128xf32> to vector<1x128xf32>
    %233 = tpu.reciprocal %232 {approx = true} : vector<1x128xf32> -> vector<1x128xf32>
    %234 = vector.broadcast %233 : vector<1x128xf32> to vector<16x128xf32>
    %235 = arith.mulf %230, %234 : vector<16x128xf32>
    %236 = vector.shape_cast %235 : vector<16x128xf32> to vector<16x1x128xf32>
    %237 = vector.broadcast %236 : vector<16x1x128xf32> to vector<16x8x128xf32>
    %238 = arith.mulf %237, %173 : vector<16x8x128xf32>
    %cst_65 = arith.constant dense<0.000000e+00> : vector<8x128xf32>
    %239 = vector.multi_reduction <add>, %238, %cst_65 [0] : vector<16x8x128xf32> to vector<8x128xf32>
    %240 = arith.mulf %239, %239 : vector<8x128xf32>
    %cst_66 = arith.constant dense<0.000000e+00> : vector<128xf32>
    %241 = vector.multi_reduction <add>, %240, %cst_66 [0] : vector<8x128xf32> to vector<128xf32>
    %242 = vector.shape_cast %241 : vector<128xf32> to vector<1x128xf32>
    %cst_67 = arith.constant 9.99999993E-9 : f32
    %243 = vector.broadcast %cst_67 : f32 to vector<1x128xf32>
    %244 = arith.addf %242, %243 : vector<1x128xf32>
    %245 = math.rsqrt %244 : vector<1x128xf32>
    %246 = arith.mulf %244, %245 : vector<1x128xf32>
    %cst_68 = arith.constant 1.000000e+00 : f32
    %247 = vector.broadcast %cst_68 : f32 to vector<1x128xf32>
    %248 = arith.addf %247, %244 : vector<1x128xf32>
    %249 = tpu.reciprocal %248 {approx = true} : vector<1x128xf32> -> vector<1x128xf32>
    %250 = arith.mulf %246, %249 : vector<1x128xf32>
    %251 = vector.broadcast %250 : vector<1x128xf32> to vector<8x128xf32>
    %252 = arith.mulf %251, %239 : vector<8x128xf32>
    %c2 = arith.constant 2 : index
    %c0_69 = arith.constant 0 : index
    %c0_70 = arith.constant 0 : index
    %253 = vector.load %arg3[%c2, %c0_69, %c0_70] : memref<4x8x128xf32, #tpu.memory_space<vmem>>, vector<1x8x128xf32>
    %254 = vector.shape_cast %253 : vector<1x8x128xf32> to vector<8x128xf32>
    %255 = vector.shape_cast %252 : vector<8x128xf32> to vector<1x8x128xf32>
    tpu.vector_store %arg3[%c2, %c0_69, %c0_70], %255 {strides = array<i32>} : memref<4x8x128xf32, #tpu.memory_space<vmem>>, vector<1x8x128xf32>,
    %c384 = arith.constant 384 : index
    %c0_71 = arith.constant 0 : index
    %256 = vector.load %arg2[%c384, %c0_71] : memref<512x128xbf16, #tpu.memory_space<vmem>>, vector<128x128xbf16>
    %cst_72 = arith.constant dense<0.000000e+00> : vector<128x128xf32>
    %257 = tpu.matmul %256, %0, %cst_72 {dimension_numbers = #tpu.dot_dimension_numbers<[1], [0], [0], [1], [0, 0, 1, 1], [], []>} : vector<128x128xbf16>, vector<128x128xbf16>, vector<128x128xf32> -> vector<128x128xf32>
    %258 = vector.shape_cast %257 : vector<128x128xf32> to vector<16x8x128xf32>
    %cst_73 = arith.constant dense<0.000000e+00> : vector<8x128xf32>
    %259 = vector.multi_reduction <add>, %258, %cst_73 [0] : vector<16x8x128xf32> to vector<8x128xf32>
    %cst_74 = arith.constant 6.250000e-02 : f32
    %260 = vector.broadcast %cst_74 : f32 to vector<8x128xf32>
    %261 = arith.mulf %259, %260 : vector<8x128xf32>
    %262 = arith.mulf %261, %261 : vector<8x128xf32>
    %cst_75 = arith.constant dense<0.000000e+00> : vector<128xf32>
    %263 = vector.multi_reduction <add>, %262, %cst_75 [0] : vector<8x128xf32> to vector<128xf32>
    %264 = vector.shape_cast %263 : vector<128xf32> to vector<1x128xf32>
    %cst_76 = arith.constant 9.99999993E-9 : f32
    %265 = vector.broadcast %cst_76 : f32 to vector<1x128xf32>
    %266 = arith.addf %264, %265 : vector<1x128xf32>
    %267 = math.rsqrt %266 : vector<1x128xf32>
    %268 = arith.mulf %266, %267 : vector<1x128xf32>
    %cst_77 = arith.constant 1.000000e+00 : f32
    %269 = vector.broadcast %cst_77 : f32 to vector<1x128xf32>
    %270 = arith.addf %269, %266 : vector<1x128xf32>
    %271 = tpu.reciprocal %270 {approx = true} : vector<1x128xf32> -> vector<1x128xf32>
    %272 = arith.mulf %268, %271 : vector<1x128xf32>
    %273 = vector.broadcast %272 : vector<1x128xf32> to vector<8x128xf32>
    %274 = arith.mulf %273, %261 : vector<8x128xf32>
    %275 = vector.shape_cast %274 : vector<8x128xf32> to vector<1x8x128xf32>
    %276 = vector.broadcast %275 : vector<1x8x128xf32> to vector<16x8x128xf32>
    %277 = arith.mulf %258, %276 : vector<16x8x128xf32>
    %cst_78 = arith.constant dense<0.000000e+00> : vector<16x128xf32>
    %278 = vector.multi_reduction <add>, %277, %cst_78 [1] : vector<16x8x128xf32> to vector<16x128xf32>
    %cst_79 = arith.constant dense<0xFF800000> : vector<128xf32>
    %279 = vector.multi_reduction <maximumf>, %278, %cst_79 [0] : vector<16x128xf32> to vector<128xf32>
    %280 = vector.shape_cast %279 : vector<128xf32> to vector<1x128xf32>
    %281 = vector.broadcast %280 : vector<1x128xf32> to vector<16x128xf32>
    %282 = arith.subf %278, %281 : vector<16x128xf32>
    %283 = math.exp %282 : vector<16x128xf32>
    %cst_80 = arith.constant dense<0.000000e+00> : vector<128xf32>
    %284 = vector.multi_reduction <add>, %283, %cst_80 [0] : vector<16x128xf32> to vector<128xf32>
    %285 = vector.shape_cast %284 : vector<128xf32> to vector<1x128xf32>
    %286 = tpu.reciprocal %285 {approx = true} : vector<1x128xf32> -> vector<1x128xf32>
    %287 = vector.broadcast %286 : vector<1x128xf32> to vector<16x128xf32>
    %288 = arith.mulf %283, %287 : vector<16x128xf32>
    %289 = vector.shape_cast %288 : vector<16x128xf32> to vector<16x1x128xf32>
    %290 = vector.broadcast %289 : vector<16x1x128xf32> to vector<16x8x128xf32>
    %291 = arith.mulf %290, %258 : vector<16x8x128xf32>
    %cst_81 = arith.constant dense<0.000000e+00> : vector<8x128xf32>
    %292 = vector.multi_reduction <add>, %291, %cst_81 [0] : vector<16x8x128xf32> to vector<8x128xf32>
    %293 = arith.mulf %292, %292 : vector<8x128xf32>
    %cst_82 = arith.constant dense<0.000000e+00> : vector<128xf32>
    %294 = vector.multi_reduction <add>, %293, %cst_82 [0] : vector<8x128xf32> to vector<128xf32>
    %295 = vector.shape_cast %294 : vector<128xf32> to vector<1x128xf32>
    %cst_83 = arith.constant 9.99999993E-9 : f32
    %296 = vector.broadcast %cst_83 : f32 to vector<1x128xf32>
    %297 = arith.addf %295, %296 : vector<1x128xf32>
    %298 = math.rsqrt %297 : vector<1x128xf32>
    %299 = arith.mulf %297, %298 : vector<1x128xf32>
    %cst_84 = arith.constant 1.000000e+00 : f32
    %300 = vector.broadcast %cst_84 : f32 to vector<1x128xf32>
    %301 = arith.addf %300, %297 : vector<1x128xf32>
    %302 = tpu.reciprocal %301 {approx = true} : vector<1x128xf32> -> vector<1x128xf32>
    %303 = arith.mulf %299, %302 : vector<1x128xf32>
    %304 = vector.broadcast %303 : vector<1x128xf32> to vector<8x128xf32>
    %305 = arith.mulf %304, %292 : vector<8x128xf32>
    %306 = vector.shape_cast %305 : vector<8x128xf32> to vector<1x8x128xf32>
    %307 = vector.broadcast %306 : vector<1x8x128xf32> to vector<16x8x128xf32>
    %308 = arith.mulf %258, %307 : vector<16x8x128xf32>
    %cst_85 = arith.constant dense<0.000000e+00> : vector<16x128xf32>
    %309 = vector.multi_reduction <add>, %308, %cst_85 [1] : vector<16x8x128xf32> to vector<16x128xf32>
    %310 = arith.addf %278, %309 : vector<16x128xf32>
    %cst_86 = arith.constant dense<0xFF800000> : vector<128xf32>
    %311 = vector.multi_reduction <maximumf>, %310, %cst_86 [0] : vector<16x128xf32> to vector<128xf32>
    %312 = vector.shape_cast %311 : vector<128xf32> to vector<1x128xf32>
    %313 = vector.broadcast %312 : vector<1x128xf32> to vector<16x128xf32>
    %314 = arith.subf %310, %313 : vector<16x128xf32>
    %315 = math.exp %314 : vector<16x128xf32>
    %cst_87 = arith.constant dense<0.000000e+00> : vector<128xf32>
    %316 = vector.multi_reduction <add>, %315, %cst_87 [0] : vector<16x128xf32> to vector<128xf32>
    %317 = vector.shape_cast %316 : vector<128xf32> to vector<1x128xf32>
    %318 = tpu.reciprocal %317 {approx = true} : vector<1x128xf32> -> vector<1x128xf32>
    %319 = vector.broadcast %318 : vector<1x128xf32> to vector<16x128xf32>
    %320 = arith.mulf %315, %319 : vector<16x128xf32>
    %321 = vector.shape_cast %320 : vector<16x128xf32> to vector<16x1x128xf32>
    %322 = vector.broadcast %321 : vector<16x1x128xf32> to vector<16x8x128xf32>
    %323 = arith.mulf %322, %258 : vector<16x8x128xf32>
    %cst_88 = arith.constant dense<0.000000e+00> : vector<8x128xf32>
    %324 = vector.multi_reduction <add>, %323, %cst_88 [0] : vector<16x8x128xf32> to vector<8x128xf32>
    %325 = arith.mulf %324, %324 : vector<8x128xf32>
    %cst_89 = arith.constant dense<0.000000e+00> : vector<128xf32>
    %326 = vector.multi_reduction <add>, %325, %cst_89 [0] : vector<8x128xf32> to vector<128xf32>
    %327 = vector.shape_cast %326 : vector<128xf32> to vector<1x128xf32>
    %cst_90 = arith.constant 9.99999993E-9 : f32
    %328 = vector.broadcast %cst_90 : f32 to vector<1x128xf32>
    %329 = arith.addf %327, %328 : vector<1x128xf32>
    %330 = math.rsqrt %329 : vector<1x128xf32>
    %331 = arith.mulf %329, %330 : vector<1x128xf32>
    %cst_91 = arith.constant 1.000000e+00 : f32
    %332 = vector.broadcast %cst_91 : f32 to vector<1x128xf32>
    %333 = arith.addf %332, %329 : vector<1x128xf32>
    %334 = tpu.reciprocal %333 {approx = true} : vector<1x128xf32> -> vector<1x128xf32>
    %335 = arith.mulf %331, %334 : vector<1x128xf32>
    %336 = vector.broadcast %335 : vector<1x128xf32> to vector<8x128xf32>
    %337 = arith.mulf %336, %324 : vector<8x128xf32>
    %c3 = arith.constant 3 : index
    %c0_92 = arith.constant 0 : index
    %c0_93 = arith.constant 0 : index
    %338 = vector.load %arg3[%c3, %c0_92, %c0_93] : memref<4x8x128xf32, #tpu.memory_space<vmem>>, vector<1x8x128xf32>
    %339 = vector.shape_cast %338 : vector<1x8x128xf32> to vector<8x128xf32>
    %340 = vector.shape_cast %337 : vector<8x128xf32> to vector<1x8x128xf32>
    tpu.vector_store %arg3[%c3, %c0_92, %c0_93], %340 {strides = array<i32>} : memref<4x8x128xf32, #tpu.memory_space<vmem>>, vector<1x8x128xf32>,
    return
  }
  func.func @transform_0(%arg0: i32) -> (i32, i32) {
    %c0_i32 = arith.constant 0 : i32
    %c0_i32_0 = arith.constant 0 : i32
    return %c0_i32, %arg0 : i32, i32
  }
  func.func @transform_1(%arg0: i32) -> (i32, i32) {
    %c0_i32 = arith.constant 0 : i32
    %c0_i32_0 = arith.constant 0 : i32
    %c0_i32_1 = arith.constant 0 : i32
    return %c0_i32, %c0_i32_0 : i32, i32
  }
  func.func @transform_2(%arg0: i32) -> (i32, i32, i32) {
    %c0_i32 = arith.constant 0 : i32
    %c0_i32_0 = arith.constant 0 : i32
    %c0_i32_1 = arith.constant 0 : i32
    return %c0_i32, %c0_i32_0, %arg0 : i32, i32, i32
  }
}

</mosaic_0001>

<bundles_post_ra>
// kernel: tpu_custom_call.1
= control target key start
LH: loop header
LB: loop body
LE: loop exit
PB: predicated region body
PF: predicated region fallthrough
CT: control target
= control target key end

     0   :  { %7 = vsyncpa [#allocation3], 0  ;;  %s7595_s0 = inlined_call_operand.hbm [shape: bf16[128,256], index: 0, kind: input, shape index: {}]   ;;  %s7596_s1 = inlined_call_operand.hbm [shape: bf16[512,128], index: 1, kind: input, shape index: {}]   ;;  %s7597_s2 = inlined_call_operand.hbm [shape: f32[4,8,256], index: 2, kind: output, shape index: {}]  }
   0x1   :  { %9 = vsyncpa [#allocation3 + $0x1], 0 }
   0x2   :  { %10 = vsyncpa [#allocation6], 0 }
   0x3   :  { %11 = vsyncpa [#allocation4], 0 }
   0x4   :  { %13 = vsyncpa [#allocation4 + $0x1], 0  ;;  %s4869_s9 = smov 0   ;;  %s4871_s10 = smov 0  }
   0x5   :  { %s4873_s11 = smov 0   ;;  %s4875_s12 = smov 0  }
   0x6 LB: > { %s4890_s13 = sadd.s32 4294967295, %s4843_s12   ;;  %s4043_s14 = sadd.s32 4294967294, %s4843_s12   ;;  %s4843_s12 = sphi %s4875_s12, %s8275_s12   ;;  %s4839_s11 = sphi %s4873_s11, %s8274_s11   ;;  %s4835_s10 = sphi %s4871_s10, %s8273_s10   ;;  %s4831_s9 = sphi %s4869_s9, %s8272_s9  }
   0x7   : > { %s4894_s15 = sadd.s32 1, %s4843_s12   ;;  %s26_s16 = sadd.s32 1, %s4839_s11 }
   0x8   : > { %s23_s17 = ssub.s32 %s4843_s12, %s4894_s15  ;;  %p33_p0 = scmp.ne.s32.totalorder %s4839_s11, %s4835_s10 }
   0x9   : > { %p24_p1 = scmp.eq.s32.totalorder %s23_s17, 0  ;;  %p34_p2 = scmp.eq.s32.totalorder %s4843_s12, 0 }
   0xa   : > { %p39_p3 = scmp.ne.s32.totalorder %s4835_s10, %s4831_s9  ;;  %p7598_p4 = scmp.eq.s32.totalorder %s4890_s13, 0 }
   0xb   : > { %s4906_s18 = scalar_select %p24_p1, %s4839_s11, %s26_s16  }
   0xc   : > { %p4908_p5 = por %p34_p2, %p33_p0  ;;  %p4914_p6 = por %p7598_p4, %p39_p3 }
   0xd   : > { %p84_p7 = scmp.eq.s32.totalorder %s4890_s13, 1  ;;  %p90_p8 = scmp.eq.s32.totalorder %s4043_s14, 1 }
   0xe   : > { %s7835_s19 = scalar_select %p4908_p5, 1, 0 }
   0xf   : > { %s7836_s20 = scalar_select %p4914_p6, 1, 0 }
  0x10   : > { %p4044_p9 = scmp.ge.s32.totalorder %s4843_s12, 1  ;;  %p97_p10 = scmp.lt.s32.totalorder %s4843_s12, 3 }
  0x11   : > { %p4921_p11 = por %p84_p7, %p33_p0  ;;  %p4925_p12 = por %p90_p8, %p39_p3 }
  0x12   : > { %p4929_p13 = pnand %p4044_p9, %p97_p10  ;;  %s4845_s24 = smov [#allocation5]  }
  0x13   : > { %s7837_s21 = scalar_select %p4921_p11, 1, 0 }
  0x14   : > { %s7838_s22 = scalar_select %p4925_p12, 1, 0 }
  0x15   : > { %s7839_s23 = scalar_select %p4929_p13, 1, 0 }
  0x16   : > { %p4300_p1 = pneg %p4929_p13  ;;  %s109_s25 = sshll.u32 %s4845_s24, 4  ;;  %s110_s25 = int_to_ptr.vmem [resolvable:$true] %s109_s25 }
  0x17   : > { %s123_s27 = sand.u32 1, %s4839_s11   ;;  %s4715_s30 = scalar_lea.hbm %s7596_s1, 4096 }
  0x18   : > { %p4937_p2 = pnand %p4300_p1, %p7598_p4  ;;  %p4716_p7 = scmp.ne.s32.totalorder %s7596_s1, %s4715_s30 }
  0x19   : > { %p4722_p1 = scmp.lt.u32.totalorder %s4715_s30, %s7596_s1 }
  0x1a   : > { %p4717_p8 = pneg %p4937_p2 }
  0x1c   : > { %p4718_p9 = pnand %p4717_p8, %p4716_p7 }
  0x1e   : > { %p4719_p10 = pneg %p4718_p9 }
  0x20   : > { %p4724_p4 = pnand %p4722_p1, %p4719_p10 }
  0x22   : > { %4727 = shalt.err (!%p4724_p4)
}
  0x23   : > { %s4728_s7 = scalar_lea.vmem %s110_s25, 4096  ;;  %p4736_p11 = scmp.lt.s32.totalorder %s110_s25, %s110_s25 }
  0x24   : > { %p4729_p0 = scmp.ne.s32.totalorder %s110_s25, %s4728_s7  ;;  %p4737_p6 = scmp.lt.s32.totalorder %s4728_s7, %s4728_s7 }
  0x26   : > { %p4731_p3 = pnand %p4729_p0, %p4717_p8  ;;  %p4738_p13 = por %p4737_p6, %p4736_p11 }
  0x28   : > { %p4732_p12 = pneg %p4731_p3 }
  0x2a   : > { %p4739_p5 = pnand %p4738_p13, %p4732_p12 }
  0x2c   : > { %4742 = shalt.err (!%p4739_p5)
}
  0x2d   : > { %s4846_s8 = smov 64   ;;  %s4847_s14 = smov 4  }
  0x2e   : > { %4303 = dma.hbm_to_vmem [thread:$0]  (!%p4937_p2), %s7596_s1, 4096, %s110_s25, [#allocation6], %s4846_s8, %s4846_s8, %s4847_s14  }
  0x2f   : > { %p7841_p4 = scmp.ne.s32.totalorder %s7835_s19, 0  ;;  %p7842_p0 = scmp.lt.s32.totalorder %s4843_s12, 2 }
  0x30   : > { %s4047_s28 = sshll.u32 %s123_s27, 6  ;;  %s4048_s29 = sshll.u32 %s4843_s12, 6 }
  0x31   : > { %p4967_p3 = pnand %p7842_p0, %p7841_p4  ;;  %s4975_s26 = scalar_lea.hbm %s7595_s0, %s4048_s29 }
  0x32   : > { %s127_s25 = scalar_lea.vmem [#allocation2], %s4047_s28  ;;  %s4979_s4 = scalar_lea.sflag [#allocation3], %s123_s27 }
  0x33   : > { %s133_s19 = sshll.u32 %s127_s25, 4  ;;  %s4743_s5 = scalar_lea.hbm %s4975_s26, 1024  ;;  %s4977_s19 = int_to_ptr.vmem [resolvable:$true] %s133_s19 }
  0x34   : > { %p4744_p5 = scmp.ne.s32.totalorder %s4975_s26, %s4743_s5  ;;  %p4745_p6 = pneg %p4967_p3 }
  0x35   : > { %s4748_s16 = scalar_lea.hbm %s7595_s0, 2048  ;;  %p4749_p13 = scmp.lt.u32.totalorder %s4975_s26, %s7595_s0 }
  0x36   : > { %p4746_p11 = pnand %p4745_p6, %p4744_p5  ;;  %p4750_p2 = scmp.lt.u32.totalorder %s4748_s16, %s4743_s5 }
  0x37   : > { %p4752_p8 = scmp.lt.u32.totalorder %s4743_s5, %s4975_s26 }
  0x38   : > { %p4747_p12 = pneg %p4746_p11  ;;  %p4751_p7 = por %p4750_p2, %p4749_p13 }
  0x3a   : > { %p4753_p9 = por %p4752_p8, %p4751_p7 }
  0x3c   : > { %p4754_p10 = pnand %p4753_p9, %p4747_p12 }
  0x3e   : > { %4757 = shalt.err (!%p4754_p10)
}
  0x3f   : > { %s4758_s27 = scalar_lea.vmem %s4977_s19, 1024  ;;  %s4848_s28 = smov [#allocation2]  }
  0x40   : > { %p4759_p1 = scmp.ne.s32.totalorder %s4977_s19, %s4758_s27  ;;  %s4763_s30 = sshll.u32 %s4848_s28, 4  ;;  %s4764_s30 = int_to_ptr.vmem [resolvable:$false] %s4763_s30 }
  0x41   : > { %s4765_s3 = scalar_lea.vmem %s4764_s30, 2048  ;;  %p4766_p5 = scmp.lt.s32.totalorder %s4977_s19, %s4764_s30 }
  0x42   : > { %p4761_p4 = pnand %p4759_p1, %p4745_p6  ;;  %p4767_p11 = scmp.lt.s32.totalorder %s4765_s3, %s4758_s27 }
  0x44   : > { %p4762_p0 = pneg %p4761_p4  ;;  %p4768_p13 = por %p4767_p11, %p4766_p5 }
  0x46   : > { %p4769_p2 = pnand %p4768_p13, %p4762_p0 }
  0x48   : > { %4772 = shalt.err (!%p4769_p2)
}
  0x49   : > { %s4849_s25 = smov 128   ;;  %p7844_p6 = scmp.ne.s32.totalorder %s7839_s23, 0 }
  0x4a   : > { %4307 = dma.hbm_to_vmem [thread:$0]  (!%p4967_p3), %s4975_s26, 1024, %s4977_s19, %s4979_s4, %s4849_s25, %s4846_s8, %s4847_s14  }
  0x4b   : > { %145 = sbr.rel (%p7844_p6) target bundleno = 1257 (0x4e9), region = 28 }
  0x52   : > { %s5012_s5 = sand.u32 1, %s4835_s10   ;;  %p7845_p12 = scmp.ne.s32.totalorder %s7836_s20, 0 }
  0x53   : > { %s4050_s6 = sshll.u32 %s5012_s5, 6  ;;  %s148_s7 = scalar_lea.sflag [#allocation3], %s5012_s5 }
  0x54   : > { %s5016_s16 = scalar_lea.vmem [#allocation2], %s4050_s6 }
  0x55   : > { %4818 = dma.done.wait (%p7845_p12), %s148_s7, 1024  }
  0x56   : > { %4820 = vsyncadd (%p7845_p12), %s148_s7, 4294966272  ;;  %p7846_p3 = scmp.eq.s32.totalorder %s4890_s13, 0 }
  0x58   : > { %4822 = dma.done.wait (%p7846_p3), [#allocation6], 4096   ;;  %p7847_p7 = pmov %p7846_p3 }
  0x59   : > { %v4355_v0 = vld [vmem:[%s5016_s16] sm:$0xff]   ;;  %v4356_v1 = vld [vmem:[%s5016_s16 + $0x8] sm:$0xff]   ;;  %v4357_v2 = vld [vmem:[%s5016_s16 + $0x10] sm:$0xff]   ;;  %vm624_vm0 = vcmask 1041409   ;;  %vm627_vm1 = vcmask 1042434   ;;  %vm630_vm2 = vcmask 1043459  }
  0x5a   : > { %4824 = vsyncadd (%p7847_p7), [#allocation6], 4294963200  ;;  %4164 = vmatprep.subr.bf16.mxu0 %v4355_v0  ;;  %4196 = vmatprep.subr.bf16.mxu1 %v4355_v0  ;;  %v5030_v3 = vld [vmem:[%s5016_s16 + $0x18] sm:$0xff]   ;;  %v4363_v4 = vld [vmem:[#allocation5] sm:$0xff]   ;;  %vm633_vm3 = vcmask 1044484   ;;  %vm636_vm4 = vcmask 1045509  }
  0x5b   : > { %4165 = vmatpush3.bf16.msra.mxu0 %v4355_v0  ;;  %4197 = vmatpush3.bf16.msra.mxu1 %v4355_v0  ;;  %v4364_v5 = vld [vmem:[#allocation5 + $0x40] sm:$0xff]   ;;  %v5042_v7 = vld [vmem:[%s5016_s16 + $0x28] sm:$0xff]   ;;  %v5049_v8 = vld [vmem:[%s5016_s16 + $0x30] sm:$0xff]   ;;  %vm639_vm5 = vcmask 1046534   ;;  %vm642_vm6 = vcmask 1047559   ;;  %s4052_s20 = sshll.u32 %s5012_s5, 5 }
  0x5c   : > { %4166 = vmatprep.subr.bf16.mxu0 %v4356_v1  ;;  %4198 = vmatprep.subr.bf16.mxu1 %v4356_v1  ;;  %v5035_v6 = vld [vmem:[%s5016_s16 + $0x20] sm:$0xff]   ;;  %v5056_v9 = vld [vmem:[%s5016_s16 + $0x38] sm:$0xff]   ;;  %v4365_v10 = vld [vmem:[#allocation5 + $0x8] sm:$0xff]   ;;  %s6570_s23 = scalar_lea.vmem [#allocation7], %s4052_s20  ;;  %s4097_s8 = sshll.u32 %s4890_s13, 7 }
  0x5d   : > { %4180 = vmatprep.mubr.bf16.mxu0 %v4363_v4  ;;  %4212 = vmatprep.mubr.bf16.mxu1 %v4364_v5  ;;  %v4366_v11 = vld [vmem:[#allocation5 + $0x48] sm:$0xff]   ;;  %v4367_v12 = vld [vmem:[#allocation5 + $0x10] sm:$0xff]   ;;  %v4369_v14 = vld [vmem:[#allocation5 + $0x18] sm:$0xff]   ;;  %s3960_s14 = sshll.u32 %s6570_s23, 4  ;;  %s7548_s19 = scalar_lea.hbm %s7597_s2, %s4097_s8  ;;  %s7550_s14 = int_to_ptr.vmem [resolvable:$true] %s3960_s14 }
  0x5e   : > { %v4368_v13 = vld [vmem:[#allocation5 + $0x50] sm:$0xff]   ;;  %v4370_v15 = vld [vmem:[#allocation5 + $0x58] sm:$0xff]   ;;  %v4371_v16 = vld [vmem:[#allocation5 + $0x20] sm:$0xff]   ;;  %s3948_s4 = scalar_lea.sflag [#allocation4], %s5012_s5  ;;  %s4773_s17 = scalar_lea.vmem %s7550_s14, 512 }
  0x5f   : > { %4167 = vmatpush3.bf16.msra.mxu0 %v4356_v1  ;;  %4199 = vmatpush3.bf16.msra.mxu1 %v4356_v1  ;;  %v4372_v17 = vld [vmem:[#allocation5 + $0x60] sm:$0xff]   ;;  %v4373_v18 = vld [vmem:[#allocation5 + $0x28] sm:$0xff]   ;;  %v4375_v20 = vld [vmem:[#allocation5 + $0x30] sm:$0xff]   ;;  %p4774_p8 = scmp.ne.s32.totalorder %s7550_s14, %s4773_s17  ;;  %p8269_p9 = scmp.ne.s32.totalorder %s7837_s21, 0 }
  0x60   : > { %4168 = vmatprep.subr.bf16.mxu0 %v4357_v2  ;;  %4200 = vmatprep.subr.bf16.mxu1 %v4357_v2  ;;  %v4374_v19 = vld [vmem:[#allocation5 + $0x68] sm:$0xff]   ;;  %v4376_v21 = vld [vmem:[#allocation5 + $0x70] sm:$0xff]   ;;  %v4377_v22 = vld [vmem:[#allocation5 + $0x38] sm:$0xff]   ;;  %s4850_s13 = smov [#allocation7]  }
  0x61   : > { %v4378_v23 = vld [vmem:[#allocation5 + $0x78] sm:$0xff]   ;;  %v4379_v24 = vld [vmem:[#allocation5 + $0x80] sm:$0xff]   ;;  %v4381_v26 = vld [vmem:[#allocation5 + $0x88] sm:$0xff]   ;;  %p4775_p10 = pnand %p4774_p8, %p8269_p9  ;;  %s4777_s29 = sshll.u32 %s4850_s13, 4  ;;  %s4778_s29 = int_to_ptr.vmem [resolvable:$false] %s4777_s29 }
  0x62   : > { %v4380_v25 = vld [vmem:[#allocation5 + $0xc0] sm:$0xff]   ;;  %v4382_v27 = vld [vmem:[#allocation5 + $0xc8] sm:$0xff]   ;;  %v4383_v28 = vld [vmem:[#allocation5 + $0x90] sm:$0xff]   ;;  %s4779_s27 = scalar_lea.vmem %s4778_s29, 1024  ;;  %p4780_p4 = scmp.lt.s32.totalorder %s7550_s14, %s4778_s29 }
  0x63   : > { %4169 = vmatpush3.bf16.msra.mxu0 %v4357_v2  ;;  %4201 = vmatpush3.bf16.msra.mxu1 %v4357_v2  ;;  %v4384_v29 = vld [vmem:[#allocation5 + $0xd0] sm:$0xff]   ;;  %v4385_v30 = vld [vmem:[#allocation5 + $0x98] sm:$0xff]   ;;  %v4387_v32 = vld [vmem:[#allocation5 + $0xa0] sm:$0xff]   ;;  %p4776_p1 = pneg %p4775_p10  ;;  %p4781_p0 = scmp.lt.s32.totalorder %s4779_s27, %s4773_s17 }
  0x64   : > { %4170 = vmatprep.subr.bf16.mxu0 %v5030_v3  ;;  %4202 = vmatprep.subr.bf16.mxu1 %v5030_v3  ;;  %v4386_v31 = vld [vmem:[#allocation5 + $0xd8] sm:$0xff]   ;;  %v4388_v33 = vld [vmem:[#allocation5 + $0xe0] sm:$0xff]   ;;  %v4389_v34 = vld [vmem:[#allocation5 + $0xa8] sm:$0xff]  }
  0x65   : > { %v4390_v35 = vld [vmem:[#allocation5 + $0xe8] sm:$0xff]   ;;  %v4391_v36 = vld [vmem:[#allocation5 + $0xb0] sm:$0xff]   ;;  %v4393_v38 = vld [vmem:[#allocation5 + $0xb8] sm:$0xff]   ;;  %p4782_p5 = por %p4781_p0, %p4780_p4 }
  0x66   : > { %v4392_v37 = vld [vmem:[#allocation5 + $0xf0] sm:$0xff]   ;;  %v4394_v39 = vld [vmem:[#allocation5 + $0xf8] sm:$0xff]  }
  0x67   : > { %4171 = vmatpush3.bf16.msra.mxu0 %v5030_v3  ;;  %4203 = vmatpush3.bf16.msra.mxu1 %v5030_v3  ;;  %p4783_p11 = pnand %p4782_p5, %p4776_p1 }
  0x68   : > { %4172 = vmatprep.subr.bf16.mxu0 %v5035_v6  ;;  %4204 = vmatprep.subr.bf16.mxu1 %v5035_v6 }
  0x6b   : > { %4173 = vmatpush3.bf16.msra.mxu0 %v5035_v6  ;;  %4205 = vmatpush3.bf16.msra.mxu1 %v5035_v6 }
  0x6c   : > { %4174 = vmatprep.subr.bf16.mxu0 %v5042_v7  ;;  %4206 = vmatprep.subr.bf16.mxu1 %v5042_v7 }
  0x6f   : > { %4175 = vmatpush3.bf16.msra.mxu0 %v5042_v7  ;;  %4207 = vmatpush3.bf16.msra.mxu1 %v5042_v7 }
  0x70   : > { %4176 = vmatprep.subr.bf16.mxu0 %v5049_v8  ;;  %4208 = vmatprep.subr.bf16.mxu1 %v5049_v8 }
  0x73   : > { %4177 = vmatpush3.bf16.msra.mxu0 %v5049_v8  ;;  %4209 = vmatpush3.bf16.msra.mxu1 %v5049_v8 }
  0x74   : > { %4178 = vmatprep.subr.bf16.mxu0 %v5056_v9  ;;  %4210 = vmatprep.subr.bf16.mxu1 %v5056_v9 }
  0x77   : > { %4179 = vmatpush3.bf16.msra.mxu0 %v5056_v9  ;;  %4211 = vmatpush3.bf16.msra.mxu1 %v5056_v9 }
  0x78   : > { %4228 = vmatprep.subr.bf16.mxu0 %v4355_v0  ;;  %4260 = vmatprep.subr.bf16.mxu1 %v4355_v0 }
  0x7a   : > { %4181 = vmatmul.mubr.bf16.vlgmr.msra.gmra.mrb[0].mxu0 %v4365_v10  ;;  %4213 = vmatmul.mubr.bf16.vlgmr.msra.gmra.mrb[0].mxu1 %v4366_v11 }
  0x7b   : > { %4229 = vmatpush3.bf16.msra.mxu0 %v4355_v0  ;;  %4261 = vmatpush3.bf16.msra.mxu1 %v4355_v0 }
  0x7c   : > { %4230 = vmatprep.subr.bf16.mxu0 %v4356_v1  ;;  %4262 = vmatprep.subr.bf16.mxu1 %v4356_v1 }
  0x7d   : > { %4184 = vmatprep.mubr.bf16.mxu0 %v4367_v12  ;;  %4216 = vmatprep.mubr.bf16.mxu1 %v4368_v13 }
  0x7f   : > { %4231 = vmatpush3.bf16.msra.mxu0 %v4356_v1  ;;  %4263 = vmatpush3.bf16.msra.mxu1 %v4356_v1 }
  0x80   : > { %4232 = vmatprep.subr.bf16.mxu0 %v4357_v2  ;;  %4264 = vmatprep.subr.bf16.mxu1 %v4357_v2 }
  0x82   : > { %4185 = vmatmul.mubr.bf16.gmra.mrb[4].mxu0 %v4369_v14  ;;  %4217 = vmatmul.mubr.bf16.gmra.mrb[4].mxu1 %v4370_v15 }
  0x83   : > { %4233 = vmatpush3.bf16.msra.mxu0 %v4357_v2  ;;  %4265 = vmatpush3.bf16.msra.mxu1 %v4357_v2 }
  0x84   : > { %4234 = vmatprep.subr.bf16.mxu0 %v5030_v3  ;;  %4266 = vmatprep.subr.bf16.mxu1 %v5030_v3 }
  0x85   : > { %4188 = vmatprep.mubr.bf16.mxu0 %v4371_v16  ;;  %4220 = vmatprep.mubr.bf16.mxu1 %v4372_v17 }
  0x87   : > { %4235 = vmatpush3.bf16.msra.mxu0 %v5030_v3  ;;  %4267 = vmatpush3.bf16.msra.mxu1 %v5030_v3 }
  0x88   : > { %4236 = vmatprep.subr.bf16.mxu0 %v5035_v6  ;;  %4268 = vmatprep.subr.bf16.mxu1 %v5035_v6 }
  0x8a   : > { %4189 = vmatmul.mubr.bf16.gmra.mrb[8].mxu0 %v4373_v18  ;;  %4221 = vmatmul.mubr.bf16.gmra.mrb[8].mxu1 %v4374_v19 }
  0x8b   : > { %4237 = vmatpush3.bf16.msra.mxu0 %v5035_v6  ;;  %4269 = vmatpush3.bf16.msra.mxu1 %v5035_v6 }
  0x8c   : > { %4238 = vmatprep.subr.bf16.mxu0 %v5042_v7  ;;  %4270 = vmatprep.subr.bf16.mxu1 %v5042_v7 }
  0x8d   : > { %4192 = vmatprep.mubr.bf16.mxu0 %v4375_v20  ;;  %4224 = vmatprep.mubr.bf16.mxu1 %v4376_v21 }
  0x8f   : > { %4239 = vmatpush3.bf16.msra.mxu0 %v5042_v7  ;;  %4271 = vmatpush3.bf16.msra.mxu1 %v5042_v7 }
  0x90   : > { %4240 = vmatprep.subr.bf16.mxu0 %v5049_v8  ;;  %4272 = vmatprep.subr.bf16.mxu1 %v5049_v8 }
  0x92   : > { %4193 = vmatmul.mubr.bf16.gmra.mrb[12].mxu0 %v4377_v22  ;;  %4225 = vmatmul.mubr.bf16.gmra.mrb[12].mxu1 %v4378_v23 }
  0x93   : > { %4241 = vmatpush3.bf16.msra.mxu0 %v5049_v8  ;;  %4273 = vmatpush3.bf16.msra.mxu1 %v5049_v8 }
  0x94   : > { %4242 = vmatprep.subr.bf16.mxu0 %v5056_v9  ;;  %4274 = vmatprep.subr.bf16.mxu1 %v5056_v9 }
  0x95   : > { %4244 = vmatprep.mubr.bf16.mxu0 %v4379_v24  ;;  %4276 = vmatprep.mubr.bf16.mxu1 %v4380_v25 }
  0x97   : > { %4243 = vmatpush3.bf16.msra.mxu0 %v5056_v9  ;;  %4275 = vmatpush3.bf16.msra.mxu1 %v5056_v9 }
  0x9a   : > { %4245 = vmatmul.mubr.bf16.vlgmr.msra.gmra.mrb[16].mxu0 %v4381_v26  ;;  %4277 = vmatmul.mubr.bf16.vlgmr.msra.gmra.mrb[16].mxu1 %v4382_v27 }
  0x9b   : > { %4248 = vmatprep.mubr.bf16.mxu0 %v4383_v28  ;;  %4280 = vmatprep.mubr.bf16.mxu1 %v4384_v29 }
  0xa2   : > { %4249 = vmatmul.mubr.bf16.gmra.mrb[20].mxu0 %v4385_v30  ;;  %4281 = vmatmul.mubr.bf16.gmra.mrb[20].mxu1 %v4386_v31 }
  0xa3   : > { %4252 = vmatprep.mubr.bf16.mxu0 %v4387_v32  ;;  %4284 = vmatprep.mubr.bf16.mxu1 %v4388_v33 }
  0xaa   : > { %4253 = vmatmul.mubr.bf16.gmra.mrb[24].mxu0 %v4389_v34  ;;  %4285 = vmatmul.mubr.bf16.gmra.mrb[24].mxu1 %v4390_v35 }
  0xab   : > { %4256 = vmatprep.mubr.bf16.mxu0 %v4391_v36  ;;  %4288 = vmatprep.mubr.bf16.mxu1 %v4392_v37 }
  0xb2   : > { %4257 = vmatmul.mubr.bf16.gmra.mrb[28].mxu0 %v4393_v38  ;;  %4289 = vmatmul.mubr.bf16.gmra.mrb[28].mxu1 %v4394_v39 }
 0x14d   : > { %v5084_v40 = vpop.f32.mrb[0].mxu0  ;;  %v5086_v41 = vpop.f32.mrb[0].mxu1 }
 0x14e   : > { %7848 = vst [vmem:[#allocation11_spill] sm:$0xff] %v5084_v40  ;;  %7849 = vst [vmem:[#allocation12_spill] sm:$0xff] %v5086_v41  ;;  %v5088_v42 = vpop.f32.mrb[1].mxu0  ;;  %v5090_v43 = vpop.f32.mrb[1].mxu1 }
 0x14f   : > { %7850 = vst [vmem:[#allocation13_spill] sm:$0xff] %v5088_v42  ;;  %7851 = vst [vmem:[#allocation14_spill] sm:$0xff] %v5090_v43  ;;  %v5092_v44 = vpop.f32.mrb[2].mxu0  ;;  %v5094_v45 = vpop.f32.mrb[2].mxu1 }
 0x150   : > { %7852 = vst [vmem:[#allocation15_spill] sm:$0xff] %v5092_v44  ;;  %7853 = vst [vmem:[#allocation16_spill] sm:$0xff] %v5094_v45  ;;  %v5096_v46 = vpop.f32.mrb[3].mxu0  ;;  %v5098_v47 = vpop.f32.mrb[3].mxu1 }
 0x151   : > { %7854 = vst [vmem:[#allocation17_spill] sm:$0xff] %v5096_v46  ;;  %7855 = vst [vmem:[#allocation18_spill] sm:$0xff] %v5098_v47  ;;  %v402_v48 = vadd.f32 %v5096_v46, %v5088_v42  ;;  %v1333_v49 = vadd.f32 %v5098_v47, %v5090_v43 }
 0x153   : > { %v403_v50 = vadd.f32 %v5084_v40, %v402_v48  ;;  %v1334_v51 = vadd.f32 %v5086_v41, %v1333_v49 }
 0x155   : > { %v5106_v52 = vpop.f32.mrb[4].mxu0  ;;  %v5108_v53 = vpop.f32.mrb[4].mxu1  ;;  %v404_v54 = vadd.f32 %v5092_v44, %v403_v50  ;;  %v1335_v55 = vadd.f32 %v5094_v45, %v1334_v51 }
 0x156   : > { %7856 = vst [vmem:[#allocation19_spill] sm:$0xff] %v5106_v52  ;;  %7857 = vst [vmem:[#allocation20_spill] sm:$0xff] %v5108_v53  ;;  %v5112_v56 = vpop.f32.mrb[5].mxu0  ;;  %v5114_v57 = vpop.f32.mrb[5].mxu1 }
 0x157   : > { %7858 = vst [vmem:[#allocation21_spill] sm:$0xff] %v5112_v56  ;;  %7859 = vst [vmem:[#allocation22_spill] sm:$0xff] %v5114_v57  ;;  %v405_v58 = vadd.f32 %v404_v54, %v5112_v56  ;;  %v1336_v59 = vadd.f32 %v1335_v55, %v5114_v57  ;;  %v5118_v60 = vpop.f32.mrb[6].mxu0  ;;  %v5120_v61 = vpop.f32.mrb[6].mxu1 }
 0x158   : > { %7860 = vst [vmem:[#allocation23_spill] sm:$0xff] %v5118_v60  ;;  %7861 = vst [vmem:[#allocation24_spill] sm:$0xff] %v5120_v61  ;;  %v5122_v62 = vpop.f32.mrb[7].mxu0  ;;  %v5124_v63 = vpop.f32.mrb[7].mxu1 }
 0x159   : > { %7862 = vst [vmem:[#allocation25_spill] sm:$0xff] %v5122_v62  ;;  %7863 = vst [vmem:[#allocation26_spill] sm:$0xff] %v5124_v63  ;;  %v406_v0 = vadd.f32 %v405_v58, %v5122_v62  ;;  %v1337_v1 = vadd.f32 %v1336_v59, %v5124_v63 }
 0x15b   : > { %v407_v2 = vadd.f32 %v5106_v52, %v406_v0  ;;  %v1338_v3 = vadd.f32 %v5108_v53, %v1337_v1 }
 0x15d   : > { %v5130_v4 = vpop.f32.mrb[8].mxu0  ;;  %v5132_v5 = vpop.f32.mrb[8].mxu1  ;;  %v408_v6 = vadd.f32 %v5118_v60, %v407_v2  ;;  %v1339_v7 = vadd.f32 %v5120_v61, %v1338_v3 }
 0x15e   : > { %7864 = vst [vmem:[#allocation27_spill] sm:$0xff] %v5130_v4  ;;  %7865 = vst [vmem:[#allocation28_spill] sm:$0xff] %v5132_v5  ;;  %v5136_v8 = vpop.f32.mrb[9].mxu0  ;;  %v5138_v9 = vpop.f32.mrb[9].mxu1 }
 0x15f   : > { %7866 = vst [vmem:[#allocation29_spill] sm:$0xff] %v5136_v8  ;;  %7867 = vst [vmem:[#allocation30_spill] sm:$0xff] %v5138_v9  ;;  %v409_v10 = vadd.f32 %v408_v6, %v5136_v8  ;;  %v1340_v11 = vadd.f32 %v1339_v7, %v5138_v9  ;;  %v5142_v12 = vpop.f32.mrb[10].mxu0  ;;  %v5144_v13 = vpop.f32.mrb[10].mxu1 }
 0x160   : > { %7868 = vst [vmem:[#allocation31_spill] sm:$0xff] %v5142_v12  ;;  %7869 = vst [vmem:[#allocation32_spill] sm:$0xff] %v5144_v13  ;;  %v5146_v14 = vpop.f32.mrb[11].mxu0  ;;  %v5148_v15 = vpop.f32.mrb[11].mxu1 }
 0x161   : > { %7870 = vst [vmem:[#allocation33_spill] sm:$0xff] %v5146_v14  ;;  %7871 = vst [vmem:[#allocation34_spill] sm:$0xff] %v5148_v15  ;;  %v410_v16 = vadd.f32 %v409_v10, %v5146_v14  ;;  %v1341_v17 = vadd.f32 %v1340_v11, %v5148_v15 }
 0x163   : > { %v411_v18 = vadd.f32 %v5130_v4, %v410_v16  ;;  %v1342_v19 = vadd.f32 %v5132_v5, %v1341_v17 }
 0x165   : > { %v5154_v20 = vpop.f32.mrb[12].mxu0  ;;  %v5156_v21 = vpop.f32.mrb[12].mxu1  ;;  %v412_v22 = vadd.f32 %v5142_v12, %v411_v18  ;;  %v1343_v23 = vadd.f32 %v5144_v13, %v1342_v19 }
 0x166   : > { %7872 = vst [vmem:[#allocation35_spill] sm:$0xff] %v5154_v20  ;;  %7873 = vst [vmem:[#allocation36_spill] sm:$0xff] %v5156_v21  ;;  %v5160_v24 = vpop.f32.mrb[13].mxu0  ;;  %v5162_v25 = vpop.f32.mrb[13].mxu1 }
 0x167   : > { %7874 = vst [vmem:[#allocation37_spill] sm:$0xff] %v5160_v24  ;;  %7875 = vst [vmem:[#allocation38_spill] sm:$0xff] %v5162_v25  ;;  %v413_v26 = vadd.f32 %v412_v22, %v5160_v24  ;;  %v1344_v27 = vadd.f32 %v1343_v23, %v5162_v25  ;;  %v5166_v28 = vpop.f32.mrb[14].mxu0  ;;  %v5168_v29 = vpop.f32.mrb[14].mxu1 }
 0x168   : > { %7876 = vst [vmem:[#allocation39_spill] sm:$0xff] %v5166_v28  ;;  %7877 = vst [vmem:[#allocation40_spill] sm:$0xff] %v5168_v29  ;;  %v5170_v30 = vpop.f32.mrb[15].mxu0  ;;  %v5172_v31 = vpop.f32.mrb[15].mxu1 }
 0x169   : > { %7878 = vst [vmem:[#allocation41_spill] sm:$0xff] %v5170_v30  ;;  %7879 = vst [vmem:[#allocation42_spill] sm:$0xff] %v5172_v31  ;;  %v414_v32 = vadd.f32 %v413_v26, %v5170_v30  ;;  %v1345_v33 = vadd.f32 %v1344_v27, %v5172_v31 }
 0x16b   : > { %v415_v34 = vadd.f32 %v5154_v20, %v414_v32  ;;  %v1346_v35 = vadd.f32 %v5156_v21, %v1345_v33 }
 0x16d   : > { %v416_v36 = vadd.f32 %v5166_v28, %v415_v34  ;;  %v1347_v37 = vadd.f32 %v5168_v29, %v1346_v35 }
 0x16f   : > { %v417_v38 = vmul.f32 0.0625, %v416_v36  ;;  %v1348_v39 = vmul.f32 0.0625, %v1347_v37 }
 0x171   : > { %v418_v48 = vmul.f32 %v417_v38, %v417_v38  ;;  %v1349_v49 = vmul.f32 %v1348_v39, %v1348_v39 }
 0x173   : > { %v419_v50 = vrot.slane %v418_v48, 4  ;;  %v1350_v51 = vrot.slane %v1349_v49, 4 }
 0x175   : > { %v420_v54 = vadd.f32 %v419_v50, %v418_v48  ;;  %v1351_v55 = vadd.f32 %v1350_v51, %v1349_v49 }
 0x177   : > { %v421_v58 = vrot.slane %v420_v54, 2  ;;  %v1352_v59 = vrot.slane %v1351_v55, 2 }
 0x179   : > { %v422_v0 = vadd.f32 %v421_v58, %v420_v54  ;;  %v1353_v1 = vadd.f32 %v1352_v59, %v1351_v55 }
 0x17b   : > { %v423_v2 = vrot.slane %v422_v0, 1  ;;  %v1354_v3 = vrot.slane %v1353_v1, 1 }
 0x17d   : > { %v424_v6 = vadd.f32 %v423_v2, %v422_v0  ;;  %v1355_v7 = vadd.f32 %v1354_v3, %v1353_v1 }
 0x17f   : > { %v425_v10 = vadd.f32 1e-08, %v424_v6  ;;  %v1356_v11 = vadd.f32 1e-08, %v1355_v7 }
 0x181   : > { %4395 = vrsqrt.f32 %v425_v10  ;;  %v428_v16 = vadd.f32 1.0, %v425_v10  ;;  %v1359_v17 = vadd.f32 1.0, %v1356_v11 }
 0x182   : > { %4397 = vrsqrt.f32 %v1356_v11 }
 0x183   : > { %4399 = vrcp.f32 %v428_v16 }
 0x184   : > { %4401 = vrcp.f32 %v1359_v17 }
 0x18b   : > { %v4396_v18 = vpop.eup %4395 }
 0x18c   : > { %v4398_v19 = vpop.eup %4397  ;;  %v427_v22 = vmul.f32 %v4396_v18, %v425_v10 }
 0x18d   : > { %v4400_v23 = vpop.eup %4399  ;;  %v1358_v26 = vmul.f32 %v4398_v19, %v1356_v11 }
 0x18e   : > { %v4402_v27 = vpop.eup %4401  ;;  %v430_v32 = vmul.f32 %v4400_v23, %v427_v22 }
 0x18f   : > { %v1361_v33 = vmul.f32 %v4402_v27, %v1358_v26 }
 0x190   : > { %v431_v34 = vmul.f32 %v430_v32, %v417_v38 }
 0x191   : > { %v5180_v35 = vmul.f32 %v1361_v33, %v1348_v39 }
 0x192   : > { %v432_v36 = vmul.f32 %v431_v34, %v5088_v42  ;;  %v433_v37 = vmul.f32 %v431_v34, %v5096_v46  ;;  %v434_v48 = vmul.f32 %v5084_v40, %v431_v34  ;;  %v435_v49 = vmul.f32 %v5092_v44, %v431_v34 }
 0x193   : > { %v436_v50 = vmul.f32 %v431_v34, %v5112_v56  ;;  %v437_v51 = vmul.f32 %v431_v34, %v5122_v62  ;;  %v438_v54 = vmul.f32 %v5106_v52, %v431_v34  ;;  %v439_v55 = vmul.f32 %v5118_v60, %v431_v34 }
 0x194   : > { %v5191_v38 = vmul.f32 %v431_v34, %v5136_v8  ;;  %v5194_v39 = vmul.f32 %v431_v34, %v5146_v14  ;;  %v5197_v58 = vmul.f32 %v5130_v4, %v431_v34  ;;  %v5200_v59 = vmul.f32 %v5142_v12, %v431_v34 }
 0x195   : > { %v5203_v0 = vmul.f32 %v431_v34, %v5160_v24  ;;  %v5206_v1 = vmul.f32 %v431_v34, %v5170_v30  ;;  %v5209_v2 = vmul.f32 %v5154_v20, %v431_v34  ;;  %v5212_v3 = vmul.f32 %v5166_v28, %v431_v34 }
 0x196   : > { %v448_v6 = vrot.slane %v432_v36, 4  ;;  %v454_v7 = vrot.slane %v433_v37, 4  ;;  %v460_v10 = vrot.slane %v434_v48, 4  ;;  %v466_v11 = vrot.slane %v435_v49, 4 }
 0x197   : > { %v472_v16 = vrot.slane %v436_v50, 4  ;;  %v478_v17 = vrot.slane %v437_v51, 4  ;;  %v484_v18 = vrot.slane %v438_v54, 4  ;;  %v490_v19 = vrot.slane %v439_v55, 4 }
 0x198   : > { %v449_v22 = vadd.f32 %v448_v6, %v432_v36  ;;  %v455_v23 = vadd.f32 %v454_v7, %v433_v37  ;;  %v461_v26 = vadd.f32 %v460_v10, %v434_v48  ;;  %v467_v27 = vadd.f32 %v466_v11, %v435_v49 }
 0x199   : > { %v473_v32 = vadd.f32 %v472_v16, %v436_v50  ;;  %v479_v33 = vadd.f32 %v478_v17, %v437_v51  ;;  %v485_v4 = vadd.f32 %v484_v18, %v438_v54  ;;  %v491_v14 = vadd.f32 %v490_v19, %v439_v55 }
 0x19a   : > { %v450_v8 = vrot.slane %v449_v22, 2  ;;  %v456_v60 = vrot.slane %v455_v23, 2  ;;  %v462_v34 = vrot.slane %v461_v26, 2  ;;  %v468_v52 = vrot.slane %v467_v27, 2 }
 0x19b   : > { %v474_v62 = vrot.slane %v473_v32, 2  ;;  %v480_v56 = vrot.slane %v479_v33, 2  ;;  %v486_v44 = vrot.slane %v485_v4, 2  ;;  %v492_v40 = vrot.slane %v491_v14, 2 }
 0x19c   : > { %v451_v28 = vadd.f32 %v450_v8, %v449_v22  ;;  %v457_v20 = vadd.f32 %v456_v60, %v455_v23  ;;  %v463_v30 = vadd.f32 %v462_v34, %v461_v26  ;;  %v469_v24 = vadd.f32 %v468_v52, %v467_v27 }
 0x19d   : > { %v475_v36 = vadd.f32 %v474_v62, %v473_v32  ;;  %v481_v37 = vadd.f32 %v480_v56, %v479_v33  ;;  %v487_v48 = vadd.f32 %v486_v44, %v485_v4  ;;  %v493_v49 = vadd.f32 %v492_v40, %v491_v14 }
 0x19e   : > { %v452_v50 = vrot.slane %v451_v28, 1  ;;  %v458_v51 = vrot.slane %v457_v20, 1  ;;  %v464_v54 = vrot.slane %v463_v30, 1  ;;  %v470_v55 = vrot.slane %v469_v24, 1 }
 0x19f   : > { %v476_v6 = vrot.slane %v475_v36, 1  ;;  %v482_v7 = vrot.slane %v481_v37, 1  ;;  %v488_v10 = vrot.slane %v487_v48, 1  ;;  %v494_v11 = vrot.slane %v493_v49, 1 }
 0x1a0   : > { %v5214_v16 = vadd.f32 %v452_v50, %v451_v28  ;;  %v5216_v17 = vadd.f32 %v458_v51, %v457_v20  ;;  %v5218_v8 = vadd.f32 %v464_v54, %v463_v30  ;;  %v5220_v60 = vadd.f32 %v470_v55, %v469_v24 }
 0x1a1   : > { %v5222_v52 = vadd.f32 %v476_v6, %v475_v36  ;;  %v5224_v44 = vadd.f32 %v482_v7, %v481_v37  ;;  %v5226_v40 = vadd.f32 %v488_v10, %v487_v48  ;;  %v5228_v56 = vadd.f32 %v494_v11, %v493_v49 }
 0x1a2   : > { %7880 = vst [vmem:[#allocation43_spill] sm:$0xff] %v5214_v16  ;;  %7881 = vst [vmem:[#allocation44_spill] sm:$0xff] %v5216_v17  ;;  %v496_v62 = vrot.slane %v5191_v38, 4  ;;  %v502_v4 = vrot.slane %v5194_v39, 4  ;;  %v508_v14 = vrot.slane %v5197_v58, 4  ;;  %v514_v20 = vrot.slane %v5200_v59, 4 }
 0x1a3   : > { %7882 = vst [vmem:[#allocation45_spill] sm:$0xff] %v5218_v8  ;;  %7883 = vst [vmem:[#allocation46_spill] sm:$0xff] %v5220_v60  ;;  %v520_v28 = vrot.slane %v5203_v0, 4  ;;  %v526_v24 = vrot.slane %v5206_v1, 4  ;;  %v532_v30 = vrot.slane %v5209_v2, 4  ;;  %v538_v18 = vrot.slane %v5212_v3, 4 }
 0x1a4   : > { %7884 = vst [vmem:[#allocation47_spill] sm:$0xff] %v5222_v52  ;;  %7885 = vst [vmem:[#allocation48_spill] sm:$0xff] %v5224_v44  ;;  %v497_v19 = vadd.f32 %v496_v62, %v5191_v38  ;;  %v503_v22 = vadd.f32 %v502_v4, %v5194_v39  ;;  %v509_v23 = vadd.f32 %v508_v14, %v5197_v58 }
 0x1a5   : > { %7886 = vst [vmem:[#allocation49_spill] sm:$0xff] %v5226_v40  ;;  %7887 = vst [vmem:[#allocation50_spill] sm:$0xff] %v5228_v56  ;;  %v515_v26 = vadd.f32 %v514_v20, %v5200_v59  ;;  %v521_v27 = vadd.f32 %v520_v28, %v5203_v0  ;;  %v527_v32 = vadd.f32 %v526_v24, %v5206_v1  ;;  %v5246_v28 = vpop.f32.mrb[16].mxu0  ;;  %v5248_v24 = vpop.f32.mrb[16].mxu1 }
 0x1a6   : > { %v533_v33 = vadd.f32 %v532_v30, %v5209_v2  ;;  %v539_v34 = vadd.f32 %v538_v18, %v5212_v3  ;;  %v498_v36 = vrot.slane %v497_v19, 2  ;;  %v504_v37 = vrot.slane %v503_v22, 2  ;;  %7888 = vst [vmem:[#allocation51_spill] sm:$0xff] %v5246_v28  ;;  %7889 = vst [vmem:[#allocation52_spill] sm:$0xff] %v5248_v24 }
 0x1a7   : > { %v510_v48 = vrot.slane %v509_v23, 2  ;;  %v516_v49 = vrot.slane %v515_v26, 2  ;;  %v522_v50 = vrot.slane %v521_v27, 2  ;;  %v528_v38 = vrot.slane %v527_v32, 2 }
 0x1a8   : > { %v534_v51 = vrot.slane %v533_v33, 2  ;;  %v540_v39 = vrot.slane %v539_v34, 2  ;;  %v499_v54 = vadd.f32 %v498_v36, %v497_v19  ;;  %v505_v58 = vadd.f32 %v504_v37, %v503_v22 }
 0x1a9   : > { %v511_v55 = vadd.f32 %v510_v48, %v509_v23  ;;  %v517_v59 = vadd.f32 %v516_v49, %v515_v26  ;;  %v523_v6 = vadd.f32 %v522_v50, %v521_v27  ;;  %v529_v0 = vadd.f32 %v528_v38, %v527_v32  ;;  %v5258_v23 = vpop.f32.mrb[17].mxu0  ;;  %v5260_v26 = vpop.f32.mrb[17].mxu1 }
 0x1aa   : > { %v535_v7 = vadd.f32 %v534_v51, %v533_v33  ;;  %v541_v1 = vadd.f32 %v540_v39, %v539_v34  ;;  %v500_v10 = vrot.slane %v499_v54, 1  ;;  %v506_v2 = vrot.slane %v505_v58, 1  ;;  %7894 = vst [vmem:[#allocation57_spill] sm:$0xff] %v5258_v23  ;;  %7895 = vst [vmem:[#allocation58_spill] sm:$0xff] %v5260_v26  ;;  %v5270_v36 = vpop.f32.mrb[18].mxu0  ;;  %v5272_v37 = vpop.f32.mrb[18].mxu1 }
 0x1ab   : > { %v512_v11 = vrot.slane %v511_v55, 1  ;;  %v518_v3 = vrot.slane %v517_v59, 1  ;;  %v524_v62 = vrot.slane %v523_v6, 1  ;;  %v530_v4 = vrot.slane %v529_v0, 1  ;;  %7900 = vst [vmem:[#allocation63_spill] sm:$0xff] %v5270_v36  ;;  %7901 = vst [vmem:[#allocation64_spill] sm:$0xff] %v5272_v37 }
 0x1ac   : > { %v536_v14 = vrot.slane %v535_v7, 1  ;;  %v542_v20 = vrot.slane %v541_v1, 1  ;;  %v5250_v30 = vadd.f32 %v500_v10, %v499_v54  ;;  %v5252_v18 = vadd.f32 %v506_v2, %v505_v58  ;;  %v5282_v51 = vpop.f32.mrb[19].mxu0  ;;  %v5284_v39 = vpop.f32.mrb[19].mxu1 }
 0x1ad   : > { %v5254_v19 = vadd.f32 %v512_v11, %v511_v55  ;;  %v5256_v22 = vadd.f32 %v518_v3, %v517_v59  ;;  %v5262_v27 = vadd.f32 %v524_v62, %v523_v6  ;;  %v5264_v32 = vadd.f32 %v530_v4, %v529_v0  ;;  %7902 = vst [vmem:[#allocation65_spill] sm:$0xff] %v5282_v51 }
 0x1ae   : > { %7890 = vst [vmem:[#allocation53_spill] sm:$0xff] %v5250_v30  ;;  %7891 = vst [vmem:[#allocation54_spill] sm:$0xff] %v5252_v18  ;;  %v5266_v33 = vadd.f32 %v536_v14, %v535_v7  ;;  %v5268_v34 = vadd.f32 %v542_v20, %v541_v1  ;;  %v544_v48 = vmax.f32 %v5214_v16, %v5222_v52 }
 0x1af   : > { %7892 = vst [vmem:[#allocation55_spill] sm:$0xff] %v5254_v19  ;;  %7893 = vst [vmem:[#allocation56_spill] sm:$0xff] %v5256_v22  ;;  %v545_v49 = vmax.f32 %v5216_v17, %v5224_v44  ;;  %v546_v50 = vmax.f32 %v5218_v8, %v5226_v40  ;;  %v547_v38 = vmax.f32 %v5220_v60, %v5228_v56 }
 0x1b0   : > { %7896 = vst [vmem:[#allocation59_spill] sm:$0xff] %v5262_v27  ;;  %7897 = vst [vmem:[#allocation60_spill] sm:$0xff] %v5264_v32  ;;  %v1363_v54 = vmul.f32 %v5180_v35, %v5090_v43  ;;  %v1364_v58 = vmul.f32 %v5180_v35, %v5098_v47  ;;  %v5292_v55 = vmul.f32 %v5086_v41, %v5180_v35 }
 0x1b1   : > { %7898 = vst [vmem:[#allocation61_spill] sm:$0xff] %v5266_v33  ;;  %7899 = vst [vmem:[#allocation62_spill] sm:$0xff] %v5268_v34  ;;  %v5296_v59 = vmul.f32 %v5094_v45, %v5180_v35  ;;  %v548_v6 = vmax.f32 %v544_v48, %v5250_v30  ;;  %v549_v0 = vmax.f32 %v545_v49, %v5252_v18 }
 0x1b2   : > { %7903 = vst [vmem:[#allocation66_spill] sm:$0xff] %v5284_v39  ;;  %v550_v7 = vmax.f32 %v546_v50, %v5254_v19  ;;  %v551_v1 = vmax.f32 %v547_v38, %v5256_v22  ;;  %v5304_v10 = vmul.f32 %v5180_v35, %v5114_v57  ;;  %v5308_v2 = vmul.f32 %v5180_v35, %v5124_v63 }
 0x1b3   : > { %v5312_v11 = vmul.f32 %v5108_v53, %v5180_v35  ;;  %v5316_v3 = vmul.f32 %v5120_v61, %v5180_v35  ;;  %v552_v62 = vmax.f32 %v548_v6, %v5262_v27  ;;  %v553_v4 = vmax.f32 %v549_v0, %v5264_v32  ;;  %v5338_v6 = vpop.f32.mrb[20].mxu0  ;;  %v5340_v0 = vpop.f32.mrb[20].mxu1 }
 0x1b4   : > { %v554_v14 = vmax.f32 %v550_v7, %v5266_v33  ;;  %v555_v20 = vmax.f32 %v551_v1, %v5268_v34  ;;  %v5324_v48 = vmul.f32 %v5180_v35, %v5138_v9  ;;  %v5328_v49 = vmul.f32 %v5180_v35, %v5148_v15  ;;  %7904 = vst [vmem:[#allocation67_spill] sm:$0xff] %v5338_v6  ;;  %v5352_v61 = vpop.f32.mrb[21].mxu1 }
 0x1b5   : > { %v5332_v50 = vmul.f32 %v5132_v5, %v5180_v35  ;;  %v5336_v38 = vmul.f32 %v5144_v13, %v5180_v35  ;;  %7905 = vst [vmem:[#allocation68_spill] sm:$0xff] %v5340_v0  ;;  %v556_v7 = vmax.f32 %v552_v62, %v553_v4  ;;  %v5344_v9 = vmul.f32 %v5180_v35, %v5162_v25  ;;  %v5350_v5 = vpop.f32.mrb[21].mxu0  ;;  %v5364_v63 = vpop.f32.mrb[22].mxu1 }
 0x1b6   : > { %v557_v1 = vmax.f32 %v554_v14, %v555_v20  ;;  %v5348_v15 = vmul.f32 %v5180_v35, %v5172_v31  ;;  %7906 = vst [vmem:[#allocation69_spill] sm:$0xff] %v5350_v5  ;;  %7907 = vst [vmem:[#allocation70_spill] sm:$0xff] %v5352_v61  ;;  %v5356_v53 = vmul.f32 %v5156_v21, %v5180_v35  ;;  %v1379_v4 = vrot.slane %v1363_v54, 4  ;;  %v5362_v20 = vpop.f32.mrb[22].mxu0  ;;  %v5371_v21 = vpop.f32.mrb[23].mxu1 }
 0x1b7   : > { %v5360_v62 = vmul.f32 %v5168_v29, %v5180_v35  ;;  %v1385_v14 = vrot.slane %v1364_v58, 4  ;;  %7908 = vst [vmem:[#allocation71_spill] sm:$0xff] %v5362_v20  ;;  %7909 = vst [vmem:[#allocation72_spill] sm:$0xff] %v5364_v63  ;;  %v1391_v25 = vrot.slane %v5292_v55, 4  ;;  %v1397_v13 = vrot.slane %v5296_v59, 4  ;;  %v5369_v45 = vpop.f32.mrb[23].mxu0 }
 0x1b8   : > { %v558_v31 = vmax.f32 %v556_v7, %v557_v1  ;;  %v1403_v57 = vrot.slane %v5304_v10, 4  ;;  %7910 = vst [vmem:[#allocation73_spill] sm:$0xff] %v5369_v45  ;;  %7911 = vst [vmem:[#allocation74_spill] sm:$0xff] %v5371_v21  ;;  %v1380_v41 = vadd.f32 %v1379_v4, %v1363_v54  ;;  %v1409_v29 = vrot.slane %v5308_v2, 4 }
 0x1b9   : > { %v1386_v35 = vadd.f32 %v1385_v14, %v1364_v58 }
 0x1ba   : > { %v559_v43 = vsub.f32 %v5214_v16, %v558_v31  ;;  %v560_v7 = vsub.f32 %v5216_v17, %v558_v31  ;;  %v561_v1 = vsub.f32 %v5218_v8, %v558_v31  ;;  %v562_v63 = vsub.f32 %v5220_v60, %v558_v31  ;;  %v5391_v17 = vpop.f32.mrb[24].mxu0 }
 0x1bb   : > { %v563_v12 = vsub.f32 %v5222_v52, %v558_v31  ;;  %v564_v46 = vsub.f32 %v5224_v44, %v558_v31  ;;  %v565_v42 = vsub.f32 %v5226_v40, %v558_v31  ;;  %v566_v54 = vsub.f32 %v5228_v56, %v558_v31  ;;  %7912 = vst [vmem:[#allocation75_spill] sm:$0xff] %v5391_v17  ;;  %v5393_v40 = vpop.f32.mrb[24].mxu1 }
 0x1bc   : > { %v567_v58 = vsub.f32 %v5250_v30, %v558_v31  ;;  %v568_v4 = vsub.f32 %v5252_v18, %v558_v31  ;;  %v569_v14 = vsub.f32 %v5254_v19, %v558_v31  ;;  %v570_v47 = vsub.f32 %v5256_v22, %v558_v31  ;;  %7913 = vst [vmem:[#allocation76_spill] sm:$0xff] %v5393_v40 }
 0x1bd   : > { %v571_v8 = vsub.f32 %v5262_v27, %v558_v31  ;;  %v572_v60 = vsub.f32 %v5264_v32, %v558_v31  ;;  %v573_v52 = vsub.f32 %v5266_v33, %v558_v31  ;;  %v574_v44 = vsub.f32 %v5268_v34, %v558_v31 }
 0x1be   : > { %v575_v56 = vmul.f32 1.442695, %v559_v43  ;;  %v577_v30 = vmul.f32 1.442695, %v560_v7  ;;  %v579_v16 = vmul.f32 1.442695, %v561_v1  ;;  %v1392_v18 = vadd.f32 %v1391_v25, %v5292_v55 }
 0x1bf   : > { %v581_v19 = vmul.f32 1.442695, %v562_v63  ;;  %v583_v20 = vmul.f32 1.442695, %v563_v12  ;;  %v585_v22 = vmul.f32 1.442695, %v564_v46  ;;  %v1398_v27 = vadd.f32 %v1397_v13, %v5296_v59 }
 0x1c0   : > { %4403 = vpow2.f32 %v575_v56  ;;  %v587_v32 = vmul.f32 1.442695, %v565_v42  ;;  %v589_v0 = vmul.f32 1.442695, %v566_v54  ;;  %v591_v33 = vmul.f32 1.442695, %v567_v58 }
 0x1c1   : > { %4405 = vpow2.f32 %v577_v30  ;;  %v593_v31 = vmul.f32 1.442695, %v568_v4  ;;  %v595_v34 = vmul.f32 1.442695, %v569_v14  ;;  %v597_v17 = vmul.f32 1.442695, %v570_v47 }
 0x1c2   : > { %4407 = vpow2.f32 %v579_v16  ;;  %v599_v40 = vmul.f32 1.442695, %v571_v8  ;;  %v5397_v43 = vmul.f32 1.442695, %v572_v60  ;;  %v5399_v7 = vmul.f32 1.442695, %v573_v52 }
 0x1c3   : > { %4409 = vpow2.f32 %v581_v19  ;;  %v5401_v63 = vmul.f32 1.442695, %v574_v44  ;;  %v1381_v46 = vrot.slane %v1380_v41, 2  ;;  %v1387_v12 = vrot.slane %v1386_v35, 2  ;;  %v5403_v13 = vpop.f32.mrb[25].mxu0  ;;  %v5405_v42 = vpop.f32.mrb[25].mxu1 }
 0x1c4   : > { %7914 = vst [vmem:[#allocation77_spill] sm:$0xff] %v5403_v13  ;;  %7915 = vst [vmem:[#allocation78_spill] sm:$0xff] %v5405_v42  ;;  %4411 = vpow2.f32 %v583_v20  ;;  %v1393_v25 = vrot.slane %v1392_v18, 2  ;;  %v1399_v47 = vrot.slane %v1398_v27, 2  ;;  %v1404_v16 = vadd.f32 %v1403_v57, %v5304_v10  ;;  %v5408_v8 = vpop.f32.mrb[26].mxu0  ;;  %v5410_v60 = vpop.f32.mrb[26].mxu1 }
 0x1c5   : > { %7916 = vst [vmem:[#allocation79_spill] sm:$0xff] %v5408_v8  ;;  %7917 = vst [vmem:[#allocation80_spill] sm:$0xff] %v5410_v60  ;;  %4413 = vpow2.f32 %v585_v22  ;;  %v1382_v52 = vadd.f32 %v1381_v46, %v1380_v41  ;;  %v1388_v44 = vadd.f32 %v1387_v12, %v1386_v35  ;;  %v1410_v56 = vadd.f32 %v1409_v29, %v5308_v2  ;;  %v5413_v30 = vpop.f32.mrb[27].mxu0  ;;  %v5415_v19 = vpop.f32.mrb[27].mxu1 }
 0x1c6   : > { %7918 = vst [vmem:[#allocation81_spill] sm:$0xff] %v5413_v30  ;;  %7919 = vst [vmem:[#allocation82_spill] sm:$0xff] %v5415_v19  ;;  %4415 = vpow2.f32 %v587_v32  ;;  %v1394_v55 = vadd.f32 %v1393_v25, %v1392_v18  ;;  %v1400_v59 = vadd.f32 %v1399_v47, %v1398_v27  ;;  %v1405_v20 = vrot.slane %v1404_v16, 2  ;;  %v5417_v57 = vpop.f32.mrb[28].mxu0  ;;  %v5419_v10 = vpop.f32.mrb[28].mxu1 }
 0x1c7   : > { %7920 = vst [vmem:[#allocation83_spill] sm:$0xff] %v5417_v57  ;;  %7921 = vst [vmem:[#allocation84_spill] sm:$0xff] %v5419_v10  ;;  %4417 = vpow2.f32 %v589_v0  ;;  %v1383_v22 = vrot.slane %v1382_v52, 1  ;;  %v1389_v41 = vrot.slane %v1388_v44, 1  ;;  %v1411_v35 = vrot.slane %v1410_v56, 2  ;;  %v5421_v1 = vpop.f32.mrb[29].mxu0 }
 0x1c8   : > { %7922 = vst [vmem:[#allocation85_spill] sm:$0xff] %v5421_v1  ;;  %v5423_v29 = vpop.f32.mrb[29].mxu1  ;;  %4419 = vpow2.f32 %v591_v33  ;;  %v1395_v32 = vrot.slane %v1394_v55, 1  ;;  %v1401_v2 = vrot.slane %v1400_v59, 1  ;;  %v1406_v18 = vadd.f32 %v1405_v20, %v1404_v16  ;;  %v5425_v27 = vpop.f32.mrb[30].mxu0 }
 0x1c9   : > { %7923 = vst [vmem:[#allocation86_spill] sm:$0xff] %v5423_v29  ;;  %7924 = vst [vmem:[#allocation87_spill] sm:$0xff] %v5425_v27  ;;  %v5427_v54 = vpop.f32.mrb[30].mxu1  ;;  %4421 = vpow2.f32 %v593_v31  ;;  %v5429_v0 = vadd.f32 %v1383_v22, %v1382_v52  ;;  %v5431_v58 = vadd.f32 %v1389_v41, %v1388_v44  ;;  %v1412_v4 = vadd.f32 %v1411_v35, %v1410_v56  ;;  %v5433_v14 = vpop.f32.mrb[31].mxu0 }
 0x1ca   : > { %7925 = vst [vmem:[#allocation88_spill] sm:$0xff] %v5427_v54  ;;  %7928 = vst [vmem:[#allocation91_spill] sm:$0xff] %v5433_v14  ;;  %v5435_v46 = vpop.eup %4403  ;;  %4423 = vpow2.f32 %v595_v34  ;;  %v5437_v33 = vadd.f32 %v1395_v32, %v1394_v55  ;;  %v5439_v12 = vadd.f32 %v1401_v2, %v1400_v59  ;;  %v1407_v25 = vrot.slane %v1406_v18, 1 }
 0x1cb   : > { %7926 = vst [vmem:[#allocation89_spill] sm:$0xff] %v5429_v0  ;;  %7927 = vst [vmem:[#allocation90_spill] sm:$0xff] %v5431_v58  ;;  %v5441_v47 = vpop.eup %4405  ;;  %4425 = vpow2.f32 %v597_v17  ;;  %v1413_v31 = vrot.slane %v1412_v4, 1  ;;  %v7931_v16 = vrot.slane %v5312_v11, 4  ;;  %v1421_v44 = vrot.slane %v5316_v3, 4 }
 0x1cc   : > { %7929 = vst [vmem:[#allocation92_spill] sm:$0xff] %v5437_v33  ;;  %7930 = vst [vmem:[#allocation93_spill] sm:$0xff] %v5439_v12  ;;  %v5447_v56 = vpop.eup %4407  ;;  %4427 = vpow2.f32 %v599_v40  ;;  %v623_v34 = vrot.slane %v5441_v47, 7  ;;  %v5450_v55 = vadd.f32 %v1407_v25, %v1406_v18  ;;  %v1427_v59 = vrot.slane %v5324_v48, 4 }
 0x1cd   : > { %v1416_v52 = vadd.f32 %v7931_v16, %v5312_v11  ;;  %v5453_v20 = vpop.eup %4409  ;;  %4429 = vpow2.f32 %v5397_v43  ;;  %v626_v17 = vrot.slane %v5447_v56, 6  ;;  %v5457_v22 = vadd.f32 %v1413_v31, %v1412_v4 }
 0x1ce   : > { %7932 = vst [vmem:[#allocation94_spill] sm:$0xff] %v5450_v55  ;;  %v5459_v41 = vpop.eup %4411  ;;  %4431 = vpow2.f32 %v5399_v7  ;;  %v625_v40 = vsel %vm624_vm0, %v623_v34, %v5435_v46  ;;  %v629_v35 = vrot.slane %v5453_v20, 5  ;;  %v1422_v32 = vadd.f32 %v1421_v44, %v5316_v3 }
 0x1cf   : > { %7933 = vst [vmem:[#allocation95_spill] sm:$0xff] %v5457_v22  ;;  %v1417_v11 = vrot.slane %v1416_v52, 2  ;;  %v5466_v2 = vpop.eup %4413  ;;  %4433 = vpow2.f32 %v5401_v63  ;;  %v628_v43 = vsel %vm627_vm1, %v626_v17, %v625_v40  ;;  %v632_v18 = vrot.slane %v5459_v41, 4 }
 0x1d0   : > { %v5471_v25 = vpop.eup %4415  ;;  %v631_v7 = vsel %vm630_vm2, %v629_v35, %v628_v43  ;;  %v635_v31 = vrot.slane %v5466_v2, 3  ;;  %v1423_v16 = vrot.slane %v1422_v32, 2  ;;  %v1428_v34 = vadd.f32 %v1427_v59, %v5324_v48 }
 0x1d1   : > { %v1418_v4 = vadd.f32 %v1417_v11, %v1416_v52  ;;  %v5476_v54 = vpop.eup %4417  ;;  %v634_v3 = vsel %vm633_vm3, %v632_v18, %v631_v7  ;;  %v638_v63 = vrot.slane %v5471_v25, 2  ;;  %v1433_v17 = vrot.slane %v5328_v49, 4 }
 0x1d2   : > { %v5481_v40 = vpop.eup %4419  ;;  %v637_v52 = vsel %vm636_vm4, %v635_v31, %v634_v3  ;;  %v641_v11 = vrot.slane %v5476_v54, 1  ;;  %v1424_v35 = vadd.f32 %v1423_v16, %v1422_v32  ;;  %v1429_v43 = vrot.slane %v1428_v34, 2 }
 0x1d3   : > { %v1419_v44 = vrot.slane %v1418_v4, 1  ;;  %v5485_v10 = vpop.eup %4421  ;;  %v640_v48 = vsel %vm639_vm5, %v638_v63, %v637_v52  ;;  %v1434_v18 = vadd.f32 %v1433_v17, %v5328_v49  ;;  %v1439_v7 = vrot.slane %v5332_v50, 4 }
 0x1d4   : > { %7934 = vst [vmem:[#allocation96_spill] sm:$0xff] %v5485_v10  ;;  %v5492_v29 = vpop.eup %4423  ;;  %v643_v60 = vsel %vm642_vm6, %v641_v11, %v640_v48  ;;  %v644_v31 = vrot.slane %v5485_v10, 7  ;;  %v1425_v3 = vrot.slane %v1424_v35, 1  ;;  %v1430_v27 = vadd.f32 %v1429_v43, %v1428_v34 }
 0x1d5   : > { %v5488_v59 = vadd.f32 %v1419_v44, %v1418_v4  ;;  %7936 = vst [vmem:[#allocation98_spill] sm:$0xff] %v5492_v29  ;;  %v5496_v32 = vpop.eup %4425  ;;  %v646_v16 = vrot.slane %v5492_v29, 6  ;;  %v1435_v57 = vrot.slane %v1434_v18, 2  ;;  %v1440_v4 = vadd.f32 %v1439_v7, %v5332_v50 }
 0x1d6   : > { %v1445_v63 = vrot.slane %v5336_v38, 4  ;;  %v5501_v49 = vpop.eup %4427  ;;  %v645_v44 = vsel %vm624_vm0, %v644_v31, %v5481_v40  ;;  %v648_v17 = vrot.slane %v5496_v32, 5  ;;  %v5506_v52 = vadd.f32 %v1425_v3, %v1424_v35 }
 0x1d7   : > { %7935 = vst [vmem:[#allocation97_spill] sm:$0xff] %v5488_v59  ;;  %v1431_v11 = vrot.slane %v1430_v27, 1  ;;  %v5508_v34 = vpop.eup %4429  ;;  %v647_v43 = vsel %vm627_vm1, %v646_v16, %v645_v44  ;;  %v650_v48 = vrot.slane %v5501_v49, 4  ;;  %v1436_v14 = vadd.f32 %v1435_v57, %v1434_v18 }
 0x1d8   : > { %7937 = vst [vmem:[#allocation99_spill] sm:$0xff] %v5506_v52  ;;  %v1441_v50 = vrot.slane %v1440_v4, 2  ;;  %v5512_v7 = vpop.eup %4431  ;;  %v649_v1 = vsel %vm630_vm2, %v648_v17, %v647_v43  ;;  %v652_v8 = vrot.slane %v5508_v34, 3  ;;  %v1446_v35 = vadd.f32 %v1445_v63, %v5336_v38 }
 0x1d9   : > { %v5516_v31 = vadd.f32 %v1431_v11, %v1430_v27  ;;  %v5519_v3 = vpop.eup %4433  ;;  %v651_v19 = vsel %vm633_vm3, %v650_v48, %v649_v1  ;;  %v654_v16 = vrot.slane %v5512_v7, 2  ;;  %v1437_v44 = vrot.slane %v1436_v14, 1 }
 0x1da   : > { %v1442_v42 = vadd.f32 %v1441_v50, %v1440_v4  ;;  %v653_v57 = vsel %vm636_vm4, %v652_v8, %v651_v19  ;;  %v656_v18 = vrot.slane %v5519_v3, 1  ;;  %v1447_v30 = vrot.slane %v1446_v35, 2 }
 0x1db   : > { %7938 = vst [vmem:[#allocation100_spill] sm:$0xff] %v5516_v31  ;;  %v1451_v17 = vrot.slane %v5344_v9, 4  ;;  %v655_v27 = vsel %vm639_vm5, %v654_v16, %v653_v57  ;;  %v5527_v11 = vadd.f32 %v1437_v44, %v1436_v14  ;;  %v1457_v63 = vrot.slane %v5348_v15, 4 }
 0x1dc   : > { %v1443_v38 = vrot.slane %v1442_v42, 1  ;;  %v657_v1 = vsel %vm642_vm6, %v656_v18, %v655_v27  ;;  %v1448_v43 = vadd.f32 %v1447_v30, %v1446_v35  ;;  %v1463_v4 = vrot.slane %v5356_v53, 4 }
 0x1dd   : > { %7939 = vst [vmem:[#allocation101_spill] sm:$0xff] %v5527_v11  ;;  %v1452_v48 = vadd.f32 %v1451_v17, %v5344_v9  ;;  %v660_v8 = vadd.f32 %v657_v1, %v643_v60  ;;  %v1458_v50 = vadd.f32 %v1457_v63, %v5348_v15  ;;  %v1469_v13 = vrot.slane %v5360_v62, 4 }
 0x1de   : > { %v5533_v19 = vadd.f32 %v1443_v38, %v1442_v42  ;;  %v1449_v16 = vrot.slane %v1448_v43, 1  ;;  %v1464_v44 = vadd.f32 %v1463_v4, %v5356_v53  ;;  %v1475_v57 = vmax.f32 %v5429_v0, %v5450_v55 }
 0x1df   : > { %v1453_v14 = vrot.slane %v1452_v48, 2  ;;  %v661_v18 = vrot.slane %v660_v8, 4  ;;  %v1459_v30 = vrot.slane %v1458_v50, 2  ;;  %v1470_v9 = vadd.f32 %v1469_v13, %v5360_v62 }
 0x1e0   : > { %7940 = vst [vmem:[#allocation102_spill] sm:$0xff] %v5533_v19  ;;  %v1476_v60 = vmax.f32 %v5431_v58, %v5457_v22  ;;  %v5543_v42 = vadd.f32 %v1449_v16, %v1448_v43  ;;  %v1465_v15 = vrot.slane %v1464_v44, 2  ;;  %v1477_v17 = vmax.f32 %v5437_v33, %v5488_v59 }
 0x1e1   : > { %v1454_v35 = vadd.f32 %v1453_v14, %v1452_v48  ;;  %v662_v27 = vadd.f32 %v661_v18, %v660_v8  ;;  %v1460_v38 = vadd.f32 %v1459_v30, %v1458_v50  ;;  %v1471_v53 = vrot.slane %v1470_v9, 2 }
 0x1e2   : > { %7941 = vst [vmem:[#allocation103_spill] sm:$0xff] %v5543_v42  ;;  %v1478_v63 = vmax.f32 %v5439_v12, %v5506_v52  ;;  %v1466_v4 = vadd.f32 %v1465_v15, %v1464_v44  ;;  %v1479_v62 = vmax.f32 %v1475_v57, %v5516_v31  ;;  %v1480_v13 = vmax.f32 %v1476_v60, %v5527_v11 }
 0x1e3   : > { %v1455_v1 = vrot.slane %v1454_v35, 1  ;;  %v663_v29 = vrot.slane %v662_v27, 2  ;;  %v1461_v43 = vrot.slane %v1460_v38, 1  ;;  %v1472_v16 = vadd.f32 %v1471_v53, %v1470_v9 }
 0x1e4   : > { %v1481_v48 = vmax.f32 %v1477_v17, %v5533_v19  ;;  %v1467_v10 = vrot.slane %v1466_v4, 1  ;;  %v1482_v8 = vmax.f32 %v1478_v63, %v5543_v42  ;;  %v2258_v50 = vadd.f32 %v5282_v51, %v5258_v23 }
 0x1e5   : > { %v5552_v14 = vadd.f32 %v1455_v1, %v1454_v35  ;;  %v664_v18 = vadd.f32 %v663_v29, %v662_v27  ;;  %v5557_v30 = vadd.f32 %v1461_v43, %v1460_v38  ;;  %v1473_v44 = vrot.slane %v1472_v16, 1 }
 0x1e6   : > { %v3183_v57 = vadd.f32 %v5284_v39, %v5260_v26  ;;  %v5561_v60 = vadd.f32 %v1467_v10, %v1466_v4  ;;  %v2259_v35 = vadd.f32 %v5246_v28, %v2258_v50 }
 0x1e7   : > { %7942 = vst [vmem:[#allocation104_spill] sm:$0xff] %v5552_v14  ;;  %7943 = vst [vmem:[#allocation105_spill] sm:$0xff] %v5557_v30  ;;  %v1483_v9 = vmax.f32 %v1479_v62, %v5552_v14  ;;  %v665_v15 = vrot.slane %v664_v18, 1  ;;  %v5565_v17 = vadd.f32 %v1473_v44, %v1472_v16  ;;  %v1484_v53 = vmax.f32 %v1480_v13, %v5557_v30 }
 0x1e8   : > { %7944 = vst [vmem:[#allocation106_spill] sm:$0xff] %v5561_v60  ;;  %v3184_v63 = vadd.f32 %v5248_v24, %v3183_v57  ;;  %v1485_v29 = vmax.f32 %v1481_v48, %v5561_v60  ;;  %v2260_v27 = vadd.f32 %v5270_v36, %v2259_v35  ;;  %v668_v62 = vlaneseq }
 0x1e9   : > { %7945 = vst [vmem:[#allocation107_spill] sm:$0xff] %v5565_v17  ;;  %v666_v38 = vadd.f32 %v665_v15, %v664_v18  ;;  %v1486_v1 = vmax.f32 %v1482_v8, %v5565_v17  ;;  %v1487_v10 = vmax.f32 %v1483_v9, %v1484_v53 }
 0x1ea   : > { %v3185_v4 = vadd.f32 %v5272_v37, %v3184_v63  ;;  %v2261_v43 = vadd.f32 %v2260_v27, %v5350_v5  ;;  %v669_v57 = vshrl.u32 %v668_v62, 7  ;;  %v7947_v63 = vld [vmem:[#allocation68_spill] sm:$0xff] }
 0x1eb   : > { %4435 = vrcp.f32 %v666_v38  ;;  %v1488_v16 = vmax.f32 %v1485_v29, %v1486_v1 }
 0x1ec   : > { %v3186_v50 = vadd.f32 %v3185_v4, %v5352_v61  ;;  %v2262_v13 = vadd.f32 %v2261_v43, %v5369_v45  ;;  %v5582_v9 = vsub.s32 0, %v669_v57 }
 0x1ed   : > { %v5576_v44 = vmax.f32 %v1487_v10, %v1488_v16  ;;  %v7948_v10 = vld [vmem:[#allocation71_spill] sm:$0xff] }
 0x1ee   : > { %v3187_v48 = vadd.f32 %v3186_v50, %v5371_v21  ;;  %v2263_v18 = vadd.f32 %v5338_v6, %v2262_v13  ;;  %7946 = vst [vmem:[#allocation108_spill] sm:$0xff] %v5582_v9 }
 0x1ef   : > { %v1490_v8 = vsub.f32 %v5429_v0, %v5576_v44  ;;  %v1491_v35 = vsub.f32 %v5431_v58, %v5576_v44  ;;  %v1492_v15 = vsub.f32 %v5437_v33, %v5576_v44  ;;  %v1493_v53 = vsub.f32 %v5439_v12, %v5576_v44  ;;  %v7961_v33 = vld [vmem:[#allocation72_spill] sm:$0xff] }
 0x1f0   : > { %v5591_v29 = vadd.f32 %v7947_v63, %v3187_v48  ;;  %v1494_v27 = vsub.f32 %v5450_v55, %v5576_v44  ;;  %v1495_v38 = vsub.f32 %v5457_v22, %v5576_v44  ;;  %v1496_v1 = vsub.f32 %v5488_v59, %v5576_v44  ;;  %v7960_v55 = vld [vmem:[#allocation15_spill] sm:$0xff] }
 0x1f1   : > { %v5600_v4 = vadd.f32 %v7948_v10, %v2263_v18  ;;  %v1497_v43 = vsub.f32 %v5506_v52, %v5576_v44  ;;  %v1498_v16 = vsub.f32 %v5516_v31, %v5576_v44  ;;  %v1499_v50 = vsub.f32 %v5527_v11, %v5576_v44 }
 0x1f2   : > { %v1506_v13 = vmul.f32 1.442695, %v1490_v8  ;;  %v1500_v57 = vsub.f32 %v5533_v19, %v5576_v44  ;;  %v1501_v18 = vsub.f32 %v5543_v42, %v5576_v44  ;;  %v1508_v63 = vmul.f32 1.442695, %v1491_v35 }
 0x1f3   : > { %v1502_v21 = vsub.f32 %v5552_v14, %v5576_v44  ;;  %v1503_v61 = vsub.f32 %v5557_v30, %v5576_v44  ;;  %v1510_v39 = vmul.f32 1.442695, %v1492_v15  ;;  %v1512_v26 = vmul.f32 1.442695, %v1493_v53 }
 0x1f4   : > { %4437 = vpow2.f32 %v1506_v13  ;;  %v1514_v35 = vmul.f32 1.442695, %v1494_v27  ;;  %v1516_v42 = vmul.f32 1.442695, %v1495_v38  ;;  %v1518_v19 = vmul.f32 1.442695, %v1496_v1 }
 0x1f5   : > { %v4436_v62 = vpop.eup %4435  ;;  %4439 = vpow2.f32 %v1508_v63  ;;  %v1520_v30 = vmul.f32 1.442695, %v1497_v43  ;;  %v1522_v11 = vmul.f32 1.442695, %v1498_v16  ;;  %v1524_v27 = vmul.f32 1.442695, %v1499_v50 }
 0x1f6   : > { %v671_v48 = vrot.slane %v4436_v62, %v5582_v9  ;;  %4441 = vpow2.f32 %v1510_v39  ;;  %v1528_v63 = vmul.f32 1.442695, %v1501_v18  ;;  %v5631_v38 = vmul.f32 1.442695, %v1502_v21  ;;  %v7949_v16 = vld [vmem:[#allocation13_spill] sm:$0xff] }
 0x1f7   : > { %v5636_v1 = vmul.f32 1.442695, %v1503_v61  ;;  %v7950_v50 = vld [vmem:[#allocation17_spill] sm:$0xff]  ;;  %4443 = vpow2.f32 %v1512_v26  ;;  %v3189_v58 = vadd.f32 %v7961_v33, %v5591_v29  ;;  %v7967_v33 = vld [vmem:[#allocation75_spill] sm:$0xff] }
 0x1f8   : > { %v672_v62 = vmul.f32 %v5435_v46, %v671_v48  ;;  %v673_v24 = vmul.f32 %v5441_v47, %v671_v48  ;;  %v683_v14 = vmul.f32 %v5496_v32, %v671_v48  ;;  %v684_v37 = vmul.f32 %v5501_v49, %v671_v48 }
 0x1f9   : > { %v685_v31 = vmul.f32 %v5508_v34, %v671_v48  ;;  %v686_v8 = vmul.f32 %v5512_v7, %v671_v48  ;;  %v687_v46 = vmul.f32 %v5519_v3, %v671_v48  ;;  %v674_v47 = vmul.f32 %v5447_v56, %v671_v48 }
 0x1fa   : > { %v691_v15 = vrot.slane %v672_v62, %v5582_v9  ;;  %v695_v53 = vrot.slane %v673_v24, %v5582_v9  ;;  %v1526_v32 = vmul.f32 1.442695, %v1500_v57  ;;  %v675_v49 = vmul.f32 %v5453_v20, %v671_v48  ;;  %v7952_v57 = vld [vmem:[#allocation98_spill] sm:$0xff]  ;;  %v7953_v62 = vld [vmem:[#allocation31_spill] sm:$0xff] }
 0x1fb   : > { %v676_v34 = vmul.f32 %v5459_v41, %v671_v48  ;;  %v735_v7 = vrot.slane %v683_v14, %v5582_v9  ;;  %v739_v56 = vrot.slane %v684_v37, %v5582_v9  ;;  %v743_v3 = vrot.slane %v685_v31, %v5582_v9  ;;  %v7951_v31 = vld [vmem:[#allocation96_spill] sm:$0xff] }
 0x1fc   : > { %v747_v24 = vrot.slane %v686_v8, %v5582_v9  ;;  %v751_v39 = vrot.slane %v687_v46, %v5582_v9  ;;  %v677_v43 = vmul.f32 %v5466_v2, %v671_v48  ;;  %v699_v21 = vrot.slane %v674_v47, %v5582_v9 }
 0x1fd   : > { %v752_v20 = vmul.f32 %v691_v15, %v7949_v16  ;;  %v753_v41 = vmul.f32 %v695_v53, %v7950_v50  ;;  %v678_v14 = vmul.f32 %v5471_v25, %v671_v48  ;;  %v679_v61 = vmul.f32 %v5476_v54, %v671_v48  ;;  %v7954_v25 = vld [vmem:[#allocation37_spill] sm:$0xff]  ;;  %v7956_v53 = vld [vmem:[#allocation35_spill] sm:$0xff] }
 0x1fe   : > { %v5649_v37 = vmul.f32 %v5481_v40, %v671_v48  ;;  %v5652_v13 = vmul.f32 %v7951_v31, %v671_v48  ;;  %v5655_v18 = vmul.f32 %v7952_v57, %v671_v48  ;;  %v703_v2 = vrot.slane %v675_v49, %v5582_v9  ;;  %v5662_v47 = vpop.eup %4437  ;;  %v7955_v40 = vld [vmem:[#allocation41_spill] sm:$0xff]  ;;  %v7957_v48 = vld [vmem:[#allocation39_spill] sm:$0xff] }
 0x1ff   : > { %v707_v8 = vrot.slane %v676_v34, %v5582_v9  ;;  %v5660_v46 = vmul.f32 %v7953_v62, %v735_v7  ;;  %v5665_v54 = vmul.f32 %v739_v56, %v7954_v25  ;;  %v5668_v15 = vmul.f32 %v743_v3, %v7955_v40  ;;  %v5676_v49 = vpop.eup %4439  ;;  %v7958_v7 = vld [vmem:[#allocation11_spill] sm:$0xff]  ;;  %v7959_v3 = vld [vmem:[#allocation77_spill] sm:$0xff] }
 0x200   : > { %v5671_v31 = vmul.f32 %v7956_v53, %v747_v24  ;;  %v5674_v57 = vmul.f32 %v7957_v48, %v751_v39  ;;  %v711_v34 = vrot.slane %v677_v43, %v5582_v9  ;;  %v754_v52 = vmul.f32 %v7958_v7, %v699_v21  ;;  %v5687_v43 = vpop.eup %4441 }
 0x201   : > { %v768_v59 = vadd.f32 %v753_v41, %v752_v20  ;;  %v715_v56 = vrot.slane %v678_v14, %v5582_v9  ;;  %v719_v22 = vrot.slane %v679_v61, %v5582_v9  ;;  %4445 = vpow2.f32 %v1514_v35  ;;  %v7962_v20 = vld [vmem:[#allocation81_spill] sm:$0xff]  ;;  %v7964_v61 = vld [vmem:[#allocation78_spill] sm:$0xff] }
 0x202   : > { %v2265_v24 = vadd.f32 %v5600_v4, %v7959_v3  ;;  %v755_v12 = vmul.f32 %v7960_v55, %v703_v2  ;;  %4447 = vpow2.f32 %v1516_v42  ;;  %v723_v26 = vrot.slane %v5649_v37, %v5582_v9  ;;  %v7963_v41 = vld [vmem:[#allocation21_spill] sm:$0xff]  ;;  %v7966_v2 = vld [vmem:[#allocation19_spill] sm:$0xff]  ;;  %v7968_v37 = vld [vmem:[#allocation82_spill] sm:$0xff] }
 0x203   : > { %v769_v39 = vadd.f32 %v768_v59, %v754_v52  ;;  %4449 = vpow2.f32 %v1518_v19  ;;  %v1554_v21 = vrot.slane %v5676_v49, 7  ;;  %v756_v14 = vmul.f32 %v707_v8, %v7963_v41  ;;  %v7965_v52 = vld [vmem:[#allocation25_spill] sm:$0xff]  ;;  %v7970_v8 = vld [vmem:[#allocation79_spill] sm:$0xff] }
 0x204   : > { %v2266_v35 = vadd.f32 %v2265_v24, %v7962_v20  ;;  %4451 = vpow2.f32 %v1520_v30  ;;  %v3190_v59 = vadd.f32 %v3189_v58, %v7964_v61  ;;  %v757_v42 = vmul.f32 %v711_v34, %v7965_v52  ;;  %v7972_v24 = vld [vmem:[#allocation76_spill] sm:$0xff]  ;;  %v7981_v61 = vld [vmem:[#allocation27_spill] sm:$0xff] }
 0x205   : > { %v770_v4 = vadd.f32 %v769_v39, %v755_v12  ;;  %v758_v29 = vmul.f32 %v7966_v2, %v715_v56  ;;  %4453 = vpow2.f32 %v1522_v11  ;;  %v1556_v19 = vrot.slane %v5687_v43, 6 }
 0x206   : > { %v2267_v0 = vadd.f32 %v7967_v33, %v2266_v35  ;;  %4455 = vpow2.f32 %v1524_v27  ;;  %v3191_v10 = vadd.f32 %v3190_v59, %v7968_v37  ;;  %v7969_v12 = vsub.f32 %v5561_v60, %v5576_v44  ;;  %v7974_v35 = vld [vmem:[#allocation85_spill] sm:$0xff] }
 0x207   : > { %v771_v3 = vadd.f32 %v770_v4, %v756_v14  ;;  %4457 = vpow2.f32 %v1526_v32  ;;  %v1555_v58 = vsel %vm624_vm0, %v1554_v21, %v5662_v47  ;;  %v7971_v11 = vsub.f32 %v5565_v17, %v5576_v44  ;;  %v5716_v4 = vpop.eup %4443  ;;  %v7975_v21 = vld [vmem:[#allocation23_spill] sm:$0xff] }
 0x208   : > { %v1534_v30 = vmul.f32 1.442695, %v7969_v12  ;;  %v2268_v34 = vadd.f32 %v7970_v8, %v2267_v0  ;;  %4459 = vpow2.f32 %v1528_v63  ;;  %v5710_v39 = vadd.f32 %v7972_v24, %v3191_v10  ;;  %v7977_v12 = vld [vmem:[#allocation29_spill] sm:$0xff] }
 0x209   : > { %v772_v56 = vadd.f32 %v771_v3, %v757_v42  ;;  %v1536_v27 = vmul.f32 1.442695, %v7971_v11  ;;  %v727_v32 = vrot.slane %v5652_v13, %v5582_v9  ;;  %4461 = vpow2.f32 %v5631_v38  ;;  %v7976_v38 = vld [vmem:[#allocation91_spill] sm:$0xff] }
 0x20a   : > { %7973 = vst [vmem:[#allocation96_spill] sm:$0xff] %v5710_v39  ;;  %v2269_v14 = vadd.f32 %v2268_v34, %v7974_v35  ;;  %v759_v0 = vmul.f32 %v7975_v21, %v719_v22  ;;  %4463 = vpow2.f32 %v5636_v1  ;;  %v1557_v44 = vsel %vm627_vm1, %v1556_v19, %v1555_v58  ;;  %v7978_v58 = vld [vmem:[#allocation83_spill] sm:$0xff] }
 0x20b   : > { %v773_v3 = vadd.f32 %v772_v56, %v758_v29  ;;  %v5721_v63 = vpop.eup %4445  ;;  %v731_v10 = vrot.slane %v5655_v18, %v5582_v9  ;;  %4465 = vpow2.f32 %v1534_v30  ;;  %v1558_v13 = vrot.slane %v5716_v4, 5  ;;  %v7979_v30 = vld [vmem:[#allocation33_spill] sm:$0xff] }
 0x20c   : > { %v2270_v59 = vadd.f32 %v2269_v14, %v7976_v38  ;;  %v5727_v42 = vpop.eup %4447  ;;  %v760_v34 = vmul.f32 %v723_v26, %v7977_v12  ;;  %4467 = vpow2.f32 %v1536_v27  ;;  %v1560_v1 = vrot.slane %v5721_v63, 4  ;;  %v7980_v27 = vld [vmem:[#allocation87_spill] sm:$0xff] }
 0x20d   : > { %v774_v22 = vadd.f32 %v773_v3, %v759_v0  ;;  %v5731_v29 = vpop.eup %4449  ;;  %v1559_v19 = vsel %vm630_vm2, %v1558_v13, %v1557_v44  ;;  %v761_v11 = vmul.f32 %v727_v32, %v7979_v30  ;;  %v1562_v26 = vrot.slane %v5727_v42, 3 }
 0x20e   : > { %v2271_v56 = vadd.f32 %v7978_v58, %v2270_v59  ;;  %v5735_v18 = vpop.eup %4451  ;;  %v1561_v14 = vsel %vm633_vm3, %v1560_v1, %v1559_v19  ;;  %v762_v17 = vmul.f32 %v7981_v61, %v731_v10  ;;  %v1564_v19 = vrot.slane %v5731_v29, 2 }
 0x20f   : > { %v775_v24 = vadd.f32 %v774_v22, %v760_v34  ;;  %v5739_v37 = vpop.eup %4453  ;;  %v1563_v59 = vsel %vm636_vm4, %v1562_v26, %v1561_v14 }
 0x210   : > { %v2272_v0 = vadd.f32 %v7980_v27, %v2271_v56  ;;  %v5743_v3 = vpop.eup %4455  ;;  %v1566_v27 = vrot.slane %v5735_v18, 1 }
 0x211   : > { %v776_v44 = vadd.f32 %v775_v24, %v761_v11  ;;  %v5746_v13 = vpop.eup %4457  ;;  %v1568_v32 = vrot.slane %v5743_v3, 7 }
 0x212   : > { %v5750_v34 = vmul.f32 0.0625, %v2272_v0  ;;  %v5752_v22 = vpop.eup %4459  ;;  %v1570_v56 = vrot.slane %v5746_v13, 6 }
 0x213   : > { %v777_v1 = vadd.f32 %v776_v44, %v762_v17  ;;  %v5756_v60 = vpop.eup %4461  ;;  %v1569_v24 = vsel %vm624_vm0, %v1568_v32, %v5739_v37  ;;  %v1572_v10 = vrot.slane %v5752_v22, 5  ;;  %v1565_v17 = vsel %vm639_vm5, %v1564_v19, %v1563_v59 }
 0x214   : > { %v2274_v11 = vmul.f32 %v5750_v34, %v5750_v34  ;;  %v5763_v14 = vpop.eup %4463  ;;  %v1571_v0 = vsel %vm627_vm1, %v1570_v56, %v1569_v24  ;;  %v1574_v44 = vrot.slane %v5756_v60, 4 }
 0x215   : > { %v778_v26 = vadd.f32 %v777_v1, %v5660_v46  ;;  %v5769_v39 = vpop.eup %4465  ;;  %v1573_v32 = vsel %vm630_vm2, %v1572_v10, %v1571_v0  ;;  %v1576_v58 = vrot.slane %v5763_v14, 3  ;;  %v1567_v1 = vsel %vm642_vm6, %v1566_v27, %v1565_v17 }
 0x216   : > { %v2275_v38 = vrot.slane %v2274_v11, 4  ;;  %v5774_v35 = vpop.eup %4467  ;;  %v1575_v46 = vsel %vm633_vm3, %v1574_v44, %v1573_v32  ;;  %v1578_v59 = vrot.slane %v5769_v39, 2 }
 0x217   : > { %v779_v8 = vadd.f32 %v778_v26, %v5665_v54  ;;  %v1577_v19 = vsel %vm636_vm4, %v1576_v58, %v1575_v46  ;;  %v1580_v56 = vrot.slane %v5774_v35, 1 }
 0x218   : > { %v2276_v24 = vadd.f32 %v2275_v38, %v2274_v11  ;;  %v1579_v0 = vsel %vm639_vm5, %v1578_v59, %v1577_v19 }
 0x219   : > { %v780_v10 = vadd.f32 %v779_v8, %v5668_v15  ;;  %v1581_v33 = vsel %vm642_vm6, %v1580_v56, %v1579_v0 }
 0x21a   : > { %v2277_v20 = vrot.slane %v2276_v24, 2  ;;  %v1584_v26 = vadd.f32 %v1581_v33, %v1567_v1 }
 0x21b   : > { %v781_v54 = vadd.f32 %v780_v10, %v5671_v31 }
 0x21c   : > { %v2278_v44 = vadd.f32 %v2277_v20, %v2276_v24  ;;  %v1585_v6 = vrot.slane %v1584_v26, 4 }
 0x21d   : > { %v782_v32 = vadd.f32 %v781_v54, %v5674_v57 }
 0x21e   : > { %v2279_v27 = vrot.slane %v2278_v44, 1  ;;  %v1586_v58 = vadd.f32 %v1585_v6, %v1584_v26 }
 0x21f   : > { %v783_v17 = vmul.f32 %v782_v32, %v782_v32 }
 0x220   : > { %v2280_v46 = vadd.f32 %v2279_v27, %v2278_v44  ;;  %v1587_v38 = vrot.slane %v1586_v58, 2 }
 0x221   : > { %v784_v45 = vrot.slane %v783_v17, 4 }
 0x222   : > { %v2281_v11 = vadd.f32 1e-08, %v2280_v46  ;;  %v1588_v8 = vadd.f32 %v1587_v38, %v1586_v58 }
 0x223   : > { %v785_v15 = vadd.f32 %v784_v45, %v783_v17 }
 0x224   : > { %4469 = vrsqrt.f32 %v2281_v11  ;;  %v2284_v59 = vadd.f32 1.0, %v2281_v11  ;;  %v1589_v56 = vrot.slane %v1588_v8, 1 }
 0x225   : > { %v786_v19 = vrot.slane %v785_v15, 2 }
 0x226   : > { %4471 = vrcp.f32 %v2284_v59  ;;  %v1590_v33 = vadd.f32 %v1589_v56, %v1588_v8 }
 0x227   : > { %v787_v31 = vadd.f32 %v786_v19, %v785_v15 }
 0x228   : > { %4473 = vrcp.f32 %v1590_v33 }
 0x229   : > { %v788_v20 = vrot.slane %v787_v31, 1 }
 0x22b   : > { %v789_v57 = vadd.f32 %v788_v20, %v787_v31 }
 0x22d   : > { %v790_v1 = vadd.f32 1e-08, %v789_v57 }
 0x22e   : > { %v4470_v24 = vpop.eup %4469 }
 0x22f   : > { %4475 = vrsqrt.f32 %v790_v1  ;;  %v793_v6 = vadd.f32 1.0, %v790_v1  ;;  %v2283_v10 = vmul.f32 %v4470_v24, %v2281_v11 }
 0x230   : > { %v4472_v0 = vpop.eup %4471 }
 0x231   : > { %4477 = vrcp.f32 %v793_v6  ;;  %v2286_v54 = vmul.f32 %v4472_v0, %v2283_v10 }
 0x232   : > { %v4474_v45 = vpop.eup %4473 }
 0x233   : > { %v5788_v26 = vmul.f32 %v2286_v54, %v5750_v34  ;;  %v1595_v44 = vrot.slane %v4474_v45, %v5582_v9 }
 0x235   : > { %v5793_v27 = vmul.f32 %v5788_v26, %v5258_v23  ;;  %v5797_v17 = vmul.f32 %v5788_v26, %v5282_v51  ;;  %v5801_v58 = vmul.f32 %v5246_v28, %v5788_v26  ;;  %v5805_v46 = vmul.f32 %v5270_v36, %v5788_v26 }
 0x236   : > { %v5808_v34 = vmul.f32 %v5662_v47, %v1595_v44  ;;  %v5811_v11 = vmul.f32 %v5676_v49, %v1595_v44  ;;  %v5814_v15 = vmul.f32 %v5687_v43, %v1595_v44  ;;  %v5817_v8 = vmul.f32 %v5716_v4, %v1595_v44 }
 0x237   : > { %7982 = vst [vmem:[#allocation98_spill] sm:$0xff] %v5797_v17  ;;  %7983 = vst [vmem:[#allocation109_spill] sm:$0xff] %v5801_v58  ;;  %v5820_v59 = vmul.f32 %v5721_v63, %v1595_v44  ;;  %v5823_v56 = vmul.f32 %v5727_v42, %v1595_v44  ;;  %v5826_v47 = vmul.f32 %v5731_v29, %v1595_v44 }
 0x238   : > { %7984 = vst [vmem:[#allocation110_spill] sm:$0xff] %v5805_v46  ;;  %v5829_v31 = vmul.f32 %v5735_v18, %v1595_v44  ;;  %v5832_v43 = vmul.f32 %v5752_v22, %v1595_v44  ;;  %v5835_v4 = vmul.f32 %v5756_v60, %v1595_v44  ;;  %v5838_v63 = vmul.f32 %v5763_v14, %v1595_v44 }
 0x239   : > { %v4476_v38 = vpop.eup %4475  ;;  %v5841_v33 = vmul.f32 %v5769_v39, %v1595_v44  ;;  %v5844_v29 = vmul.f32 %v5739_v37, %v1595_v44  ;;  %v5847_v18 = vmul.f32 %v5743_v3, %v1595_v44  ;;  %v5850_v20 = vmul.f32 %v5746_v13, %v1595_v44 }
 0x23a   : > { %v792_v19 = vmul.f32 %v4476_v38, %v790_v1  ;;  %v5853_v22 = vmul.f32 %v5774_v35, %v1595_v44 }
 0x23b   : > { %v4478_v49 = vpop.eup %4477 }
 0x23c   : > { %v795_v42 = vmul.f32 %v4478_v49, %v792_v19 }
 0x23e   : > { %v796_v37 = vmul.f32 %v795_v42, %v782_v32 }
 0x240   : > { %v797_v6 = vmul.f32 %v796_v37, %v7949_v16  ;;  %v798_v10 = vmul.f32 %v796_v37, %v7950_v50  ;;  %v799_v0 = vmul.f32 %v7958_v7, %v796_v37  ;;  %v800_v54 = vmul.f32 %v7960_v55, %v796_v37 }
 0x241   : > { %v801_v45 = vmul.f32 %v796_v37, %v7963_v41  ;;  %v802_v44 = vmul.f32 %v796_v37, %v7965_v52  ;;  %v803_v38 = vmul.f32 %v7966_v2, %v796_v37  ;;  %v804_v19 = vmul.f32 %v7975_v21, %v796_v37 }
 0x242   : > { %v5884_v49 = vmul.f32 %v796_v37, %v7977_v12  ;;  %v5887_v42 = vmul.f32 %v796_v37, %v7979_v30  ;;  %v5890_v35 = vmul.f32 %v7981_v61, %v796_v37  ;;  %v5893_v32 = vmul.f32 %v7953_v62, %v796_v37 }
 0x243   : > { %v5896_v24 = vmul.f32 %v796_v37, %v7954_v25  ;;  %v5899_v1 = vmul.f32 %v796_v37, %v7955_v40  ;;  %v5902_v57 = vmul.f32 %v7956_v53, %v796_v37  ;;  %v5905_v13 = vmul.f32 %v7957_v48, %v796_v37 }
 0x244   : > { %v813_v3 = vrot.slane %v797_v6, 4  ;;  %v819_v14 = vrot.slane %v798_v10, 4  ;;  %v825_v39 = vrot.slane %v799_v0, 4  ;;  %v831_v60 = vrot.slane %v800_v54, 4 }
 0x245   : > { %v837_v36 = vrot.slane %v801_v45, 4  ;;  %v843_v28 = vrot.slane %v802_v44, 4  ;;  %v849_v51 = vrot.slane %v803_v38, 4  ;;  %v855_v23 = vrot.slane %v804_v19, 4 }
 0x246   : > { %v814_v62 = vadd.f32 %v813_v3, %v797_v6  ;;  %v820_v25 = vadd.f32 %v819_v14, %v798_v10  ;;  %v826_v61 = vadd.f32 %v825_v39, %v799_v0  ;;  %v832_v30 = vadd.f32 %v831_v60, %v800_v54 }
 0x247   : > { %v838_v40 = vadd.f32 %v837_v36, %v801_v45  ;;  %v844_v12 = vadd.f32 %v843_v28, %v802_v44  ;;  %v850_v21 = vadd.f32 %v849_v51, %v803_v38  ;;  %v856_v53 = vadd.f32 %v855_v23, %v804_v19 }
 0x248   : > { %v815_v2 = vrot.slane %v814_v62, 2  ;;  %v821_v52 = vrot.slane %v820_v25, 2  ;;  %v827_v37 = vrot.slane %v826_v61, 2  ;;  %v833_v48 = vrot.slane %v832_v30, 2 }
 0x249   : > { %v839_v41 = vrot.slane %v838_v40, 2  ;;  %v845_v55 = vrot.slane %v844_v12, 2  ;;  %v851_v7 = vrot.slane %v850_v21, 2  ;;  %v857_v50 = vrot.slane %v856_v53, 2 }
 0x24a   : > { %v816_v16 = vadd.f32 %v815_v2, %v814_v62  ;;  %v822_v46 = vadd.f32 %v821_v52, %v820_v25  ;;  %v828_v58 = vadd.f32 %v827_v37, %v826_v61  ;;  %v834_v17 = vadd.f32 %v833_v48, %v832_v30 }
 0x24b   : > { %v840_v3 = vadd.f32 %v839_v41, %v838_v40  ;;  %v846_v14 = vadd.f32 %v845_v55, %v844_v12  ;;  %v852_v39 = vadd.f32 %v851_v7, %v850_v21  ;;  %v858_v60 = vadd.f32 %v857_v50, %v856_v53 }
 0x24c   : > { %v817_v36 = vrot.slane %v816_v16, 1  ;;  %v823_v28 = vrot.slane %v822_v46, 1  ;;  %v829_v51 = vrot.slane %v828_v58, 1  ;;  %v835_v23 = vrot.slane %v834_v17, 1 }
 0x24d   : > { %v841_v6 = vrot.slane %v840_v3, 1  ;;  %v847_v10 = vrot.slane %v846_v14, 1  ;;  %v853_v0 = vrot.slane %v852_v39, 1  ;;  %v859_v54 = vrot.slane %v858_v60, 1 }
 0x24e   : > { %v818_v45 = vadd.f32 %v817_v36, %v816_v16  ;;  %v824_v44 = vadd.f32 %v823_v28, %v822_v46  ;;  %v830_v38 = vadd.f32 %v829_v51, %v828_v58  ;;  %v836_v19 = vadd.f32 %v835_v23, %v834_v17 }
 0x24f   : > { %v842_v62 = vadd.f32 %v841_v6, %v840_v3  ;;  %v848_v25 = vadd.f32 %v847_v10, %v846_v14  ;;  %v854_v61 = vadd.f32 %v853_v0, %v852_v39  ;;  %v860_v48 = vadd.f32 %v859_v54, %v858_v60 }
 0x250   : > { %v861_v55 = vrot.slane %v5884_v49, 4  ;;  %v867_v50 = vrot.slane %v5887_v42, 4  ;;  %v873_v40 = vrot.slane %v5890_v35, 4  ;;  %v879_v53 = vrot.slane %v5893_v32, 4 }
 0x251   : > { %v885_v7 = vrot.slane %v5896_v24, 4  ;;  %v891_v41 = vrot.slane %v5899_v1, 4  ;;  %v897_v16 = vrot.slane %v5902_v57, 4  ;;  %v903_v52 = vrot.slane %v5905_v13, 4 }
 0x252   : > { %v862_v2 = vadd.f32 %v861_v55, %v5884_v49  ;;  %v868_v21 = vadd.f32 %v867_v50, %v5887_v42  ;;  %v874_v12 = vadd.f32 %v873_v40, %v5890_v35  ;;  %v880_v30 = vadd.f32 %v879_v53, %v5893_v32 }
 0x253   : > { %v886_v17 = vadd.f32 %v885_v7, %v5896_v24  ;;  %v892_v58 = vadd.f32 %v891_v41, %v5899_v1  ;;  %v898_v46 = vadd.f32 %v897_v16, %v5902_v57  ;;  %v904_v37 = vadd.f32 %v903_v52, %v5905_v13 }
 0x254   : > { %v863_v3 = vrot.slane %v862_v2, 2  ;;  %v869_v14 = vrot.slane %v868_v21, 2  ;;  %v875_v39 = vrot.slane %v874_v12, 2  ;;  %v881_v60 = vrot.slane %v880_v30, 2 }
 0x255   : > { %v887_v36 = vrot.slane %v886_v17, 2  ;;  %v893_v49 = vrot.slane %v892_v58, 2  ;;  %v899_v28 = vrot.slane %v898_v46, 2  ;;  %v905_v42 = vrot.slane %v904_v37, 2 }
 0x256   : > { %v864_v51 = vadd.f32 %v863_v3, %v862_v2  ;;  %v870_v35 = vadd.f32 %v869_v14, %v868_v21  ;;  %v876_v23 = vadd.f32 %v875_v39, %v874_v12  ;;  %v882_v32 = vadd.f32 %v881_v60, %v880_v30  ;;  %v7987_v3 = vld [vmem:[#allocation45_spill] sm:$0xff]  ;;  %v7988_v39 = vld [vmem:[#allocation46_spill] sm:$0xff] }
 0x257   : > { %v888_v6 = vadd.f32 %v887_v36, %v886_v17  ;;  %v894_v24 = vadd.f32 %v893_v49, %v892_v58  ;;  %v900_v10 = vadd.f32 %v899_v28, %v898_v46  ;;  %v906_v1 = vadd.f32 %v905_v42, %v904_v37  ;;  %v7985_v17 = vld [vmem:[#allocation43_spill] sm:$0xff]  ;;  %v7986_v46 = vld [vmem:[#allocation44_spill] sm:$0xff] }
 0x258   : > { %v865_v0 = vrot.slane %v864_v51, 1  ;;  %v871_v57 = vrot.slane %v870_v35, 1  ;;  %v877_v54 = vrot.slane %v876_v23, 1  ;;  %v883_v13 = vrot.slane %v882_v32, 1  ;;  %v7989_v36 = vld [vmem:[#allocation47_spill] sm:$0xff]  ;;  %v7990_v28 = vld [vmem:[#allocation48_spill] sm:$0xff] }
 0x259   : > { %v889_v55 = vrot.slane %v888_v6, 1  ;;  %v895_v50 = vrot.slane %v894_v24, 1  ;;  %v901_v40 = vrot.slane %v900_v10, 1  ;;  %v907_v53 = vrot.slane %v906_v1, 1 }
 0x25a   : > { %v866_v7 = vadd.f32 %v865_v0, %v864_v51  ;;  %v872_v41 = vadd.f32 %v871_v57, %v870_v35  ;;  %v878_v16 = vadd.f32 %v877_v54, %v876_v23  ;;  %v884_v52 = vadd.f32 %v883_v13, %v882_v32  ;;  %v7991_v51 = vld [vmem:[#allocation49_spill] sm:$0xff]  ;;  %v8000_v0 = vld [vmem:[#allocation54_spill] sm:$0xff]  ;;  %v8001_v57 = vld [vmem:[#allocation55_spill] sm:$0xff] }
 0x25b   : > { %v890_v2 = vadd.f32 %v889_v55, %v888_v6  ;;  %v896_v21 = vadd.f32 %v895_v50, %v894_v24  ;;  %v902_v12 = vadd.f32 %v901_v40, %v900_v10  ;;  %v908_v30 = vadd.f32 %v907_v53, %v906_v1  ;;  %v7995_v6 = vld [vmem:[#allocation18_spill] sm:$0xff]  ;;  %v7998_v24 = vld [vmem:[#allocation12_spill] sm:$0xff]  ;;  %v8003_v40 = vld [vmem:[#allocation59_spill] sm:$0xff] }
 0x25c   : > { %v5924_v58 = vadd.f32 %v818_v45, %v7985_v17  ;;  %v5927_v37 = vadd.f32 %v824_v44, %v7986_v46  ;;  %v5930_v14 = vadd.f32 %v830_v38, %v7987_v3  ;;  %v5933_v60 = vadd.f32 %v836_v19, %v7988_v39  ;;  %v7992_v45 = vld [vmem:[#allocation50_spill] sm:$0xff] }
 0x25d   : > { %v5936_v49 = vadd.f32 %v842_v62, %v7989_v36  ;;  %v5939_v42 = vadd.f32 %v848_v25, %v7990_v28  ;;  %v5942_v35 = vadd.f32 %v854_v61, %v7991_v51  ;;  %v5945_v23 = vadd.f32 %v860_v48, %v7992_v45  ;;  %v7993_v38 = vld [vmem:[#allocation14_spill] sm:$0xff]  ;;  %v7999_v48 = vld [vmem:[#allocation53_spill] sm:$0xff]  ;;  %v8008_v51 = vld [vmem:[#allocation16_spill] sm:$0xff] }
 0x25e   : > { %v1675_v44 = vrot.slane %v5853_v22, %v5582_v9  ;;  %v7994_v19 = vrot.slane %v5808_v34, %v5582_v9  ;;  %v7996_v62 = vrot.slane %v5811_v11, %v5582_v9  ;;  %v7997_v61 = vrot.slane %v5814_v15, %v5582_v9  ;;  %v8002_v34 = vld [vmem:[#allocation56_spill] sm:$0xff]  ;;  %v8006_v17 = vld [vmem:[#allocation62_spill] sm:$0xff] }
 0x25f   : > { %v5962_v1 = vadd.f32 %v866_v7, %v7999_v48  ;;  %v5965_v22 = vadd.f32 %v872_v41, %v8000_v0  ;;  %v5968_v54 = vadd.f32 %v878_v16, %v8001_v57  ;;  %v5971_v13 = vadd.f32 %v884_v52, %v8002_v34  ;;  %v8004_v7 = vld [vmem:[#allocation60_spill] sm:$0xff]  ;;  %v8005_v16 = vld [vmem:[#allocation61_spill] sm:$0xff]  ;;  %v8009_v45 = vld [vmem:[#allocation22_spill] sm:$0xff] }
 0x260   : > { %v1676_v32 = vmul.f32 %v7994_v19, %v7993_v38  ;;  %v1677_v25 = vmul.f32 %v7996_v62, %v7995_v6  ;;  %v1678_v10 = vmul.f32 %v7998_v24, %v7997_v61  ;;  %v925_v11 = vmax.f32 %v5924_v58, %v5936_v49  ;;  %v8012_v62 = vld [vmem:[#allocation32_spill] sm:$0xff]  ;;  %v8013_v48 = vld [vmem:[#allocation38_spill] sm:$0xff] }
 0x261   : > { %v926_v15 = vmax.f32 %v5927_v37, %v5939_v42  ;;  %v927_v55 = vmax.f32 %v5930_v14, %v5942_v35  ;;  %v928_v50 = vmax.f32 %v5933_v60, %v5945_v23  ;;  %v5982_v53 = vadd.f32 %v890_v2, %v8003_v40 }
 0x262   : > { %v5985_v41 = vadd.f32 %v896_v21, %v8004_v7  ;;  %v5988_v52 = vadd.f32 %v902_v12, %v8005_v16  ;;  %v5991_v46 = vadd.f32 %v908_v30, %v8006_v17  ;;  %v929_v3 = vmax.f32 %v925_v11, %v5962_v1  ;;  %v8019_v7 = vld [vmem:[#allocation40_spill] sm:$0xff] }
 0x263   : > { %v930_v39 = vmax.f32 %v926_v15, %v5965_v22  ;;  %v931_v36 = vmax.f32 %v927_v55, %v5968_v54  ;;  %v932_v28 = vmax.f32 %v928_v50, %v5971_v13  ;;  %v8007_v2 = vrot.slane %v5817_v8, %v5582_v9  ;;  %v8015_v15 = vld [vmem:[#allocation42_spill] sm:$0xff] }
 0x264   : > { %v8010_v12 = vrot.slane %v5820_v59, %v5582_v9  ;;  %v8011_v30 = vrot.slane %v5832_v43, %v5582_v9  ;;  %v8014_v0 = vrot.slane %v5835_v4, %v5582_v9  ;;  %v933_v8 = vmax.f32 %v929_v3, %v5982_v53  ;;  %v8018_v4 = vld [vmem:[#allocation36_spill] sm:$0xff] }
 0x265   : > { %v1679_v21 = vmul.f32 %v8008_v51, %v8007_v2  ;;  %v934_v34 = vmax.f32 %v930_v39, %v5985_v41  ;;  %v935_v11 = vmax.f32 %v931_v36, %v5988_v52  ;;  %v936_v59 = vmax.f32 %v932_v28, %v5991_v46  ;;  %v8020_v28 = vld [vmem:[#allocation73_spill] sm:$0xff] }
 0x266   : > { %v1680_v19 = vmul.f32 %v8010_v12, %v8009_v45  ;;  %v6009_v61 = vmul.f32 %v8012_v62, %v8011_v30  ;;  %v6015_v57 = vmul.f32 %v8014_v0, %v8013_v48  ;;  %v8016_v43 = vrot.slane %v5838_v63, %v5582_v9  ;;  %v8022_v30 = vld [vmem:[#allocation71_spill] sm:$0xff]  ;;  %v6056_v0 = vpop.f32.mrb[31].mxu1 }
 0x267   : > { %v8017_v50 = vrot.slane %v5841_v33, %v5582_v9  ;;  %v6034_v16 = vmul.f32 %v8019_v7, %v1675_v44  ;;  %v1692_v17 = vadd.f32 %v1677_v25, %v1676_v32  ;;  %v937_v3 = vmax.f32 %v933_v8, %v934_v34  ;;  %v8021_v33 = vld [vmem:[#allocation67_spill] sm:$0xff]  ;;  %v8023_v32 = vld [vmem:[#allocation77_spill] sm:$0xff]  ;;  %8024 = vst [vmem:[#allocation43_spill] sm:$0xff] %v6056_v0 }
 0x268   : > { %v6025_v55 = vmul.f32 %v8016_v43, %v8015_v15  ;;  %v938_v39 = vmax.f32 %v935_v11, %v936_v59  ;;  %v6038_v36 = vmul.f32 %v5788_v26, %v5350_v5  ;;  %v6042_v63 = vmul.f32 %v5788_v26, %v8020_v28  ;;  %v8025_v34 = vld [vmem:[#allocation81_spill] sm:$0xff]  ;;  %v8027_v43 = vld [vmem:[#allocation79_spill] sm:$0xff] }
 0x269   : > { %v6031_v40 = vmul.f32 %v8018_v4, %v8017_v50  ;;  %v1693_v2 = vadd.f32 %v1692_v17, %v1678_v10  ;;  %v6046_v12 = vmul.f32 %v8021_v33, %v5788_v26  ;;  %v6050_v44 = vmul.f32 %v8022_v30, %v5788_v26  ;;  %v8026_v10 = vld [vmem:[#allocation75_spill] sm:$0xff]  ;;  %v8028_v30 = vld [vmem:[#allocation85_spill] sm:$0xff] }
 0x26a   : > { %v6054_v25 = vmul.f32 %v5788_v26, %v8023_v32  ;;  %v6058_v8 = vmax.f32 %v937_v3, %v938_v39  ;;  %v6062_v11 = vmul.f32 %v5788_v26, %v8025_v34  ;;  %v6066_v59 = vmul.f32 %v8026_v10, %v5788_v26  ;;  %v8029_v33 = vld [vmem:[#allocation91_spill] sm:$0xff] }
 0x26b   : > { %v6070_v50 = vmul.f32 %v8027_v43, %v5788_v26  ;;  %v1694_v17 = vadd.f32 %v1693_v2, %v1679_v21  ;;  %v6074_v32 = vmul.f32 %v5788_v26, %v8028_v30  ;;  %v6078_v3 = vmul.f32 %v5788_v26, %v8029_v33  ;;  %v8030_v39 = vld [vmem:[#allocation83_spill] sm:$0xff] }
 0x26c   : > { %v6082_v34 = vmul.f32 %v8030_v39, %v5788_v26  ;;  %v940_v10 = vsub.f32 %v5924_v58, %v6058_v8  ;;  %v941_v43 = vsub.f32 %v5927_v37, %v6058_v8  ;;  %v942_v21 = vsub.f32 %v5930_v14, %v6058_v8  ;;  %v8031_v4 = vld [vmem:[#allocation87_spill] sm:$0xff] }
 0x26d   : > { %v943_v2 = vsub.f32 %v5933_v60, %v6058_v8  ;;  %v944_v33 = vsub.f32 %v5936_v49, %v6058_v8  ;;  %v945_v30 = vsub.f32 %v5939_v42, %v6058_v8  ;;  %v946_v39 = vsub.f32 %v5942_v35, %v6058_v8 }
 0x26e   : > { %v947_v58 = vsub.f32 %v5945_v23, %v6058_v8  ;;  %v948_v37 = vsub.f32 %v5962_v1, %v6058_v8  ;;  %v949_v14 = vsub.f32 %v5965_v22, %v6058_v8  ;;  %v950_v60 = vsub.f32 %v5968_v54, %v6058_v8 }
 0x26f   : > { %v951_v49 = vsub.f32 %v5971_v13, %v6058_v8  ;;  %v952_v42 = vsub.f32 %v5982_v53, %v6058_v8  ;;  %v953_v35 = vsub.f32 %v5985_v41, %v6058_v8  ;;  %v954_v23 = vsub.f32 %v5988_v52, %v6058_v8 }
 0x270   : > { %v955_v1 = vsub.f32 %v5991_v46, %v6058_v8  ;;  %v956_v28 = vmul.f32 1.442695, %v940_v10  ;;  %v958_v22 = vmul.f32 1.442695, %v941_v43  ;;  %v960_v5 = vmul.f32 1.442695, %v942_v21 }
 0x271   : > { %v1695_v7 = vadd.f32 %v1694_v17, %v1680_v19  ;;  %v962_v54 = vmul.f32 1.442695, %v943_v2  ;;  %v1639_v13 = vrot.slane %v5826_v47, %v5582_v9  ;;  %v6120_v53 = vmul.f32 %v8031_v4, %v5788_v26  ;;  %v8032_v8 = vld [vmem:[#allocation26_spill] sm:$0xff]  ;;  %v8035_v17 = vld [vmem:[#allocation24_spill] sm:$0xff] }
 0x272   : > { %4479 = vpow2.f32 %v956_v28  ;;  %v964_v41 = vmul.f32 1.442695, %v944_v33  ;;  %v1643_v52 = vrot.slane %v5829_v31, %v5582_v9  ;;  %v966_v15 = vmul.f32 1.442695, %v945_v30  ;;  %v8034_v33 = vld [vmem:[#allocation20_spill] sm:$0xff] }
 0x273   : > { %4481 = vpow2.f32 %v958_v22  ;;  %v1647_v46 = vrot.slane %v5844_v29, %v5582_v9  ;;  %v8033_v19 = vrot.slane %v5823_v56, %v5582_v9  ;;  %v968_v47 = vmul.f32 1.442695, %v946_v39  ;;  %v8036_v39 = vld [vmem:[#allocation30_spill] sm:$0xff] }
 0x274   : > { %4483 = vpow2.f32 %v960_v5  ;;  %v1651_v26 = vrot.slane %v5847_v18, %v5582_v9  ;;  %v1655_v28 = vrot.slane %v5850_v20, %v5582_v9  ;;  %v970_v31 = vmul.f32 1.442695, %v947_v58 }
 0x275   : > { %v1681_v10 = vmul.f32 %v8033_v19, %v8032_v8  ;;  %4485 = vpow2.f32 %v962_v54  ;;  %v1682_v30 = vmul.f32 %v8034_v33, %v1639_v13  ;;  %v972_v29 = vmul.f32 1.442695, %v948_v37  ;;  %v8037_v19 = vld [vmem:[#allocation34_spill] sm:$0xff] }
 0x276   : > { %4487 = vpow2.f32 %v964_v41  ;;  %v1683_v21 = vmul.f32 %v8035_v17, %v1643_v52  ;;  %v2304_v56 = vrot.slane %v5793_v27, 4  ;;  %v974_v5 = vmul.f32 1.442695, %v949_v14  ;;  %v8038_v54 = vld [vmem:[#allocation98_spill] sm:$0xff]  ;;  %v8039_v41 = vld [vmem:[#allocation109_spill] sm:$0xff] }
 0x277   : > { %v1696_v43 = vadd.f32 %v1695_v7, %v1681_v10  ;;  %4489 = vpow2.f32 %v966_v15  ;;  %v1684_v2 = vmul.f32 %v1647_v46, %v8036_v39  ;;  %v976_v18 = vmul.f32 1.442695, %v950_v60  ;;  %v8040_v15 = vld [vmem:[#allocation110_spill] sm:$0xff] }
 0x278   : > { %4491 = vpow2.f32 %v968_v47  ;;  %v1685_v20 = vmul.f32 %v1651_v26, %v8037_v19  ;;  %v2310_v58 = vrot.slane %v8038_v54, 4  ;;  %v978_v13 = vmul.f32 1.442695, %v951_v49 }
 0x279   : > { %v1697_v22 = vadd.f32 %v1696_v43, %v1682_v30  ;;  %4493 = vpow2.f32 %v970_v31  ;;  %v2316_v37 = vrot.slane %v8039_v41, 4  ;;  %v980_v52 = vmul.f32 1.442695, %v952_v42  ;;  %v8041_v31 = vld [vmem:[#allocation28_spill] sm:$0xff] }
 0x27a   : > { %4495 = vpow2.f32 %v972_v29  ;;  %v2305_v10 = vadd.f32 %v2304_v56, %v5793_v27  ;;  %v2322_v14 = vrot.slane %v8040_v15, 4  ;;  %v982_v46 = vmul.f32 1.442695, %v953_v35 }
 0x27b   : > { %v1698_v7 = vadd.f32 %v1697_v22, %v1683_v21  ;;  %4497 = vpow2.f32 %v974_v5  ;;  %v2328_v60 = vrot.slane %v6038_v36, 4  ;;  %v984_v26 = vmul.f32 1.442695, %v954_v23 }
 0x27c   : > { %v6144_v47 = vpop.eup %4479  ;;  %4499 = vpow2.f32 %v976_v18  ;;  %v1686_v49 = vmul.f32 %v8041_v31, %v1655_v28  ;;  %v2311_v43 = vadd.f32 %v2310_v58, %v8038_v54  ;;  %v986_v42 = vmul.f32 1.442695, %v955_v1 }
 0x27d   : > { %v1699_v30 = vadd.f32 %v1698_v7, %v1684_v2  ;;  %v6148_v21 = vpop.eup %4481  ;;  %4501 = vpow2.f32 %v978_v13  ;;  %v2317_v29 = vadd.f32 %v2316_v37, %v8039_v41  ;;  %v2306_v5 = vrot.slane %v2305_v10, 2 }
 0x27e   : > { %v6151_v56 = vpop.eup %4483  ;;  %4503 = vpow2.f32 %v980_v52  ;;  %v1004_v35 = vrot.slane %v6148_v21, 7  ;;  %v2323_v2 = vadd.f32 %v2322_v14, %v8040_v15  ;;  %v2329_v18 = vadd.f32 %v2328_v60, %v6038_v36 }
 0x27f   : > { %v1700_v27 = vadd.f32 %v1699_v30, %v1685_v20  ;;  %v6155_v23 = vpop.eup %4485  ;;  %4505 = vpow2.f32 %v982_v46  ;;  %v1006_v28 = vrot.slane %v6151_v56, 6  ;;  %v2312_v58 = vrot.slane %v2311_v43, 2 }
 0x280   : > { %v6159_v1 = vpop.eup %4487  ;;  %4507 = vpow2.f32 %v984_v26  ;;  %v1005_v20 = vsel %vm624_vm0, %v1004_v35, %v6144_v47  ;;  %v1008_v54 = vrot.slane %v6155_v23, 5  ;;  %v2318_v26 = vrot.slane %v2317_v29, 2 }
 0x281   : > { %v1701_v22 = vadd.f32 %v1700_v27, %v1686_v49  ;;  %v6164_v13 = vpop.eup %4489  ;;  %4509 = vpow2.f32 %v986_v42  ;;  %v1007_v7 = vsel %vm627_vm1, %v1006_v28, %v1005_v20  ;;  %v1010_v41 = vrot.slane %v6159_v1, 4 }
 0x282   : > { %v6169_v52 = vpop.eup %4491  ;;  %v1009_v36 = vsel %vm630_vm2, %v1008_v54, %v1007_v7  ;;  %v1012_v15 = vrot.slane %v6164_v13, 3  ;;  %v2307_v27 = vadd.f32 %v2306_v5, %v2305_v10  ;;  %v2324_v35 = vrot.slane %v2323_v2, 2 }
 0x283   : > { %v1702_v37 = vadd.f32 %v1701_v22, %v6009_v61  ;;  %v6173_v14 = vpop.eup %4493  ;;  %v1011_v46 = vsel %vm633_vm3, %v1010_v41, %v1009_v36  ;;  %v1014_v30 = vrot.slane %v6169_v52, 2  ;;  %v2313_v54 = vadd.f32 %v2312_v58, %v2311_v43 }
 0x284   : > { %v6178_v49 = vpop.eup %4495  ;;  %v1013_v42 = vsel %vm636_vm4, %v1012_v15, %v1011_v46  ;;  %v1016_v61 = vrot.slane %v6173_v14, 1  ;;  %v2330_v7 = vrot.slane %v2329_v18, 2  ;;  %v2334_v36 = vrot.slane %v6042_v63, 4 }
 0x285   : > { %v1703_v60 = vadd.f32 %v1702_v37, %v6015_v57  ;;  %v6182_v28 = vpop.eup %4497  ;;  %v1015_v22 = vsel %vm639_vm5, %v1014_v30, %v1013_v42  ;;  %v2340_v15 = vrot.slane %v6046_v12, 4  ;;  %v2319_v30 = vadd.f32 %v2318_v26, %v2317_v29 }
 0x286   : > { %v6186_v41 = vpop.eup %4499  ;;  %v1017_v57 = vsel %vm642_vm6, %v1016_v61, %v1015_v22  ;;  %v1018_v37 = vrot.slane %v6182_v28, 7  ;;  %v2308_v42 = vrot.slane %v2307_v27, 1  ;;  %v2325_v61 = vadd.f32 %v2324_v35, %v2323_v2 }
 0x287   : > { %v1704_v20 = vadd.f32 %v1703_v60, %v6025_v55  ;;  %v6192_v10 = vpop.eup %4501  ;;  %v1020_v5 = vrot.slane %v6186_v41, 6  ;;  %v2346_v55 = vrot.slane %v6050_v44, 4  ;;  %v2314_v29 = vrot.slane %v2313_v54, 1 }
 0x288   : > { %v6197_v43 = vpop.eup %4503  ;;  %v1019_v58 = vsel %vm624_vm0, %v1018_v37, %v6178_v49  ;;  %v1022_v60 = vrot.slane %v6192_v10, 5  ;;  %v2335_v62 = vadd.f32 %v2334_v36, %v6042_v63  ;;  %v2341_v2 = vadd.f32 %v2340_v15, %v6046_v12 }
 0x289   : > { %v1705_v46 = vadd.f32 %v1704_v20, %v6031_v40  ;;  %v6202_v22 = vpop.eup %4505  ;;  %v1021_v4 = vsel %vm627_vm1, %v1020_v5, %v1019_v58  ;;  %v1024_v48 = vrot.slane %v6197_v43, 4  ;;  %v2352_v63 = vrot.slane %v6054_v25, 4 }
 0x28a   : > { %v6209_v26 = vpop.eup %4507  ;;  %v1023_v20 = vsel %vm630_vm2, %v1022_v60, %v1021_v4  ;;  %v1026_v37 = vrot.slane %v6202_v22, 3  ;;  %v2331_v60 = vadd.f32 %v2330_v7, %v2329_v18  ;;  %v6226_v15 = vadd.f32 %v2308_v42, %v2307_v27 }
 0x28b   : > { %v6207_v40 = vadd.f32 %v1705_v46, %v6034_v16  ;;  %v6215_v35 = vpop.eup %4509  ;;  %v1025_v5 = vsel %vm633_vm3, %v1024_v48, %v1023_v20  ;;  %v1028_v58 = vrot.slane %v6209_v26, 2  ;;  %v2347_v46 = vadd.f32 %v2346_v55, %v6050_v44 }
 0x28c   : > { %v1027_v31 = vsel %vm636_vm4, %v1026_v37, %v1025_v5  ;;  %v1030_v4 = vrot.slane %v6215_v35, 1  ;;  %8042 = vst [vmem:[#allocation44_spill] sm:$0xff] %v6226_v15  ;;  %v2320_v48 = vrot.slane %v2319_v30, 1  ;;  %v6229_v19 = vadd.f32 %v2314_v29, %v2313_v54 }
 0x28d   : > { %v1707_v16 = vmul.f32 %v6207_v40, %v6207_v40  ;;  %v1029_v12 = vsel %vm639_vm5, %v1028_v58, %v1027_v31  ;;  %v2336_v39 = vrot.slane %v2335_v62, 2  ;;  %v2358_v44 = vrot.slane %v6062_v11, 4 }
 0x28e   : > { %v1031_v20 = vsel %vm642_vm6, %v1030_v4, %v1029_v12  ;;  %8043 = vst [vmem:[#allocation45_spill] sm:$0xff] %v6229_v19  ;;  %v2342_v5 = vrot.slane %v2341_v2, 2  ;;  %v2348_v17 = vrot.slane %v2347_v46, 2  ;;  %v2353_v18 = vadd.f32 %v2352_v63, %v6054_v25 }
 0x28f   : > { %v1708_v36 = vrot.slane %v1707_v16, 4  ;;  %v1034_v55 = vadd.f32 %v1031_v20, %v1017_v57  ;;  %v2359_v7 = vadd.f32 %v2358_v44, %v6062_v11  ;;  %v2364_v31 = vrot.slane %v6066_v59, 4 }
 0x290   : > { %v2370_v27 = vrot.slane %v6070_v50, 4  ;;  %v2326_v4 = vrot.slane %v2325_v61, 1  ;;  %v2376_v54 = vrot.slane %v6074_v32, 4  ;;  %v2332_v29 = vrot.slane %v2331_v60, 1 }
 0x291   : > { %v1709_v37 = vadd.f32 %v1708_v36, %v1707_v16  ;;  %v1035_v42 = vrot.slane %v1034_v55, 4  ;;  %v2337_v12 = vadd.f32 %v2336_v39, %v2335_v62  ;;  %v2365_v57 = vadd.f32 %v2364_v31, %v6066_v59 }
 0x292   : > { %v2371_v16 = vadd.f32 %v2370_v27, %v6070_v50  ;;  %v6239_v25 = vadd.f32 %v2320_v48, %v2319_v30  ;;  %v2382_v11 = vrot.slane %v6078_v3, 4  ;;  %v2343_v63 = vadd.f32 %v2342_v5, %v2341_v2 }
 0x293   : > { %v1710_v58 = vrot.slane %v1709_v37, 2  ;;  %v1036_v36 = vadd.f32 %v1035_v42, %v1034_v55  ;;  %v2349_v44 = vadd.f32 %v2348_v17, %v2347_v46  ;;  %v2354_v33 = vrot.slane %v2353_v18, 2 }
 0x294   : > { %8044 = vst [vmem:[#allocation46_spill] sm:$0xff] %v6239_v25  ;;  %v2360_v8 = vrot.slane %v2359_v7, 2  ;;  %v6242_v24 = vadd.f32 %v2326_v4, %v2325_v61  ;;  %v2377_v62 = vadd.f32 %v2376_v54, %v6074_v32  ;;  %v6245_v39 = vadd.f32 %v2332_v29, %v2331_v60 }
 0x295   : > { %v1711_v20 = vadd.f32 %v1710_v58, %v1709_v37  ;;  %v1037_v45 = vrot.slane %v1036_v36, 2  ;;  %v2338_v59 = vrot.slane %v2337_v12, 1  ;;  %v2366_v50 = vrot.slane %v2365_v57, 2 }
 0x296   : > { %8045 = vst [vmem:[#allocation47_spill] sm:$0xff] %v6242_v24  ;;  %8046 = vst [vmem:[#allocation48_spill] sm:$0xff] %v6245_v39  ;;  %v2372_v55 = vrot.slane %v2371_v16, 2  ;;  %v2383_v48 = vadd.f32 %v2382_v11, %v6078_v3  ;;  %v2388_v2 = vrot.slane %v6082_v34, 4  ;;  %v2344_v17 = vrot.slane %v2343_v63, 1 }
 0x297   : > { %v1712_v51 = vrot.slane %v1711_v20, 1  ;;  %v1038_v37 = vadd.f32 %v1037_v45, %v1036_v36  ;;  %v2350_v46 = vrot.slane %v2349_v44, 1  ;;  %v2355_v5 = vadd.f32 %v2354_v33, %v2353_v18 }
 0x298   : > { %v2361_v31 = vadd.f32 %v2360_v8, %v2359_v7  ;;  %v2378_v42 = vrot.slane %v2377_v62, 2  ;;  %v2389_v32 = vadd.f32 %v2388_v2, %v6082_v34  ;;  %v6250_v60 = vadd.f32 %v2338_v59, %v2337_v12  ;;  %v8050_v59 = vld [vmem:[#allocation96_spill] sm:$0xff] }
 0x299   : > { %v1713_v30 = vadd.f32 %v1712_v51, %v1711_v20  ;;  %v1039_v27 = vrot.slane %v1038_v37, 1  ;;  %v2367_v58 = vadd.f32 %v2366_v50, %v2365_v57  ;;  %v2373_v4 = vadd.f32 %v2372_v55, %v2371_v16  ;;  %v8051_v50 = vld [vmem:[#allocation80_spill] sm:$0xff] }
 0x29a   : > { %8047 = vst [vmem:[#allocation49_spill] sm:$0xff] %v6250_v60  ;;  %v2394_v45 = vrot.slane %v6120_v53, 4  ;;  %v2384_v54 = vrot.slane %v2383_v48, 2  ;;  %v6253_v29 = vadd.f32 %v2344_v17, %v2343_v63  ;;  %v2356_v36 = vrot.slane %v2355_v5, 1 }
 0x29b   : > { %v1714_v61 = vadd.f32 1e-08, %v1713_v30  ;;  %v1040_v51 = vadd.f32 %v1039_v27, %v1038_v37  ;;  %v2390_v33 = vrot.slane %v2389_v32, 2  ;;  %v6256_v18 = vadd.f32 %v2350_v46, %v2349_v44 }
 0x29c   : > { %8048 = vst [vmem:[#allocation50_spill] sm:$0xff] %v6253_v29  ;;  %v2395_v8 = vadd.f32 %v2394_v45, %v6120_v53  ;;  %v2362_v34 = vrot.slane %v2361_v31, 1  ;;  %v2379_v7 = vadd.f32 %v2378_v42, %v2377_v62  ;;  %v2368_v12 = vrot.slane %v2367_v58, 1 }
 0x29d   : > { %4511 = vrsqrt.f32 %v1714_v61  ;;  %v1717_v3 = vadd.f32 1.0, %v1714_v61  ;;  %8049 = vst [vmem:[#allocation53_spill] sm:$0xff] %v6256_v18  ;;  %v2374_v57 = vrot.slane %v2373_v4, 1  ;;  %v2385_v20 = vadd.f32 %v2384_v54, %v2383_v48  ;;  %v8053_v48 = vld [vmem:[#allocation86_spill] sm:$0xff] }
 0x29e   : > { %4513 = vrcp.f32 %v1040_v51  ;;  %v2396_v16 = vrot.slane %v2395_v8, 2  ;;  %v2391_v11 = vadd.f32 %v2390_v33, %v2389_v32  ;;  %v3193_v55 = vadd.f32 %v8051_v50, %v8050_v59 }
 0x29f   : > { %4515 = vrcp.f32 %v1717_v3  ;;  %v6260_v63 = vadd.f32 %v2356_v36, %v2355_v5  ;;  %v2400_v53 = vmax.f32 %v6226_v15, %v6245_v39  ;;  %v2401_v44 = vmax.f32 %v6229_v19, %v6250_v60 }
 0x2a0   : > { %v2397_v37 = vadd.f32 %v2396_v16, %v2395_v8  ;;  %v2402_v62 = vmax.f32 %v6239_v25, %v6253_v29  ;;  %v2403_v30 = vmax.f32 %v6242_v24, %v6256_v18  ;;  %v3194_v2 = vadd.f32 %v3193_v55, %v8053_v48  ;;  %v8062_v55 = vld [vmem:[#allocation88_spill] sm:$0xff] }
 0x2a1   : > { %8052 = vst [vmem:[#allocation54_spill] sm:$0xff] %v6260_v63  ;;  %v6271_v17 = vadd.f32 %v2362_v34, %v2361_v31  ;;  %v6273_v46 = vadd.f32 %v2368_v12, %v2367_v58  ;;  %v6275_v5 = vadd.f32 %v2374_v57, %v2373_v4  ;;  %v2380_v27 = vrot.slane %v2379_v7, 1  ;;  %v8057_v4 = vld [vmem:[#allocation84_spill] sm:$0xff] }
 0x2a2   : > { %v2386_v42 = vrot.slane %v2385_v20, 1  ;;  %v2392_v32 = vrot.slane %v2391_v11, 1  ;;  %v2398_v45 = vrot.slane %v2397_v37, 1  ;;  %v3195_v51 = vadd.f32 %v3194_v2, %v6056_v0  ;;  %v8072_v0 = vld [vmem:[#allocation33_spill] sm:$0xff] }
 0x2a3   : > { %8054 = vst [vmem:[#allocation55_spill] sm:$0xff] %v6271_v17  ;;  %8055 = vst [vmem:[#allocation56_spill] sm:$0xff] %v6273_v46  ;;  %v6279_v3 = vmax.f32 %v2400_v53, %v6260_v63  ;;  %v6282_v36 = vmax.f32 %v2401_v44, %v6271_v17  ;;  %v6285_v31 = vmax.f32 %v2402_v62, %v6273_v46 }
 0x2a4   : > { %8056 = vst [vmem:[#allocation59_spill] sm:$0xff] %v6275_v5  ;;  %v6288_v58 = vmax.f32 %v2403_v30, %v6275_v5  ;;  %v3196_v33 = vadd.f32 %v8057_v4, %v3195_v51  ;;  %v6291_v34 = vadd.f32 %v2380_v27, %v2379_v7  ;;  %v6293_v57 = vadd.f32 %v2386_v42, %v2385_v20  ;;  %v8071_v4 = vld [vmem:[#allocation29_spill] sm:$0xff] }
 0x2a5   : > { %v6295_v16 = vadd.f32 %v2392_v32, %v2391_v11  ;;  %v6297_v59 = vadd.f32 %v2398_v45, %v2397_v37 }
 0x2a6   : > { %8058 = vst [vmem:[#allocation60_spill] sm:$0xff] %v6291_v34  ;;  %8059 = vst [vmem:[#allocation61_spill] sm:$0xff] %v6293_v57  ;;  %v6300_v53 = vadd.f32 %v8062_v55, %v3196_v33  ;;  %v2408_v30 = vmax.f32 %v6279_v3, %v6291_v34  ;;  %v8070_v55 = vld [vmem:[#allocation23_spill] sm:$0xff] }
 0x2a7   : > { %v4512_v54 = vpop.eup %4511  ;;  %8060 = vst [vmem:[#allocation62_spill] sm:$0xff] %v6295_v16  ;;  %8061 = vst [vmem:[#allocation98_spill] sm:$0xff] %v6297_v59  ;;  %v2410_v7 = vmax.f32 %v6285_v31, %v6295_v16  ;;  %v2411_v20 = vmax.f32 %v6288_v58, %v6297_v59 }
 0x2a8   : > { %v1716_v8 = vmul.f32 %v4512_v54, %v1714_v61  ;;  %v4514_v12 = vpop.eup %4513  ;;  %v2409_v61 = vmax.f32 %v6282_v36, %v6293_v57 }
 0x2a9   : > { %v4516_v44 = vpop.eup %4515  ;;  %v1045_v62 = vrot.slane %v4514_v12, %v5582_v9 }
 0x2aa   : > { %v1719_v2 = vmul.f32 %v4516_v44, %v1716_v8 }
 0x2ab   : > { %v1046_v11 = vmul.f32 %v6144_v47, %v1045_v62  ;;  %v1047_v37 = vmul.f32 %v6148_v21, %v1045_v62  ;;  %v1048_v27 = vmul.f32 %v6151_v56, %v1045_v62  ;;  %v1049_v42 = vmul.f32 %v6155_v23, %v1045_v62 }
 0x2ac   : > { %v1050_v32 = vmul.f32 %v6159_v1, %v1045_v62  ;;  %v1051_v45 = vmul.f32 %v6164_v13, %v1045_v62  ;;  %v1052_v51 = vmul.f32 %v6169_v52, %v1045_v62  ;;  %v1053_v3 = vmul.f32 %v6173_v14, %v1045_v62 }
 0x2ad   : > { %v1054_v54 = vmul.f32 %v6178_v49, %v1045_v62  ;;  %v1055_v36 = vmul.f32 %v6182_v28, %v1045_v62  ;;  %v1056_v47 = vmul.f32 %v6186_v41, %v1045_v62  ;;  %v1057_v21 = vmul.f32 %v6192_v10, %v1045_v62 }
 0x2ae   : > { %v1058_v56 = vmul.f32 %v6197_v43, %v1045_v62  ;;  %v1059_v23 = vmul.f32 %v6202_v22, %v1045_v62  ;;  %v1060_v1 = vmul.f32 %v6209_v26, %v1045_v62  ;;  %v1061_v13 = vmul.f32 %v6215_v35, %v1045_v62  ;;  %v8063_v62 = vld [vmem:[#allocation13_spill] sm:$0xff] }
 0x2af   : > { %v1065_v52 = vrot.slane %v1046_v11, %v5582_v9  ;;  %v1069_v14 = vrot.slane %v1047_v37, %v5582_v9  ;;  %v1073_v49 = vrot.slane %v1048_v27, %v5582_v9  ;;  %v1077_v28 = vrot.slane %v1049_v42, %v5582_v9  ;;  %v8064_v37 = vld [vmem:[#allocation17_spill] sm:$0xff]  ;;  %v8065_v42 = vld [vmem:[#allocation11_spill] sm:$0xff] }
 0x2b0   : > { %v1081_v41 = vrot.slane %v1050_v32, %v5582_v9  ;;  %v1085_v10 = vrot.slane %v1051_v45, %v5582_v9  ;;  %v1089_v43 = vrot.slane %v1052_v51, %v5582_v9  ;;  %v1093_v22 = vrot.slane %v1053_v3, %v5582_v9  ;;  %v8066_v45 = vld [vmem:[#allocation15_spill] sm:$0xff]  ;;  %v8067_v3 = vld [vmem:[#allocation21_spill] sm:$0xff] }
 0x2b1   : > { %v1097_v26 = vrot.slane %v1054_v54, %v5582_v9  ;;  %v1101_v35 = vrot.slane %v1055_v36, %v5582_v9  ;;  %v1105_v31 = vrot.slane %v1056_v47, %v5582_v9  ;;  %v1109_v58 = vrot.slane %v1057_v21, %v5582_v9  ;;  %v8068_v36 = vld [vmem:[#allocation25_spill] sm:$0xff]  ;;  %v8069_v21 = vld [vmem:[#allocation19_spill] sm:$0xff] }
 0x2b2   : > { %v1113_v33 = vrot.slane %v1058_v56, %v5582_v9  ;;  %v1117_v8 = vrot.slane %v1059_v23, %v5582_v9  ;;  %v1121_v12 = vrot.slane %v1060_v1, %v5582_v9  ;;  %v1125_v44 = vrot.slane %v1061_v13, %v5582_v9 }
 0x2b3   : > { %v1126_v11 = vmul.f32 %v1065_v52, %v8063_v62  ;;  %v1127_v27 = vmul.f32 %v1069_v14, %v8064_v37  ;;  %v1128_v32 = vmul.f32 %v8065_v42, %v1073_v49  ;;  %v1129_v51 = vmul.f32 %v8066_v45, %v1077_v28  ;;  %v8073_v52 = vld [vmem:[#allocation27_spill] sm:$0xff]  ;;  %v8075_v28 = vld [vmem:[#allocation37_spill] sm:$0xff]  ;;  %v8079_v45 = vld [vmem:[#allocation12_spill] sm:$0xff] }
 0x2b4   : > { %v1130_v54 = vmul.f32 %v1081_v41, %v8067_v3  ;;  %v1131_v47 = vmul.f32 %v1085_v10, %v8068_v36  ;;  %v1132_v56 = vmul.f32 %v8069_v21, %v1089_v43  ;;  %v1133_v23 = vmul.f32 %v8070_v55, %v1093_v22  ;;  %v8074_v14 = vld [vmem:[#allocation31_spill] sm:$0xff]  ;;  %v8076_v41 = vld [vmem:[#allocation41_spill] sm:$0xff]  ;;  %v8081_v21 = vld [vmem:[#allocation22_spill] sm:$0xff] }
 0x2b5   : > { %v1134_v1 = vmul.f32 %v1097_v26, %v8071_v4  ;;  %v6353_v13 = vmul.f32 %v1101_v35, %v8072_v0  ;;  %v6356_v62 = vmul.f32 %v8073_v52, %v1105_v31  ;;  %v6359_v49 = vmul.f32 %v8074_v14, %v1109_v58  ;;  %v8077_v43 = vld [vmem:[#allocation35_spill] sm:$0xff]  ;;  %v8082_v52 = vld [vmem:[#allocation26_spill] sm:$0xff] }
 0x2b6   : > { %v6362_v37 = vmul.f32 %v1113_v33, %v8075_v28  ;;  %v6365_v10 = vmul.f32 %v1117_v8, %v8076_v41  ;;  %v6368_v42 = vmul.f32 %v8077_v43, %v1121_v12  ;;  %v8078_v55 = vld [vmem:[#allocation39_spill] sm:$0xff]  ;;  %v1142_v0 = vadd.f32 %v1127_v27, %v1126_v11  ;;  %v8080_v8 = vld [vmem:[#allocation16_spill] sm:$0xff] }
 0x2b7   : > { %v6371_v4 = vmul.f32 %v8078_v55, %v1125_v44  ;;  %v1720_v22 = vmul.f32 %v1719_v2, %v6207_v40  ;;  %v2412_v26 = vmax.f32 %v2408_v30, %v2409_v61  ;;  %v2413_v35 = vmax.f32 %v2410_v7, %v2411_v20  ;;  %v8083_v44 = vld [vmem:[#allocation20_spill] sm:$0xff]  ;;  %v8085_v30 = vld [vmem:[#allocation30_spill] sm:$0xff] }
 0x2b8   : > { %v1143_v31 = vadd.f32 %v1142_v0, %v1128_v32  ;;  %v8084_v27 = vld [vmem:[#allocation24_spill] sm:$0xff]  ;;  %v8086_v61 = vld [vmem:[#allocation34_spill] sm:$0xff] }
 0x2b9   : > { %v1721_v58 = vmul.f32 %v1720_v22, %v7993_v38  ;;  %v1722_v33 = vmul.f32 %v1720_v22, %v7995_v6  ;;  %v1723_v3 = vmul.f32 %v8079_v45, %v1720_v22  ;;  %v1724_v36 = vmul.f32 %v8080_v8, %v1720_v22  ;;  %v8087_v20 = vld [vmem:[#allocation28_spill] sm:$0xff]  ;;  %v8089_v55 = vld [vmem:[#allocation38_spill] sm:$0xff] }
 0x2ba   : > { %v1725_v12 = vmul.f32 %v1720_v22, %v8081_v21  ;;  %v1726_v14 = vmul.f32 %v1720_v22, %v8082_v52  ;;  %v1727_v28 = vmul.f32 %v8083_v44, %v1720_v22  ;;  %v1144_v11 = vadd.f32 %v1143_v31, %v1129_v51  ;;  %v8088_v41 = vld [vmem:[#allocation32_spill] sm:$0xff]  ;;  %v8090_v44 = vld [vmem:[#allocation42_spill] sm:$0xff] }
 0x2bb   : > { %v6382_v40 = vmul.f32 %v8084_v27, %v1720_v22  ;;  %v6385_v2 = vmul.f32 %v1720_v22, %v8085_v30  ;;  %v6388_v7 = vmul.f32 %v1720_v22, %v8086_v61  ;;  %v6391_v32 = vmul.f32 %v8087_v20, %v1720_v22  ;;  %v8091_v27 = vld [vmem:[#allocation36_spill] sm:$0xff] }
 0x2bc   : > { %v6394_v43 = vmul.f32 %v8088_v41, %v1720_v22  ;;  %v6397_v0 = vmul.f32 %v1720_v22, %v8089_v55  ;;  %v6400_v51 = vmul.f32 %v1720_v22, %v8090_v44  ;;  %v1145_v31 = vadd.f32 %v1144_v11, %v1130_v54  ;;  %v8092_v30 = vld [vmem:[#allocation40_spill] sm:$0xff] }
 0x2bd   : > { %v6403_v52 = vmul.f32 %v8091_v27, %v1720_v22  ;;  %v6406_v21 = vmul.f32 %v8092_v30, %v1720_v22  ;;  %v1737_v61 = vrot.slane %v1721_v58, 4  ;;  %v1743_v8 = vrot.slane %v1722_v33, 4 }
 0x2be   : > { %v1749_v20 = vrot.slane %v1723_v3, 4  ;;  %v1755_v45 = vrot.slane %v1724_v36, 4  ;;  %v1761_v6 = vrot.slane %v1725_v12, 4  ;;  %v1146_v41 = vadd.f32 %v1145_v31, %v1131_v47 }
 0x2bf   : > { %v1738_v38 = vadd.f32 %v1737_v61, %v1721_v58  ;;  %v1767_v9 = vrot.slane %v1726_v14, 4  ;;  %v1773_v55 = vrot.slane %v1727_v28, 4  ;;  %v1744_v48 = vadd.f32 %v1743_v8, %v1722_v33 }
 0x2c0   : > { %v1750_v50 = vadd.f32 %v1749_v20, %v1723_v3  ;;  %v1756_v44 = vadd.f32 %v1755_v45, %v1724_v36  ;;  %v1762_v59 = vadd.f32 %v1761_v6, %v1725_v12  ;;  %v1147_v54 = vadd.f32 %v1146_v41, %v1132_v56 }
 0x2c1   : > { %v1739_v11 = vrot.slane %v1738_v38, 2  ;;  %v1768_v27 = vadd.f32 %v1767_v9, %v1726_v14  ;;  %v1774_v16 = vadd.f32 %v1773_v55, %v1727_v28  ;;  %v1745_v57 = vrot.slane %v1744_v48, 2 }
 0x2c2   : > { %v1751_v22 = vrot.slane %v1750_v50, 2  ;;  %v1757_v30 = vrot.slane %v1756_v44, 2  ;;  %v1763_v34 = vrot.slane %v1762_v59, 2  ;;  %v1148_v5 = vadd.f32 %v1147_v54, %v1133_v23 }
 0x2c3   : > { %v1740_v46 = vadd.f32 %v1739_v11, %v1738_v38  ;;  %v1769_v17 = vrot.slane %v1768_v27, 2  ;;  %v1775_v63 = vrot.slane %v1774_v16, 2  ;;  %v1746_v47 = vadd.f32 %v1745_v57, %v1744_v48 }
 0x2c4   : > { %v1752_v58 = vadd.f32 %v1751_v22, %v1750_v50  ;;  %v1758_v61 = vadd.f32 %v1757_v30, %v1756_v44  ;;  %v1764_v31 = vadd.f32 %v1763_v34, %v1762_v59  ;;  %v1149_v33 = vadd.f32 %v1148_v5, %v1134_v1 }
 0x2c5   : > { %v1741_v3 = vrot.slane %v1740_v46, 1  ;;  %v1770_v45 = vadd.f32 %v1769_v17, %v1768_v27  ;;  %v1776_v6 = vadd.f32 %v1775_v63, %v1774_v16  ;;  %v1747_v56 = vrot.slane %v1746_v47, 1 }
 0x2c6   : > { %v1753_v8 = vrot.slane %v1752_v58, 1  ;;  %v1759_v9 = vrot.slane %v1758_v61, 1  ;;  %v1765_v36 = vrot.slane %v1764_v31, 1  ;;  %v1150_v12 = vadd.f32 %v1149_v33, %v6353_v13 }
 0x2c7   : > { %v1742_v14 = vadd.f32 %v1741_v3, %v1740_v46  ;;  %v1771_v28 = vrot.slane %v1770_v45, 1  ;;  %v6409_v23 = vmax.f32 %v2412_v26, %v2413_v35  ;;  %v1748_v38 = vadd.f32 %v1747_v56, %v1746_v47 }
 0x2c8   : > { %v1754_v20 = vadd.f32 %v1753_v8, %v1752_v58  ;;  %v1760_v48 = vadd.f32 %v1759_v9, %v1758_v61  ;;  %v1777_v50 = vrot.slane %v1776_v6, 1  ;;  %v1151_v34 = vadd.f32 %v1150_v12, %v6356_v62 }
 0x2c9   : > { %v1766_v5 = vadd.f32 %v1765_v36, %v1764_v31  ;;  %v1772_v57 = vadd.f32 %v1771_v28, %v1770_v45  ;;  %v1779_v63 = vrot.slane %v6382_v40, 4  ;;  %v1785_v17 = vrot.slane %v6385_v2, 4 }
 0x2ca   : > { %v1791_v16 = vrot.slane %v6388_v7, 4  ;;  %v1797_v59 = vrot.slane %v6391_v32, 4  ;;  %v1803_v46 = vrot.slane %v6394_v43, 4  ;;  %v1152_v1 = vadd.f32 %v1151_v34, %v6359_v49 }
 0x2cb   : > { %v1780_v13 = vadd.f32 %v1779_v63, %v6382_v40  ;;  %v1809_v26 = vrot.slane %v6397_v0, 4  ;;  %v1815_v62 = vrot.slane %v6400_v51, 4  ;;  %v1786_v35 = vadd.f32 %v1785_v17, %v6385_v2 }
 0x2cc   : > { %v1792_v44 = vadd.f32 %v1791_v16, %v6388_v7  ;;  %v1798_v27 = vadd.f32 %v1797_v59, %v6391_v32  ;;  %v1804_v30 = vadd.f32 %v1803_v46, %v6394_v43  ;;  %v1153_v41 = vadd.f32 %v1152_v1, %v6362_v37 }
 0x2cd   : > { %v1781_v55 = vrot.slane %v1780_v13, 2  ;;  %v1810_v54 = vadd.f32 %v1809_v26, %v6397_v0  ;;  %v1816_v49 = vadd.f32 %v1815_v62, %v6400_v51  ;;  %v1787_v40 = vrot.slane %v1786_v35, 2  ;;  %v8093_v26 = vld [vmem:[#allocation89_spill] sm:$0xff] }
 0x2ce   : > { %v1793_v11 = vrot.slane %v1792_v44, 2  ;;  %v1799_v22 = vrot.slane %v1798_v27, 2  ;;  %v1805_v47 = vrot.slane %v1804_v30, 2  ;;  %v1154_v58 = vadd.f32 %v1153_v41, %v6365_v10 }
 0x2cf   : > { %v1782_v2 = vadd.f32 %v1781_v55, %v1780_v13  ;;  %v1811_v61 = vrot.slane %v1810_v54, 2  ;;  %v1817_v7 = vrot.slane %v1816_v49, 2  ;;  %v1788_v31 = vadd.f32 %v1787_v40, %v1786_v35  ;;  %v8097_v55 = vld [vmem:[#allocation94_spill] sm:$0xff]  ;;  %v8098_v40 = vld [vmem:[#allocation95_spill] sm:$0xff] }
 0x2d0   : > { %v1794_v32 = vadd.f32 %v1793_v11, %v1792_v44  ;;  %v1800_v33 = vadd.f32 %v1799_v22, %v1798_v27  ;;  %v1806_v43 = vadd.f32 %v1805_v47, %v1804_v30  ;;  %v1155_v37 = vadd.f32 %v1154_v58, %v6368_v42  ;;  %v8096_v30 = vld [vmem:[#allocation93_spill] sm:$0xff]  ;;  %v8100_v22 = vld [vmem:[#allocation99_spill] sm:$0xff] }
 0x2d1   : > { %v1783_v3 = vrot.slane %v1782_v2, 1  ;;  %v1812_v45 = vadd.f32 %v1811_v61, %v1810_v54  ;;  %v1818_v0 = vadd.f32 %v1817_v7, %v1816_v49  ;;  %v1789_v56 = vrot.slane %v1788_v31, 1  ;;  %v8099_v11 = vld [vmem:[#allocation97_spill] sm:$0xff] }
 0x2d2   : > { %v1795_v51 = vrot.slane %v1794_v32, 1  ;;  %v1801_v8 = vrot.slane %v1800_v33, 1  ;;  %v1807_v9 = vrot.slane %v1806_v43, 1  ;;  %v6431_v36 = vadd.f32 %v1155_v37, %v6371_v4  ;;  %v8094_v4 = vld [vmem:[#allocation90_spill] sm:$0xff]  ;;  %v8105_v37 = vld [vmem:[#allocation104_spill] sm:$0xff] }
 0x2d3   : > { %v1778_v10 = vadd.f32 %v1777_v50, %v1776_v6  ;;  %v1784_v12 = vadd.f32 %v1783_v3, %v1782_v2  ;;  %v1813_v28 = vrot.slane %v1812_v45, 1  ;;  %v1790_v34 = vadd.f32 %v1789_v56, %v1788_v31  ;;  %v8095_v50 = vld [vmem:[#allocation92_spill] sm:$0xff] }
 0x2d4   : > { %v1796_v63 = vadd.f32 %v1795_v51, %v1794_v32  ;;  %v1802_v17 = vadd.f32 %v1801_v8, %v1800_v33  ;;  %v1819_v16 = vrot.slane %v1818_v0, 1  ;;  %v1157_v42 = vmul.f32 %v6431_v36, %v6431_v36  ;;  %v8101_v2 = vld [vmem:[#allocation100_spill] sm:$0xff] }
 0x2d5   : > { %v1808_v59 = vadd.f32 %v1807_v9, %v1806_v43  ;;  %v1814_v46 = vadd.f32 %v1813_v28, %v1812_v45  ;;  %v1821_v1 = vrot.slane %v6403_v52, 4  ;;  %v1827_v13 = vrot.slane %v6406_v21, 4 }
 0x2d6   : > { %v6438_v62 = vadd.f32 %v1742_v14, %v8093_v26  ;;  %v6441_v6 = vadd.f32 %v1748_v38, %v8094_v4  ;;  %v6444_v35 = vadd.f32 %v1754_v20, %v8095_v50  ;;  %v1158_v44 = vrot.slane %v1157_v42, 4  ;;  %v8107_v50 = vld [vmem:[#allocation106_spill] sm:$0xff] }
 0x2d7   : > { %v1822_v27 = vadd.f32 %v1821_v1, %v6403_v52  ;;  %v6448_v41 = vadd.f32 %v1760_v48, %v8096_v30  ;;  %v6451_v54 = vadd.f32 %v1766_v5, %v8097_v55  ;;  %v1828_v49 = vadd.f32 %v1827_v13, %v6406_v21  ;;  %v8102_v5 = vld [vmem:[#allocation101_spill] sm:$0xff]  ;;  %v8103_v21 = vld [vmem:[#allocation102_spill] sm:$0xff] }
 0x2d8   : > { %v6455_v14 = vadd.f32 %v1772_v57, %v8098_v40  ;;  %v6458_v38 = vadd.f32 %v1778_v10, %v8099_v11  ;;  %v6461_v20 = vadd.f32 %v1784_v12, %v8100_v22  ;;  %v1159_v47 = vadd.f32 %v1158_v44, %v1157_v42  ;;  %v8104_v57 = vld [vmem:[#allocation103_spill] sm:$0xff]  ;;  %v8106_v12 = vld [vmem:[#allocation105_spill] sm:$0xff] }
 0x2d9   : > { %v1820_v58 = vadd.f32 %v1819_v16, %v1818_v0  ;;  %v1823_v52 = vrot.slane %v1822_v27, 2  ;;  %v6464_v48 = vadd.f32 %v1790_v34, %v8101_v2  ;;  %v1829_v61 = vrot.slane %v1828_v49, 2 }
 0x2da   : > { %v6467_v7 = vadd.f32 %v1796_v63, %v8102_v5  ;;  %v6470_v31 = vadd.f32 %v1802_v17, %v8103_v21  ;;  %v6473_v32 = vadd.f32 %v1808_v59, %v8104_v57  ;;  %v1160_v33 = vrot.slane %v1159_v47, 2 }
 0x2db   : > { %v1824_v43 = vadd.f32 %v1823_v52, %v1822_v27  ;;  %v6476_v3 = vadd.f32 %v1814_v46, %v8105_v37  ;;  %v1849_v45 = vmax.f32 %v6438_v62, %v6451_v54  ;;  %v1830_v0 = vadd.f32 %v1829_v61, %v1828_v49  ;;  %v8108_v27 = vld [vmem:[#allocation107_spill] sm:$0xff] }
 0x2dc   : > { %v1850_v56 = vmax.f32 %v6441_v6, %v6455_v14  ;;  %v1851_v51 = vmax.f32 %v6444_v35, %v6458_v38  ;;  %v1852_v8 = vmax.f32 %v6448_v41, %v6461_v20  ;;  %v1161_v9 = vadd.f32 %v1160_v33, %v1159_v47 }
 0x2dd   : > { %v1825_v10 = vrot.slane %v1824_v43, 1  ;;  %v6487_v28 = vadd.f32 %v1820_v58, %v8106_v12  ;;  %v1853_v34 = vmax.f32 %v1849_v45, %v6464_v48  ;;  %v1831_v63 = vrot.slane %v1830_v0, 1 }
 0x2de   : > { %v1854_v17 = vmax.f32 %v1850_v56, %v6467_v7  ;;  %v1855_v16 = vmax.f32 %v1851_v51, %v6470_v31  ;;  %v1856_v42 = vmax.f32 %v1852_v8, %v6473_v32  ;;  %v1162_v59 = vrot.slane %v1161_v9, 1 }
 0x2df   : > { %v1826_v46 = vadd.f32 %v1825_v10, %v1824_v43  ;;  %v1857_v1 = vmax.f32 %v1853_v34, %v6476_v3  ;;  %v1832_v13 = vadd.f32 %v1831_v63, %v1830_v0  ;;  %v2415_v49 = vsub.f32 %v6226_v15, %v6409_v23 }
 0x2e0   : > { %v1858_v26 = vmax.f32 %v1854_v17, %v6487_v28  ;;  %v1163_v4 = vadd.f32 %v1162_v59, %v1161_v9  ;;  %v2416_v40 = vsub.f32 %v6229_v19, %v6409_v23  ;;  %v2417_v52 = vsub.f32 %v6239_v25, %v6409_v23 }
 0x2e1   : > { %v6496_v44 = vadd.f32 %v1826_v46, %v8107_v50  ;;  %v6499_v30 = vadd.f32 %v1832_v13, %v8108_v27  ;;  %v2418_v2 = vsub.f32 %v6242_v24, %v6409_v23  ;;  %v2431_v5 = vmul.f32 1.442695, %v2415_v49 }
 0x2e2   : > { %v1861_v55 = vmax.f32 %v1857_v1, %v1858_v26  ;;  %v1164_v11 = vadd.f32 1e-08, %v1163_v4  ;;  %v2433_v21 = vmul.f32 1.442695, %v2416_v40  ;;  %v2435_v33 = vmul.f32 1.442695, %v2417_v52 }
 0x2e3   : > { %v1859_v22 = vmax.f32 %v1855_v16, %v6496_v44  ;;  %v1860_v47 = vmax.f32 %v1856_v42, %v6499_v30  ;;  %v2437_v43 = vmul.f32 1.442695, %v2418_v2  ;;  %v6514_v37 = vmul.f32 0.0625, %v6300_v53  ;;  %v8110_v40 = vld [vmem:[#allocation55_spill] sm:$0xff] }
 0x2e4   : > { %4517 = vrsqrt.f32 %v1164_v11  ;;  %v1167_v58 = vadd.f32 1.0, %v1164_v11  ;;  %v2419_v17 = vsub.f32 %v6245_v39, %v6409_v23  ;;  %v2420_v1 = vsub.f32 %v6250_v60, %v6409_v23 }
 0x2e5   : > { %v1862_v61 = vmax.f32 %v1859_v22, %v1860_v47  ;;  %v3199_v16 = vmul.f32 %v6514_v37, %v6514_v37  ;;  %v2421_v4 = vsub.f32 %v6253_v29, %v6409_v23  ;;  %v2422_v50 = vsub.f32 %v6256_v18, %v6409_v23  ;;  %v8111_v22 = vld [vmem:[#allocation56_spill] sm:$0xff] }
 0x2e6   : > { %4519 = vrcp.f32 %v1167_v58  ;;  %v2425_v47 = vsub.f32 %v8111_v22, %v6409_v23  ;;  %v8122_v29 = vld [vmem:[#allocation64_spill] sm:$0xff] }
 0x2e7   : > { %v6511_v57 = vmax.f32 %v1861_v55, %v1862_v61  ;;  %4521 = vpow2.f32 %v2431_v5  ;;  %v3200_v2 = vrot.slane %v3199_v16, 4  ;;  %v8113_v5 = vld [vmem:[#allocation60_spill] sm:$0xff] }
 0x2e8   : > { %4523 = vpow2.f32 %v2433_v21  ;;  %v2427_v21 = vsub.f32 %v8113_v5, %v6409_v23 }
 0x2e9   : > { %v1864_v45 = vsub.f32 %v6438_v62, %v6511_v57  ;;  %v1865_v0 = vsub.f32 %v6441_v6, %v6511_v57  ;;  %v1866_v56 = vsub.f32 %v6444_v35, %v6511_v57  ;;  %v1867_v51 = vsub.f32 %v6448_v41, %v6511_v57 }
 0x2ea   : > { %v1868_v8 = vsub.f32 %v6451_v54, %v6511_v57  ;;  %v1869_v9 = vsub.f32 %v6455_v14, %v6511_v57  ;;  %v1870_v53 = vsub.f32 %v6458_v38, %v6511_v57  ;;  %v1871_v62 = vsub.f32 %v6461_v20, %v6511_v57 }
 0x2eb   : > { %v1872_v6 = vsub.f32 %v6464_v48, %v6511_v57  ;;  %v1873_v35 = vsub.f32 %v6467_v7, %v6511_v57  ;;  %v1874_v41 = vsub.f32 %v6470_v31, %v6511_v57  ;;  %v1875_v54 = vsub.f32 %v6473_v32, %v6511_v57 }
 0x2ec   : > { %v1876_v14 = vsub.f32 %v6476_v3, %v6511_v57  ;;  %v1877_v38 = vsub.f32 %v6487_v28, %v6511_v57  ;;  %v1878_v20 = vsub.f32 %v6496_v44, %v6511_v57  ;;  %v1879_v48 = vsub.f32 %v6499_v30, %v6511_v57  ;;  %v8109_v30 = vld [vmem:[#allocation54_spill] sm:$0xff]  ;;  %v8114_v57 = vld [vmem:[#allocation61_spill] sm:$0xff] }
 0x2ed   : > { %v1880_v10 = vmul.f32 1.442695, %v1864_v45  ;;  %v1882_v7 = vmul.f32 1.442695, %v1865_v0  ;;  %v1884_v12 = vmul.f32 1.442695, %v1866_v56  ;;  %4525 = vpow2.f32 %v2435_v33 }
 0x2ee   : > { %v4518_v31 = vpop.eup %4517  ;;  %v1886_v34 = vmul.f32 1.442695, %v1867_v51  ;;  %4527 = vpow2.f32 %v2437_v43  ;;  %v1888_v3 = vmul.f32 1.442695, %v1868_v8  ;;  %v1890_v28 = vmul.f32 1.442695, %v1869_v9 }
 0x2ef   : > { %v1166_v32 = vmul.f32 %v4518_v31, %v1164_v11  ;;  %4529 = vpow2.f32 %v1880_v10  ;;  %v1892_v46 = vmul.f32 1.442695, %v1870_v53  ;;  %v1894_v26 = vmul.f32 1.442695, %v1871_v62  ;;  %v8115_v0 = vld [vmem:[#allocation62_spill] sm:$0xff] }
 0x2f0   : > { %v4520_v63 = vpop.eup %4519  ;;  %4531 = vpow2.f32 %v1882_v7  ;;  %v1896_v27 = vmul.f32 1.442695, %v1872_v6  ;;  %v2423_v55 = vsub.f32 %v8109_v30, %v6409_v23  ;;  %v1898_v49 = vmul.f32 1.442695, %v1873_v35  ;;  %v8116_v53 = vld [vmem:[#allocation98_spill] sm:$0xff]  ;;  %v8121_v30 = vld [vmem:[#allocation52_spill] sm:$0xff] }
 0x2f1   : > { %v6553_v42 = vpop.eup %4521  ;;  %v1169_v59 = vmul.f32 %v4520_v63, %v1166_v32  ;;  %4533 = vpow2.f32 %v1884_v12  ;;  %v2424_v11 = vsub.f32 %v8110_v40, %v6409_v23  ;;  %v1900_v58 = vmul.f32 1.442695, %v1874_v41 }
 0x2f2   : > { %v6557_v13 = vpop.eup %4523  ;;  %4535 = vpow2.f32 %v1886_v34  ;;  %v1902_v61 = vmul.f32 1.442695, %v1875_v54  ;;  %v2428_v33 = vsub.f32 %v8114_v57, %v6409_v23  ;;  %v1904_v45 = vmul.f32 1.442695, %v1876_v14 }
 0x2f3   : > { %v1170_v44 = vmul.f32 %v1169_v59, %v6431_v36  ;;  %4537 = vpow2.f32 %v1888_v3  ;;  %v8112_v36 = vld [vmem:[#allocation59_spill] sm:$0xff]  ;;  %v2429_v56 = vsub.f32 %v8115_v0, %v6409_v23  ;;  %v3201_v51 = vadd.f32 %v3200_v2, %v3199_v16 }
 0x2f4   : > { %4539 = vpow2.f32 %v1890_v28  ;;  %v2426_v52 = vsub.f32 %v8112_v36, %v6409_v23  ;;  %v1906_v9 = vmul.f32 1.442695, %v1877_v38  ;;  %v2430_v62 = vsub.f32 %v8116_v53, %v6409_v23 }
 0x2f5   : > { %1171 = vst [vmem:[%s6570_s23] sm:$0xff] %v1170_v44  ;;  %4541 = vpow2.f32 %v1892_v46  ;;  %v2439_v6 = vmul.f32 1.442695, %v2419_v17  ;;  %v1908_v41 = vmul.f32 1.442695, %v1878_v20  ;;  %v2441_v54 = vmul.f32 1.442695, %v2420_v1 }
 0x2f6   : > { %4543 = vpow2.f32 %v1894_v26  ;;  %v3202_v10 = vrot.slane %v3201_v51, 2  ;;  %v1910_v14 = vmul.f32 1.442695, %v1879_v48  ;;  %v2443_v12 = vmul.f32 1.442695, %v2421_v4 }
 0x2f7   : > { %v6579_v43 = vpop.eup %4525  ;;  %4545 = vpow2.f32 %v1896_v27  ;;  %v2445_v31 = vmul.f32 1.442695, %v2422_v50  ;;  %v2447_v32 = vmul.f32 1.442695, %v2423_v55  ;;  %v2449_v28 = vmul.f32 1.442695, %v2424_v11 }
 0x2f8   : > { %v6583_v8 = vpop.eup %4527  ;;  %4547 = vpow2.f32 %v1898_v49  ;;  %v3203_v3 = vadd.f32 %v3202_v10, %v3201_v51  ;;  %v2451_v17 = vmul.f32 1.442695, %v2425_v47  ;;  %v2453_v50 = vmul.f32 1.442695, %v2426_v52 }
 0x2f9   : > { %v6587_v35 = vpop.eup %4529  ;;  %4549 = vpow2.f32 %v1900_v58  ;;  %v2479_v49 = vrot.slane %v6557_v13, 7  ;;  %v2455_v51 = vmul.f32 1.442695, %v2427_v21  ;;  %v2481_v10 = vrot.slane %v6579_v43, 6 }
 0x2fa   : > { %v6589_v7 = vpop.eup %4531  ;;  %4551 = vpow2.f32 %v1902_v61  ;;  %v3204_v46 = vrot.slane %v3203_v3, 1 }
 0x2fb   : > { %v6591_v34 = vpop.eup %4533  ;;  %4553 = vpow2.f32 %v1904_v45  ;;  %v1928_v38 = vrot.slane %v6589_v7, 7 }
 0x2fc   : > { %v6594_v63 = vpop.eup %4535  ;;  %4555 = vpow2.f32 %v1906_v9  ;;  %v1930_v20 = vrot.slane %v6591_v34, 6  ;;  %v3205_v2 = vadd.f32 %v3204_v46, %v3203_v3  ;;  %v2480_v3 = vsel %vm624_vm0, %v2479_v49, %v6553_v42 }
 0x2fd   : > { %v6597_v16 = vpop.eup %4537  ;;  %4557 = vpow2.f32 %v1908_v41  ;;  %v1929_v48 = vsel %vm624_vm0, %v1928_v38, %v6587_v35  ;;  %v1932_v59 = vrot.slane %v6594_v63, 5  ;;  %v2457_v41 = vmul.f32 1.442695, %v2428_v33 }
 0x2fe   : > { %v6602_v1 = vpop.eup %4539  ;;  %4559 = vpow2.f32 %v1910_v14  ;;  %v1931_v26 = vsel %vm627_vm1, %v1930_v20, %v1929_v48  ;;  %v1934_v4 = vrot.slane %v6597_v16, 4  ;;  %v2459_v33 = vmul.f32 1.442695, %v2429_v56 }
 0x2ff   : > { %v6606_v44 = vpop.eup %4541  ;;  %v1933_v27 = vsel %vm630_vm2, %v1932_v59, %v1931_v26  ;;  %v1936_v55 = vrot.slane %v6602_v1, 3  ;;  %4561 = vpow2.f32 %v2439_v6  ;;  %v2461_v59 = vmul.f32 1.442695, %v2430_v62 }
 0x300   : > { %v6611_v11 = vpop.eup %4543  ;;  %v1935_v47 = vsel %vm633_vm3, %v1934_v4, %v1933_v27  ;;  %v1938_v58 = vrot.slane %v6606_v44, 2  ;;  %4563 = vpow2.f32 %v2441_v54  ;;  %v2482_v26 = vsel %vm627_vm1, %v2481_v10, %v2480_v3 }
 0x301   : > { %v6615_v61 = vpop.eup %4545  ;;  %v1937_v52 = vsel %vm636_vm4, %v1936_v55, %v1935_v47  ;;  %v1940_v45 = vrot.slane %v6611_v11, 1  ;;  %4565 = vpow2.f32 %v2443_v12 }
 0x302   : > { %v6619_v9 = vpop.eup %4547  ;;  %v1939_v6 = vsel %vm639_vm5, %v1938_v58, %v1937_v52  ;;  %4567 = vpow2.f32 %v2445_v31  ;;  %v6635_v31 = vadd.f32 1e-08, %v3205_v2 }
 0x303   : > { %v6623_v14 = vpop.eup %4549  ;;  %v1941_v54 = vsel %vm642_vm6, %v1940_v45, %v1939_v6  ;;  %v1942_v38 = vrot.slane %v6619_v9, 7  ;;  %4569 = vpow2.f32 %v2447_v32 }
 0x304   : > { %v6629_v12 = vpop.eup %4551  ;;  %v1944_v21 = vrot.slane %v6623_v14, 6  ;;  %4571 = vpow2.f32 %v2449_v28 }
 0x305   : > { %v6637_v20 = vpop.eup %4553  ;;  %v1943_v48 = vsel %vm624_vm0, %v1942_v38, %v6615_v61  ;;  %v1946_v32 = vrot.slane %v6629_v12, 5  ;;  %4573 = vpow2.f32 %v2451_v17  ;;  %v2483_v17 = vrot.slane %v6583_v8, 5 }
 0x306   : > { %v6645_v46 = vpop.eup %4555  ;;  %v1945_v28 = vsel %vm627_vm1, %v1944_v21, %v1943_v48  ;;  %v1948_v56 = vrot.slane %v6637_v20, 4  ;;  %4575 = vpow2.f32 %v2453_v50  ;;  %v3209_v50 = vadd.f32 1.0, %v6635_v31 }
 0x307   : > { %v6650_v4 = vpop.eup %4557  ;;  %v1947_v27 = vsel %vm630_vm2, %v1946_v32, %v1945_v28  ;;  %v1950_v55 = vrot.slane %v6645_v46, 3  ;;  %4577 = vpow2.f32 %v2455_v51  ;;  %v2484_v52 = vsel %vm630_vm2, %v2483_v17, %v2482_v26 }
 0x308   : > { %v6655_v23 = vpop.eup %4559  ;;  %v1949_v62 = vsel %vm633_vm3, %v1948_v56, %v1947_v27  ;;  %v1952_v49 = vrot.slane %v6650_v4, 2  ;;  %4579 = vpow2.f32 %v2457_v41 }
 0x309   : > { %v6660_v47 = vpop.eup %4561  ;;  %v1951_v58 = vsel %vm636_vm4, %v1950_v55, %v1949_v62  ;;  %v1954_v2 = vrot.slane %v6655_v23, 1  ;;  %4581 = vpow2.f32 %v2459_v33 }
 0x30a   : > { %v6665_v45 = vpop.eup %4563  ;;  %v1953_v51 = vsel %vm639_vm5, %v1952_v49, %v1951_v58  ;;  %4583 = vpow2.f32 %v2461_v59  ;;  %v2485_v6 = vrot.slane %v6660_v47, 4 }
 0x30b   : > { %v6669_v10 = vpop.eup %4565  ;;  %v1955_v41 = vsel %vm642_vm6, %v1954_v2, %v1953_v51  ;;  %4585 = vrsqrt.f32 %v6635_v31  ;;  %v2487_v48 = vrot.slane %v6665_v45, 3 }
 0x30c   : > { %v6673_v38 = vpop.eup %4567  ;;  %v1958_v3 = vadd.f32 %v1955_v41, %v1941_v54  ;;  %v2486_v21 = vsel %vm633_vm3, %v2485_v6, %v2484_v52  ;;  %4587 = vrcp.f32 %v3209_v50  ;;  %v2489_v54 = vrot.slane %v6669_v10, 2 }
 0x30d   : > { %v6676_v33 = vpop.eup %4569  ;;  %v2488_v56 = vsel %vm636_vm4, %v2487_v48, %v2486_v21 }
 0x30e   : > { %v6679_v32 = vpop.eup %4571  ;;  %v1959_v59 = vrot.slane %v1958_v3, 4  ;;  %v2490_v52 = vsel %vm639_vm5, %v2489_v54, %v2488_v56 }
 0x30f   : > { %v6681_v28 = vpop.eup %4573  ;;  %v2493_v26 = vrot.slane %v6679_v32, 7 }
 0x310   : > { %v6685_v27 = vpop.eup %4575  ;;  %v1960_v55 = vadd.f32 %v1959_v59, %v1958_v3  ;;  %v2495_v17 = vrot.slane %v6681_v28, 6  ;;  %v2491_v3 = vrot.slane %v6673_v38, 1 }
 0x311   : > { %v6689_v62 = vpop.eup %4577  ;;  %v2494_v49 = vsel %vm624_vm0, %v2493_v26, %v6676_v33  ;;  %v2497_v50 = vrot.slane %v6685_v27, 5 }
 0x312   : > { %v6694_v58 = vpop.eup %4579  ;;  %v1961_v2 = vrot.slane %v1960_v55, 2  ;;  %v2496_v51 = vsel %vm627_vm1, %v2495_v17, %v2494_v49  ;;  %v2499_v6 = vrot.slane %v6689_v62, 4  ;;  %v2492_v54 = vsel %vm642_vm6, %v2491_v3, %v2490_v52  ;;  %v8119_v3 = vld [vmem:[#allocation58_spill] sm:$0xff] }
 0x313   : > { %v6699_v41 = vpop.eup %4581  ;;  %v2498_v21 = vsel %vm630_vm2, %v2497_v50, %v2496_v51  ;;  %v2501_v48 = vrot.slane %v6694_v58, 3 }
 0x314   : > { %8117 = vst [vmem:[#allocation109_spill] sm:$0xff] %v6699_v41  ;;  %v6704_v59 = vpop.eup %4583  ;;  %v1962_v26 = vadd.f32 %v1961_v2, %v1960_v55  ;;  %v2500_v53 = vsel %vm633_vm3, %v2499_v6, %v2498_v21  ;;  %v2503_v0 = vrot.slane %v6699_v41, 2 }
 0x315   : > { %8118 = vst [vmem:[#allocation110_spill] sm:$0xff] %v6704_v59  ;;  %v4586_v56 = vpop.eup %4585  ;;  %v2502_v17 = vsel %vm636_vm4, %v2501_v48, %v2500_v53  ;;  %v2505_v49 = vrot.slane %v6704_v59, 1  ;;  %v8120_v48 = vld [vmem:[#allocation66_spill] sm:$0xff] }
 0x316   : > { %v4588_v57 = vpop.eup %4587  ;;  %v1963_v5 = vrot.slane %v1962_v26, 1  ;;  %v2504_v50 = vsel %vm639_vm5, %v2503_v0, %v2502_v17  ;;  %v3208_v51 = vmul.f32 %v4586_v56, %v6635_v31  ;;  %v8123_v17 = vld [vmem:[#allocation70_spill] sm:$0xff] }
 0x317   : > { %v2506_v36 = vsel %vm642_vm6, %v2505_v49, %v2504_v50  ;;  %v8124_v56 = vld [vmem:[#allocation74_spill] sm:$0xff] }
 0x318   : > { %v1964_v55 = vadd.f32 %v1963_v5, %v1962_v26  ;;  %v2509_v2 = vadd.f32 %v2506_v36, %v2492_v54  ;;  %v3211_v6 = vmul.f32 %v4588_v57, %v3208_v51  ;;  %v8125_v5 = vld [vmem:[#allocation68_spill] sm:$0xff]  ;;  %v8130_v51 = vld [vmem:[#allocation82_spill] sm:$0xff] }
 0x319   : > { %v8126_v26 = vld [vmem:[#allocation72_spill] sm:$0xff] }
 0x31a   : > { %4589 = vrcp.f32 %v1964_v55  ;;  %v2510_v21 = vrot.slane %v2509_v2, 4  ;;  %v3212_v22 = vmul.f32 %v3211_v6, %v6514_v37  ;;  %v8128_v37 = vld [vmem:[#allocation78_spill] sm:$0xff] }
 0x31c   : > { %v2511_v52 = vadd.f32 %v2510_v21, %v2509_v2  ;;  %v3213_v53 = vmul.f32 %v3212_v22, %v8119_v3  ;;  %v3214_v40 = vmul.f32 %v3212_v22, %v8120_v48  ;;  %v3215_v18 = vmul.f32 %v8121_v30, %v3212_v22  ;;  %v8132_v2 = vld [vmem:[#allocation76_spill] sm:$0xff] }
 0x31d   : > { %v3216_v0 = vmul.f32 %v8122_v29, %v3212_v22  ;;  %v3217_v31 = vmul.f32 %v3212_v22, %v8123_v17  ;;  %v3218_v49 = vmul.f32 %v3212_v22, %v8124_v56  ;;  %v6722_v36 = vmul.f32 %v8125_v5, %v3212_v22  ;;  %v8134_v21 = vld [vmem:[#allocation80_spill] sm:$0xff]  ;;  %v8136_v56 = vld [vmem:[#allocation86_spill] sm:$0xff]  ;;  %v8138_v5 = vld [vmem:[#allocation43_spill] sm:$0xff] }
 0x31e   : > { %v2512_v57 = vrot.slane %v2511_v52, 2  ;;  %v6725_v54 = vmul.f32 %v8126_v26, %v3212_v22  ;;  %v6728_v50 = vmul.f32 %v3212_v22, %v8128_v37  ;;  %v6731_v55 = vmul.f32 %v3212_v22, %v8130_v51  ;;  %v8140_v48 = vld [vmem:[#allocation84_spill] sm:$0xff] }
 0x31f   : > { %v6734_v6 = vmul.f32 %v8132_v2, %v3212_v22  ;;  %v6737_v17 = vmul.f32 %v8134_v21, %v3212_v22  ;;  %v6740_v29 = vmul.f32 %v3212_v22, %v8136_v56  ;;  %v6743_v30 = vmul.f32 %v3212_v22, %v8138_v5  ;;  %v8142_v37 = vld [vmem:[#allocation88_spill] sm:$0xff] }
 0x320   : > { %8127 = vst [vmem:[#allocation96_spill] sm:$0xff] %v6725_v54  ;;  %8129 = vst [vmem:[#allocation13_spill] sm:$0xff] %v6728_v50  ;;  %v2513_v26 = vadd.f32 %v2512_v57, %v2511_v52  ;;  %v6746_v3 = vmul.f32 %v8140_v48, %v3212_v22  ;;  %v6749_v60 = vmul.f32 %v8142_v37, %v3212_v22  ;;  %v3229_v51 = vrot.slane %v3213_v53, 4 }
 0x321   : > { %8131 = vst [vmem:[#allocation17_spill] sm:$0xff] %v6731_v55  ;;  %8133 = vst [vmem:[#allocation11_spill] sm:$0xff] %v6734_v6  ;;  %v3235_v39 = vrot.slane %v3214_v40, 4  ;;  %v3241_v2 = vrot.slane %v3215_v18, 4  ;;  %v3247_v24 = vrot.slane %v3216_v0, 4  ;;  %v3253_v25 = vrot.slane %v3217_v31, 4 }
 0x322   : > { %8135 = vst [vmem:[#allocation15_spill] sm:$0xff] %v6737_v17  ;;  %8137 = vst [vmem:[#allocation21_spill] sm:$0xff] %v6740_v29  ;;  %v2514_v21 = vrot.slane %v2513_v26, 1  ;;  %v3230_v19 = vadd.f32 %v3229_v51, %v3213_v53  ;;  %v3259_v15 = vrot.slane %v3218_v49, 4 }
 0x323   : > { %8139 = vst [vmem:[#allocation25_spill] sm:$0xff] %v6743_v30  ;;  %8141 = vst [vmem:[#allocation19_spill] sm:$0xff] %v6746_v3  ;;  %v6751_v56 = vadd.f32 %v3235_v39, %v3214_v40  ;;  %v6753_v29 = vadd.f32 %v3241_v2, %v3215_v18  ;;  %v6755_v5 = vadd.f32 %v3247_v24, %v3216_v0  ;;  %v8144_v3 = vld [vmem:[#allocation108_spill] sm:$0xff] }
 0x324   : > { %8143 = vst [vmem:[#allocation23_spill] sm:$0xff] %v6749_v60  ;;  %v6757_v52 = vadd.f32 %v3253_v25, %v3217_v31  ;;  %v4590_v57 = vpop.eup %4589  ;;  %v2515_v48 = vadd.f32 %v2514_v21, %v2513_v26  ;;  %v3231_v22 = vrot.slane %v3230_v19, 2  ;;  %v6759_v37 = vadd.f32 %v3259_v15, %v3218_v49  ;;  %v8148_v60 = vld [vmem:[#allocation16_spill] sm:$0xff] }
 0x325   : > { %v1969_v30 = vrot.slane %v4590_v57, %v8144_v3  ;;  %v3237_v53 = vrot.slane %v6751_v56, 2  ;;  %v3243_v39 = vrot.slane %v6753_v29, 2  ;;  %v3249_v18 = vrot.slane %v6755_v5, 2 }
 0x326   : > { %4591 = vrcp.f32 %v2515_v48  ;;  %v6766_v24 = vadd.f32 %v3231_v22, %v3230_v19  ;;  %v3255_v25 = vrot.slane %v6757_v52, 2  ;;  %v3261_v40 = vrot.slane %v6759_v37, 2 }
 0x327   : > { %v1970_v15 = vmul.f32 %v6587_v35, %v1969_v30  ;;  %v1971_v0 = vmul.f32 %v6589_v7, %v1969_v30  ;;  %v1972_v31 = vmul.f32 %v6591_v34, %v1969_v30  ;;  %v1973_v49 = vmul.f32 %v6594_v63, %v1969_v30 }
 0x328   : > { %v1974_v26 = vmul.f32 %v6597_v16, %v1969_v30  ;;  %v1975_v51 = vmul.f32 %v6602_v1, %v1969_v30  ;;  %v1976_v48 = vmul.f32 %v6606_v44, %v1969_v30  ;;  %v1977_v19 = vmul.f32 %v6611_v11, %v1969_v30 }
 0x329   : > { %v1978_v2 = vmul.f32 %v6615_v61, %v1969_v30  ;;  %v1979_v21 = vmul.f32 %v6619_v9, %v1969_v30  ;;  %v1980_v35 = vmul.f32 %v6623_v14, %v1969_v30  ;;  %v1981_v7 = vmul.f32 %v6629_v12, %v1969_v30 }
 0x32a   : > { %v1982_v34 = vmul.f32 %v6637_v20, %v1969_v30  ;;  %v1983_v63 = vmul.f32 %v6645_v46, %v1969_v30  ;;  %v1984_v16 = vmul.f32 %v6650_v4, %v1969_v30  ;;  %v1985_v1 = vmul.f32 %v6655_v23, %v1969_v30 }
 0x32b   : > { %v1989_v44 = vrot.slane %v1970_v15, %v8144_v3  ;;  %v1993_v11 = vrot.slane %v1971_v0, %v8144_v3  ;;  %v1997_v61 = vrot.slane %v1972_v31, %v8144_v3  ;;  %v2001_v9 = vrot.slane %v1973_v49, %v8144_v3  ;;  %v8145_v49 = vld [vmem:[#allocation14_spill] sm:$0xff] }
 0x32c   : > { %v2005_v14 = vrot.slane %v1974_v26, %v8144_v3  ;;  %v2009_v12 = vrot.slane %v1975_v51, %v8144_v3  ;;  %v2013_v20 = vrot.slane %v1976_v48, %v8144_v3  ;;  %v2017_v46 = vrot.slane %v1977_v19, %v8144_v3  ;;  %v8146_v51 = vld [vmem:[#allocation18_spill] sm:$0xff]  ;;  %v8147_v19 = vld [vmem:[#allocation12_spill] sm:$0xff] }
 0x32d   : > { %v2021_v4 = vrot.slane %v1978_v2, %v8144_v3  ;;  %v2025_v30 = vrot.slane %v1979_v21, %v8144_v3  ;;  %v2029_v23 = vrot.slane %v1980_v35, %v8144_v3  ;;  %v2033_v57 = vrot.slane %v1981_v7, %v8144_v3  ;;  %v8149_v35 = vld [vmem:[#allocation22_spill] sm:$0xff] }
 0x32e   : > { %v2037_v22 = vrot.slane %v1982_v34, %v8144_v3  ;;  %v2041_v15 = vrot.slane %v1983_v63, %v8144_v3  ;;  %v2045_v0 = vrot.slane %v1984_v16, %v8144_v3  ;;  %v2049_v31 = vrot.slane %v1985_v1, %v8144_v3  ;;  %v8150_v7 = vld [vmem:[#allocation26_spill] sm:$0xff]  ;;  %v8151_v34 = vld [vmem:[#allocation20_spill] sm:$0xff] }
 0x32f   : > { %v2050_v26 = vmul.f32 %v1989_v44, %v8145_v49  ;;  %v2051_v48 = vmul.f32 %v1993_v11, %v8146_v51  ;;  %v2052_v2 = vmul.f32 %v8147_v19, %v1997_v61  ;;  %v2053_v21 = vmul.f32 %v8148_v60, %v2001_v9  ;;  %v8152_v63 = vld [vmem:[#allocation24_spill] sm:$0xff]  ;;  %v8153_v16 = vld [vmem:[#allocation30_spill] sm:$0xff] }
 0x330   : > { %v4592_v17 = vpop.eup %4591  ;;  %v2054_v6 = vmul.f32 %v2005_v14, %v8149_v35  ;;  %v2055_v55 = vmul.f32 %v2009_v12, %v8150_v7  ;;  %v2056_v50 = vmul.f32 %v8151_v34, %v2013_v20  ;;  %v2057_v54 = vmul.f32 %v8152_v63, %v2017_v46  ;;  %v8154_v1 = vld [vmem:[#allocation34_spill] sm:$0xff]  ;;  %v8155_v44 = vld [vmem:[#allocation28_spill] sm:$0xff] }
 0x331   : > { %v2058_v59 = vmul.f32 %v2021_v4, %v8153_v16  ;;  %v6812_v41 = vmul.f32 %v2025_v30, %v8154_v1  ;;  %v6815_v11 = vmul.f32 %v8155_v44, %v2029_v23  ;;  %v8156_v61 = vld [vmem:[#allocation32_spill] sm:$0xff]  ;;  %v8157_v60 = vld [vmem:[#allocation38_spill] sm:$0xff]  ;;  %v2066_v30 = vadd.f32 %v2051_v48, %v2050_v26 }
 0x332   : > { %v6818_v49 = vmul.f32 %v8156_v61, %v2033_v57  ;;  %v6821_v9 = vmul.f32 %v2037_v22, %v8157_v60  ;;  %v8158_v14 = vld [vmem:[#allocation42_spill] sm:$0xff]  ;;  %v8159_v20 = vld [vmem:[#allocation36_spill] sm:$0xff]  ;;  %v2520_v19 = vrot.slane %v4592_v17, %v8144_v3  ;;  %v3233_v23 = vrot.slane %v6766_v24, 1  ;;  %v8164_v61 = vld [vmem:[#allocation57_spill] sm:$0xff] }
 0x333   : > { %v6824_v12 = vmul.f32 %v2041_v15, %v8158_v14  ;;  %v6827_v51 = vmul.f32 %v8159_v20, %v2045_v0  ;;  %v8160_v46 = vld [vmem:[#allocation40_spill] sm:$0xff]  ;;  %v6835_v57 = vadd.f32 %v3237_v53, %v6751_v56  ;;  %v6838_v22 = vadd.f32 %v3243_v39, %v6753_v29  ;;  %v8165_v14 = vld [vmem:[#allocation65_spill] sm:$0xff] }
 0x334   : > { %v6830_v4 = vmul.f32 %v8160_v46, %v2049_v31  ;;  %v8161_v15 = vrot.slane %v6722_v36, 4  ;;  %v2067_v0 = vadd.f32 %v2066_v30, %v2052_v2  ;;  %v6846_v31 = vadd.f32 %v3249_v18, %v6755_v5 }
 0x335   : > { %v6849_v26 = vadd.f32 %v3255_v25, %v6757_v52  ;;  %v6852_v17 = vadd.f32 %v3261_v40, %v6759_v37  ;;  %v2521_v56 = vmul.f32 %v6553_v42, %v2520_v19  ;;  %v2522_v29 = vmul.f32 %v6557_v13, %v2520_v19 }
 0x336   : > { %v6843_v35 = vadd.f32 %v8161_v15, %v6722_v36  ;;  %v2523_v53 = vmul.f32 %v6579_v43, %v2520_v19  ;;  %v2524_v39 = vmul.f32 %v6583_v8, %v2520_v19  ;;  %v2068_v36 = vadd.f32 %v2067_v0, %v2053_v21  ;;  %v8167_v0 = vld [vmem:[#allocation63_spill] sm:$0xff] }
 0x337   : > { %v2525_v48 = vmul.f32 %v6660_v47, %v2520_v19  ;;  %v2526_v5 = vmul.f32 %v6665_v45, %v2520_v19  ;;  %v2527_v18 = vmul.f32 %v6669_v10, %v2520_v19  ;;  %v2528_v52 = vmul.f32 %v6673_v38, %v2520_v19  ;;  %v8162_v47 = vld [vmem:[#allocation109_spill] sm:$0xff]  ;;  %v8163_v45 = vld [vmem:[#allocation110_spill] sm:$0xff] }
 0x338   : > { %v2529_v37 = vmul.f32 %v6676_v33, %v2520_v19  ;;  %v2530_v25 = vmul.f32 %v6679_v32, %v2520_v19  ;;  %v2531_v42 = vmul.f32 %v6681_v28, %v2520_v19  ;;  %v2069_v13 = vadd.f32 %v2068_v36, %v2054_v6 }
 0x339   : > { %v2532_v43 = vmul.f32 %v6685_v27, %v2520_v19  ;;  %v2533_v8 = vmul.f32 %v6689_v62, %v2520_v19  ;;  %v2534_v40 = vmul.f32 %v6694_v58, %v2520_v19  ;;  %v2535_v2 = vmul.f32 %v8162_v47, %v2520_v19 }
 0x33a   : > { %v2536_v21 = vmul.f32 %v8163_v45, %v2520_v19  ;;  %v2540_v10 = vrot.slane %v2521_v56, %v8144_v3  ;;  %v2544_v38 = vrot.slane %v2522_v29, %v8144_v3  ;;  %v2070_v33 = vadd.f32 %v2069_v13, %v2055_v55  ;;  %v8168_v29 = vld [vmem:[#allocation69_spill] sm:$0xff]  ;;  %v8172_v13 = vld [vmem:[#allocation79_spill] sm:$0xff] }
 0x33b   : > { %v2548_v32 = vrot.slane %v2523_v53, %v8144_v3  ;;  %v2552_v28 = vrot.slane %v2524_v39, %v8144_v3  ;;  %v2556_v6 = vrot.slane %v2525_v48, %v8144_v3  ;;  %v2560_v27 = vrot.slane %v2526_v5, %v8144_v3  ;;  %v8169_v39 = vld [vmem:[#allocation73_spill] sm:$0xff]  ;;  %v8170_v48 = vld [vmem:[#allocation67_spill] sm:$0xff] }
 0x33c   : > { %v2564_v62 = vrot.slane %v2527_v18, %v8144_v3  ;;  %v2568_v58 = vrot.slane %v2528_v52, %v8144_v3  ;;  %v2572_v7 = vrot.slane %v2529_v37, %v8144_v3  ;;  %v2071_v34 = vadd.f32 %v2070_v33, %v2056_v50  ;;  %v8166_v50 = vld [vmem:[#allocation51_spill] sm:$0xff] }
 0x33d   : > { %v2584_v63 = vrot.slane %v2532_v43, %v8144_v3  ;;  %v2588_v16 = vrot.slane %v2533_v8, %v8144_v3  ;;  %v2592_v55 = vrot.slane %v2534_v40, %v8144_v3  ;;  %v2596_v1 = vrot.slane %v2535_v2, %v8144_v3  ;;  %v8171_v52 = vld [vmem:[#allocation71_spill] sm:$0xff] }
 0x33e   : > { %v2600_v44 = vrot.slane %v2536_v21, %v8144_v3  ;;  %v2601_v60 = vmul.f32 %v2540_v10, %v8164_v61  ;;  %v2602_v20 = vmul.f32 %v2544_v38, %v8165_v14  ;;  %v2072_v46 = vadd.f32 %v2071_v34, %v2057_v54  ;;  %v8173_v54 = vld [vmem:[#allocation85_spill] sm:$0xff]  ;;  %v8175_v40 = vld [vmem:[#allocation83_spill] sm:$0xff] }
 0x33f   : > { %v2576_v30 = vrot.slane %v2530_v25, %v8144_v3  ;;  %v2580_v19 = vrot.slane %v2531_v42, %v8144_v3  ;;  %v2603_v15 = vmul.f32 %v8166_v50, %v2548_v32  ;;  %v2604_v56 = vmul.f32 %v8167_v0, %v2552_v28  ;;  %v8174_v42 = vld [vmem:[#allocation91_spill] sm:$0xff]  ;;  %v8177_v10 = vld [vmem:[#allocation77_spill] sm:$0xff] }
 0x340   : > { %v2605_v53 = vmul.f32 %v2556_v6, %v8168_v29  ;;  %v2606_v36 = vmul.f32 %v2560_v27, %v8169_v39  ;;  %v2607_v5 = vmul.f32 %v8170_v48, %v2564_v62  ;;  %v2073_v18 = vadd.f32 %v2072_v46, %v2058_v59  ;;  %v8176_v2 = vld [vmem:[#allocation87_spill] sm:$0xff]  ;;  %v8178_v28 = vld [vmem:[#allocation81_spill] sm:$0xff] }
 0x341   : > { %v2608_v37 = vmul.f32 %v8171_v52, %v2568_v58  ;;  %v6895_v43 = vmul.f32 %v8172_v13, %v2584_v63  ;;  %v6898_v25 = vmul.f32 %v2588_v16, %v8173_v54  ;;  %v6901_v8 = vmul.f32 %v2592_v55, %v8174_v42  ;;  %v8179_v27 = vld [vmem:[#allocation75_spill] sm:$0xff]  ;;  %v8184_v46 = vld [vmem:[#allocation13_spill] sm:$0xff] }
 0x342   : > { %v6904_v47 = vmul.f32 %v8175_v40, %v2596_v1  ;;  %v6907_v45 = vmul.f32 %v8176_v2, %v2600_v44  ;;  %v2617_v21 = vadd.f32 %v2602_v20, %v2601_v60  ;;  %v2074_v59 = vadd.f32 %v2073_v18, %v6812_v41 }
 0x343   : > { %v2609_v38 = vmul.f32 %v2572_v7, %v8177_v10  ;;  %v3239_v33 = vrot.slane %v6835_v57, 1  ;;  %v3245_v32 = vrot.slane %v6838_v22, 1  ;;  %v2610_v6 = vmul.f32 %v2576_v30, %v8178_v28 }
 0x344   : > { %v6915_v62 = vmul.f32 %v8179_v27, %v2580_v19  ;;  %v2618_v58 = vadd.f32 %v2617_v21, %v2603_v15  ;;  %v6920_v34 = vadd.f32 %v3233_v23, %v6766_v24  ;;  %v2075_v63 = vadd.f32 %v2074_v59, %v6815_v11  ;;  %v8183_v11 = vld [vmem:[#allocation96_spill] sm:$0xff]  ;;  %v8185_v15 = vld [vmem:[#allocation17_spill] sm:$0xff] }
 0x345   : > { %v3251_v41 = vrot.slane %v6846_v31, 1  ;;  %v3257_v7 = vrot.slane %v6849_v26, 1  ;;  %v3267_v16 = vrot.slane %v6843_v35, 2  ;;  %v6927_v1 = vadd.f32 %v3239_v33, %v6835_v57  ;;  %v8187_v57 = vld [vmem:[#allocation15_spill] sm:$0xff] }
 0x346   : > { %8180 = vst [vmem:[#allocation29_spill] sm:$0xff] %v6920_v34  ;;  %v2619_v55 = vadd.f32 %v2618_v58, %v2604_v56  ;;  %v6930_v44 = vadd.f32 %v3245_v32, %v6838_v22  ;;  %v3263_v60 = vrot.slane %v6852_v17, 1  ;;  %v2076_v24 = vadd.f32 %v2075_v63, %v6818_v49  ;;  %v8186_v56 = vld [vmem:[#allocation11_spill] sm:$0xff] }
 0x347   : > { %8181 = vst [vmem:[#allocation33_spill] sm:$0xff] %v6927_v1  ;;  %v3268_v23 = vadd.f32 %v3267_v16, %v6843_v35  ;;  %v3271_v20 = vrot.slane %v8183_v11, 4  ;;  %v3277_v30 = vrot.slane %v8184_v46, 4  ;;  %v3283_v18 = vrot.slane %v8185_v15, 4 }
 0x348   : > { %8182 = vst [vmem:[#allocation27_spill] sm:$0xff] %v6930_v44  ;;  %v2620_v19 = vadd.f32 %v2619_v55, %v2605_v53  ;;  %v3289_v21 = vrot.slane %v8186_v56, 4  ;;  %v3295_v59 = vrot.slane %v8187_v57, 4  ;;  %v2077_v22 = vadd.f32 %v2076_v24, %v6821_v9 }
 0x349   : > { %v6942_v33 = vadd.f32 %v3251_v41, %v6846_v31  ;;  %v3272_v49 = vadd.f32 %v3271_v20, %v8183_v11  ;;  %v3278_v35 = vadd.f32 %v3277_v30, %v8184_v46  ;;  %v3284_v58 = vadd.f32 %v3283_v18, %v8185_v15 }
 0x34a   : > { %v2621_v32 = vadd.f32 %v2620_v19, %v2606_v36  ;;  %v3290_v53 = vadd.f32 %v3289_v21, %v8186_v56  ;;  %v3296_v63 = vadd.f32 %v3295_v59, %v8187_v57  ;;  %v2078_v16 = vadd.f32 %v2077_v22, %v6824_v12  ;;  %v8189_v36 = vld [vmem:[#allocation21_spill] sm:$0xff] }
 0x34b   : > { %8188 = vst [vmem:[#allocation31_spill] sm:$0xff] %v6942_v33  ;;  %v3269_v55 = vrot.slane %v3268_v23, 1  ;;  %v3273_v3 = vrot.slane %v3272_v49, 2  ;;  %v3279_v2 = vrot.slane %v3278_v35, 2  ;;  %v3285_v24 = vrot.slane %v3284_v58, 2 }
 0x34c   : > { %v2622_v9 = vadd.f32 %v2621_v32, %v2607_v5  ;;  %v3291_v31 = vrot.slane %v3290_v53, 2  ;;  %v3297_v41 = vrot.slane %v3296_v63, 2  ;;  %v2079_v11 = vadd.f32 %v2078_v16, %v6827_v51  ;;  %v8196_v16 = vld [vmem:[#allocation19_spill] sm:$0xff] }
 0x34d   : > { %v3274_v20 = vadd.f32 %v3273_v3, %v3272_v49  ;;  %v3280_v46 = vadd.f32 %v3279_v2, %v3278_v35  ;;  %v3301_v30 = vrot.slane %v8189_v36, 4  ;;  %v3286_v15 = vadd.f32 %v3285_v24, %v3284_v58 }
 0x34e   : > { %v2623_v19 = vadd.f32 %v2622_v9, %v2608_v37  ;;  %v3292_v18 = vadd.f32 %v3291_v31, %v3290_v53  ;;  %v3298_v56 = vadd.f32 %v3297_v41, %v3296_v63  ;;  %v6953_v21 = vadd.f32 %v2079_v11, %v6830_v4 }
 0x34f   : > { %v3275_v12 = vrot.slane %v3274_v20, 1  ;;  %v3281_v57 = vrot.slane %v3280_v46, 1  ;;  %v3302_v5 = vadd.f32 %v3301_v30, %v8189_v36  ;;  %v6957_v22 = vadd.f32 %v3257_v7, %v6849_v26  ;;  %v8195_v7 = vld [vmem:[#allocation25_spill] sm:$0xff] }
 0x350   : > { %v2624_v59 = vadd.f32 %v2623_v19, %v2609_v38  ;;  %v3287_v51 = vrot.slane %v3286_v15, 1  ;;  %v3293_v3 = vrot.slane %v3292_v18, 1  ;;  %v2081_v2 = vmul.f32 %v6953_v21, %v6953_v21 }
 0x351   : > { %8190 = vst [vmem:[#allocation37_spill] sm:$0xff] %v6957_v22  ;;  %v6962_v37 = vadd.f32 %v3263_v60, %v6852_v17  ;;  %v6964_v49 = vadd.f32 %v3269_v55, %v3268_v23  ;;  %v3303_v4 = vrot.slane %v3302_v5, 2  ;;  %v6966_v32 = vadd.f32 %v3275_v12, %v3274_v20  ;;  %v8199_v60 = vld [vmem:[#allocation23_spill] sm:$0xff] }
 0x352   : > { %v2625_v35 = vadd.f32 %v2624_v59, %v2610_v6  ;;  %v6968_v58 = vadd.f32 %v3281_v57, %v3280_v46  ;;  %v3299_v38 = vrot.slane %v3298_v56, 1  ;;  %v2082_v53 = vrot.slane %v2081_v2, 4 }
 0x353   : > { %8191 = vst [vmem:[#allocation41_spill] sm:$0xff] %v6962_v37  ;;  %8192 = vst [vmem:[#allocation35_spill] sm:$0xff] %v6964_v49  ;;  %v3304_v26 = vadd.f32 %v3303_v4, %v3302_v5  ;;  %v3307_v63 = vrot.slane %v8195_v7, 4  ;;  %v3313_v9 = vrot.slane %v8196_v16, 4  ;;  %v6973_v31 = vadd.f32 %v3287_v51, %v3286_v15 }
 0x354   : > { %8193 = vst [vmem:[#allocation39_spill] sm:$0xff] %v6966_v32  ;;  %8194 = vst [vmem:[#allocation89_spill] sm:$0xff] %v6968_v58  ;;  %v2626_v24 = vadd.f32 %v2625_v35, %v6915_v62  ;;  %v6975_v17 = vadd.f32 %v3293_v3, %v3292_v18  ;;  %v3319_v23 = vrot.slane %v8199_v60, 4  ;;  %v2083_v6 = vadd.f32 %v2082_v53, %v2081_v2 }
 0x355   : > { %8197 = vst [vmem:[#allocation90_spill] sm:$0xff] %v6973_v31  ;;  %v3308_v55 = vadd.f32 %v3307_v63, %v8195_v7  ;;  %v3314_v41 = vadd.f32 %v3313_v9, %v8196_v16  ;;  %v3325_v11 = vmax.f32 %v6920_v34, %v6957_v22  ;;  %v3305_v46 = vrot.slane %v3304_v26, 1 }
 0x356   : > { %8198 = vst [vmem:[#allocation92_spill] sm:$0xff] %v6975_v17  ;;  %v2627_v20 = vadd.f32 %v2626_v24, %v6895_v43  ;;  %v3320_v36 = vadd.f32 %v3319_v23, %v8199_v60  ;;  %v3326_v62 = vmax.f32 %v6927_v1, %v6962_v37  ;;  %v2084_v30 = vrot.slane %v2083_v6, 2 }
 0x357   : > { %v3309_v19 = vrot.slane %v3308_v55, 2  ;;  %v3315_v15 = vrot.slane %v3314_v41, 2  ;;  %v3327_v18 = vmax.f32 %v6930_v44, %v6964_v49  ;;  %v6989_v57 = vadd.f32 %v3299_v38, %v3298_v56 }
 0x358   : > { %v2628_v12 = vadd.f32 %v2627_v20, %v6898_v25  ;;  %v3321_v5 = vrot.slane %v3320_v36, 2  ;;  %v3328_v43 = vmax.f32 %v6942_v33, %v6966_v32  ;;  %v2085_v59 = vadd.f32 %v2084_v30, %v2083_v6 }
 0x359   : > { %8200 = vst [vmem:[#allocation93_spill] sm:$0xff] %v6989_v57  ;;  %v3310_v51 = vadd.f32 %v3309_v19, %v3308_v55  ;;  %v3316_v3 = vadd.f32 %v3315_v15, %v3314_v41  ;;  %v3329_v2 = vmax.f32 %v3325_v11, %v6968_v58  ;;  %v6995_v35 = vadd.f32 %v3305_v46, %v3304_v26 }
 0x35a   : > { %v2629_v4 = vadd.f32 %v2628_v12, %v6901_v8  ;;  %v3322_v53 = vadd.f32 %v3321_v5, %v3320_v36  ;;  %v3330_v7 = vmax.f32 %v3326_v62, %v6973_v31  ;;  %v2086_v63 = vrot.slane %v2085_v59, 1 }
 0x35b   : > { %8201 = vst [vmem:[#allocation94_spill] sm:$0xff] %v6995_v35  ;;  %v3311_v25 = vrot.slane %v3310_v51, 1  ;;  %v3317_v56 = vrot.slane %v3316_v3, 1  ;;  %v3331_v38 = vmax.f32 %v3327_v18, %v6975_v17  ;;  %v3332_v24 = vmax.f32 %v3328_v43, %v6989_v57 }
 0x35c   : > { %v2630_v16 = vadd.f32 %v2629_v4, %v6904_v47  ;;  %v3323_v9 = vrot.slane %v3322_v53, 1  ;;  %v2087_v60 = vadd.f32 %v2086_v63, %v2085_v59  ;;  %v3333_v8 = vmax.f32 %v3329_v2, %v6995_v35 }
 0x35d   : > { %v7001_v23 = vadd.f32 %v3311_v25, %v3310_v51  ;;  %v7003_v6 = vadd.f32 %v3317_v56, %v3316_v3 }
 0x35e   : > { %v7007_v26 = vadd.f32 %v2630_v16, %v6907_v45  ;;  %v7009_v55 = vadd.f32 %v3323_v9, %v3322_v53  ;;  %v2088_v41 = vadd.f32 1e-08, %v2087_v60 }
 0x35f   : > { %8202 = vst [vmem:[#allocation95_spill] sm:$0xff] %v7001_v23  ;;  %8203 = vst [vmem:[#allocation97_spill] sm:$0xff] %v7003_v6  ;;  %v3334_v11 = vmax.f32 %v3330_v7, %v7001_v23  ;;  %v3335_v47 = vmax.f32 %v3331_v38, %v7003_v6 }
 0x360   : > { %8204 = vst [vmem:[#allocation99_spill] sm:$0xff] %v7009_v55  ;;  %v2632_v20 = vmul.f32 %v7007_v26, %v7007_v26  ;;  %v3336_v46 = vmax.f32 %v3332_v24, %v7009_v55  ;;  %4593 = vrsqrt.f32 %v2088_v41  ;;  %v2091_v36 = vadd.f32 1.0, %v2088_v41 }
 0x361   : > { %v3337_v62 = vmax.f32 %v3333_v8, %v3334_v11 }
 0x362   : > { %v2633_v30 = vrot.slane %v2632_v20, 4  ;;  %v3338_v19 = vmax.f32 %v3335_v47, %v3336_v46  ;;  %4595 = vrcp.f32 %v2091_v36 }
 0x364   : > { %v2634_v45 = vadd.f32 %v2633_v30, %v2632_v20  ;;  %v7016_v15 = vmax.f32 %v3337_v62, %v3338_v19 }
 0x366   : > { %v2635_v18 = vrot.slane %v2634_v45, 2  ;;  %v3340_v12 = vsub.f32 %v6920_v34, %v7016_v15  ;;  %v3341_v5 = vsub.f32 %v6927_v1, %v7016_v15  ;;  %v3342_v43 = vsub.f32 %v6930_v44, %v7016_v15 }
 0x367   : > { %v3343_v59 = vsub.f32 %v6942_v33, %v7016_v15  ;;  %v3344_v3 = vsub.f32 %v6957_v22, %v7016_v15  ;;  %v3345_v7 = vsub.f32 %v6962_v37, %v7016_v15  ;;  %v3346_v11 = vsub.f32 %v6964_v49, %v7016_v15 }
 0x368   : > { %v2636_v51 = vadd.f32 %v2635_v18, %v2634_v45  ;;  %v3356_v4 = vmul.f32 1.442695, %v3340_v12  ;;  %v3358_v63 = vmul.f32 1.442695, %v3341_v5  ;;  %v3360_v25 = vmul.f32 1.442695, %v3342_v43 }
 0x369   : > { %v3362_v56 = vmul.f32 1.442695, %v3343_v59  ;;  %v3364_v24 = vmul.f32 1.442695, %v3344_v3  ;;  %v3366_v47 = vmul.f32 1.442695, %v3345_v7  ;;  %v3348_v36 = vsub.f32 %v6968_v58, %v7016_v15 }
 0x36a   : > { %v2637_v2 = vrot.slane %v2636_v51, 1  ;;  %v4594_v53 = vpop.eup %4593  ;;  %4597 = vpow2.f32 %v3356_v4  ;;  %v3349_v62 = vsub.f32 %v6973_v31, %v7016_v15  ;;  %v3350_v30 = vsub.f32 %v6975_v17, %v7016_v15 }
 0x36b   : > { %v2090_v38 = vmul.f32 %v4594_v53, %v2088_v41  ;;  %4599 = vpow2.f32 %v3358_v63  ;;  %v3347_v41 = vsub.f32 %v6966_v32, %v7016_v15  ;;  %v3368_v19 = vmul.f32 1.442695, %v3346_v11 }
 0x36c   : > { %v2638_v16 = vadd.f32 %v2637_v2, %v2636_v51  ;;  %v4596_v9 = vpop.eup %4595  ;;  %4601 = vpow2.f32 %v3360_v25  ;;  %v3352_v18 = vsub.f32 %v6995_v35, %v7016_v15  ;;  %v3372_v12 = vmul.f32 1.442695, %v3348_v36 }
 0x36d   : > { %v2093_v60 = vmul.f32 %v4596_v9, %v2090_v38  ;;  %4603 = vpow2.f32 %v3362_v56  ;;  %v3370_v45 = vmul.f32 1.442695, %v3347_v41  ;;  %v3353_v43 = vsub.f32 %v7001_v23, %v7016_v15 }
 0x36e   : > { %v2639_v8 = vadd.f32 1e-08, %v2638_v16  ;;  %v3354_v59 = vsub.f32 %v7003_v6, %v7016_v15  ;;  %v3374_v51 = vmul.f32 1.442695, %v3349_v62  ;;  %v3376_v2 = vmul.f32 1.442695, %v3350_v30 }
 0x36f   : > { %v2094_v20 = vmul.f32 %v2093_v60, %v6953_v21  ;;  %v3351_v21 = vsub.f32 %v6989_v57, %v7016_v15  ;;  %v3355_v53 = vsub.f32 %v7009_v55, %v7016_v15  ;;  %v3380_v56 = vmul.f32 1.442695, %v3352_v18 }
 0x370   : > { %4605 = vrsqrt.f32 %v2639_v8  ;;  %v2642_v46 = vadd.f32 1.0, %v2639_v8  ;;  %v3382_v9 = vmul.f32 1.442695, %v3353_v43 }
 0x371   : > { %4607 = vpow2.f32 %v3364_v24  ;;  %4077 = vst [vmem:[%s6570_s23 + $0x8] sm:$0xff] %v2094_v20  ;;  %v3378_v7 = vmul.f32 1.442695, %v3351_v21  ;;  %v3384_v24 = vmul.f32 1.442695, %v3354_v59 }
 0x372   : > { %4609 = vrcp.f32 %v2642_v46  ;;  %v3386_v41 = vmul.f32 1.442695, %v3355_v53 }
 0x373   : > { %4611 = vpow2.f32 %v3366_v47 }
 0x374   : > { %v7046_v5 = vpop.eup %4597  ;;  %4613 = vpow2.f32 %v3368_v19 }
 0x375   : > { %v7052_v3 = vpop.eup %4599  ;;  %4615 = vpow2.f32 %v3370_v45 }
 0x376   : > { %v7054_v4 = vpop.eup %4601  ;;  %v3404_v63 = vrot.slane %v7052_v3, 7  ;;  %4617 = vpow2.f32 %v3372_v12 }
 0x377   : > { %v7059_v25 = vpop.eup %4603  ;;  %v3406_v38 = vrot.slane %v7054_v4, 6  ;;  %4619 = vpow2.f32 %v3374_v51 }
 0x378   : > { %v3405_v60 = vsel %vm624_vm0, %v3404_v63, %v7046_v5  ;;  %4621 = vpow2.f32 %v3376_v2  ;;  %v3408_v20 = vrot.slane %v7059_v25, 5 }
 0x379   : > { %v3407_v47 = vsel %vm627_vm1, %v3406_v38, %v3405_v60  ;;  %4623 = vpow2.f32 %v3378_v7 }
 0x37a   : > { %v4606_v16 = vpop.eup %4605  ;;  %4625 = vpow2.f32 %v3380_v56  ;;  %v3409_v30 = vsel %vm630_vm2, %v3408_v20, %v3407_v47 }
 0x37b   : > { %v7064_v11 = vpop.eup %4607  ;;  %v2641_v15 = vmul.f32 %v4606_v16, %v2639_v8  ;;  %4627 = vpow2.f32 %v3382_v9 }
 0x37c   : > { %v4610_v46 = vpop.eup %4609  ;;  %v3410_v19 = vrot.slane %v7064_v11, 4  ;;  %4629 = vpow2.f32 %v3384_v24 }
 0x37d   : > { %v7068_v36 = vpop.eup %4611  ;;  %v2644_v62 = vmul.f32 %v4610_v46, %v2641_v15  ;;  %4631 = vpow2.f32 %v3386_v41  ;;  %v8205_v46 = vld [vmem:[#allocation87_spill] sm:$0xff] }
 0x37e   : > { %v7074_v8 = vsel %vm633_vm3, %v3410_v19, %v3409_v30  ;;  %v7077_v18 = vpop.eup %4613 }
 0x37f   : > { %v2645_v21 = vmul.f32 %v2644_v62, %v7007_v26  ;;  %v7083_v2 = vpop.eup %4615 }
 0x380   : > { %v7089_v56 = vpop.eup %4617 }
 0x381   : > { %v2646_v12 = vmul.f32 %v2645_v21, %v8164_v61  ;;  %v2647_v43 = vmul.f32 %v2645_v21, %v8165_v14  ;;  %v2648_v59 = vmul.f32 %v8166_v50, %v2645_v21  ;;  %v2649_v51 = vmul.f32 %v8167_v0, %v2645_v21  ;;  %v7103_v60 = vpop.eup %4619 }
 0x382   : > { %v2650_v26 = vmul.f32 %v2645_v21, %v8168_v29  ;;  %v2651_v53 = vmul.f32 %v2645_v21, %v8169_v39  ;;  %v2652_v7 = vmul.f32 %v8170_v48, %v2645_v21  ;;  %v2653_v63 = vmul.f32 %v8171_v52, %v2645_v21  ;;  %v7117_v62 = vpop.eup %4621 }
 0x383   : > { %v7092_v38 = vmul.f32 %v2645_v21, %v8177_v10  ;;  %v7095_v16 = vmul.f32 %v2645_v21, %v8178_v28  ;;  %v7098_v9 = vmul.f32 %v8179_v27, %v2645_v21  ;;  %v7101_v24 = vmul.f32 %v8172_v13, %v2645_v21  ;;  %v7119_v6 = vpop.eup %4623 }
 0x384   : > { %v7106_v15 = vmul.f32 %v2645_v21, %v8173_v54  ;;  %v7109_v47 = vmul.f32 %v2645_v21, %v8174_v42  ;;  %v7112_v20 = vmul.f32 %v8175_v40, %v2645_v21  ;;  %v7115_v41 = vmul.f32 %v8205_v46, %v2645_v21  ;;  %v7121_v31 = vpop.eup %4625 }
 0x385   : > { %v2662_v30 = vrot.slane %v2646_v12, 4  ;;  %v2668_v19 = vrot.slane %v2647_v43, 4  ;;  %v2674_v45 = vrot.slane %v2648_v59, 4  ;;  %v2680_v55 = vrot.slane %v2649_v51, 4  ;;  %v7123_v21 = vpop.eup %4627 }
 0x386   : > { %v2686_v23 = vrot.slane %v2650_v26, 4  ;;  %v2692_v35 = vrot.slane %v2651_v53, 4  ;;  %v2698_v57 = vrot.slane %v2652_v7, 4  ;;  %v2704_v17 = vrot.slane %v2653_v63, 4  ;;  %v7125_v34 = vpop.eup %4629 }
 0x387   : > { %v2663_v58 = vadd.f32 %v2662_v30, %v2646_v12  ;;  %v2669_v32 = vadd.f32 %v2668_v19, %v2647_v43  ;;  %v2675_v49 = vadd.f32 %v2674_v45, %v2648_v59  ;;  %v2681_v37 = vadd.f32 %v2680_v55, %v2649_v51  ;;  %v7127_v13 = vpop.eup %4631 }
 0x388   : > { %v2687_v22 = vadd.f32 %v2686_v23, %v2650_v26  ;;  %v2693_v33 = vadd.f32 %v2692_v35, %v2651_v53  ;;  %v2699_v44 = vadd.f32 %v2698_v57, %v2652_v7  ;;  %v2705_v1 = vadd.f32 %v2704_v17, %v2653_v63 }
 0x389   : > { %v2664_v46 = vrot.slane %v2663_v58, 2  ;;  %v2670_v40 = vrot.slane %v2669_v32, 2  ;;  %v2676_v42 = vrot.slane %v2675_v49, 2  ;;  %v2682_v54 = vrot.slane %v2681_v37, 2 }
 0x38a   : > { %v2688_v27 = vrot.slane %v2687_v22, 2  ;;  %v2694_v28 = vrot.slane %v2693_v33, 2  ;;  %v2700_v12 = vrot.slane %v2699_v44, 2  ;;  %v2706_v43 = vrot.slane %v2705_v1, 2 }
 0x38b   : > { %v2665_v45 = vadd.f32 %v2664_v46, %v2663_v58  ;;  %v2671_v55 = vadd.f32 %v2670_v40, %v2669_v32  ;;  %v2677_v59 = vadd.f32 %v2676_v42, %v2675_v49  ;;  %v2683_v51 = vadd.f32 %v2682_v54, %v2681_v37 }
 0x38c   : > { %v2689_v23 = vadd.f32 %v2688_v27, %v2687_v22  ;;  %v2695_v35 = vadd.f32 %v2694_v28, %v2693_v33  ;;  %v2701_v57 = vadd.f32 %v2700_v12, %v2699_v44  ;;  %v2707_v17 = vadd.f32 %v2706_v43, %v2705_v1 }
 0x38d   : > { %v2666_v26 = vrot.slane %v2665_v45, 1  ;;  %v2672_v53 = vrot.slane %v2671_v55, 1  ;;  %v2678_v7 = vrot.slane %v2677_v59, 1  ;;  %v2684_v63 = vrot.slane %v2683_v51, 1 }
 0x38e   : > { %v2690_v30 = vrot.slane %v2689_v23, 1  ;;  %v2696_v19 = vrot.slane %v2695_v35, 1  ;;  %v2702_v10 = vrot.slane %v2701_v57, 1  ;;  %v2708_v52 = vrot.slane %v2707_v17, 1 }
 0x38f   : > { %v2667_v48 = vadd.f32 %v2666_v26, %v2665_v45  ;;  %v2673_v39 = vadd.f32 %v2672_v53, %v2671_v55  ;;  %v2679_v29 = vadd.f32 %v2678_v7, %v2677_v59  ;;  %v2685_v0 = vadd.f32 %v2684_v63, %v2683_v51 }
 0x390   : > { %v2691_v58 = vadd.f32 %v2690_v30, %v2689_v23  ;;  %v2697_v40 = vadd.f32 %v2696_v19, %v2695_v35  ;;  %v2703_v42 = vadd.f32 %v2702_v10, %v2701_v57  ;;  %v2709_v54 = vadd.f32 %v2708_v52, %v2707_v17 }
 0x391   : > { %v2710_v28 = vrot.slane %v7092_v38, 4  ;;  %v2716_v27 = vrot.slane %v7095_v16, 4  ;;  %v2722_v1 = vrot.slane %v7098_v9, 4  ;;  %v2728_v44 = vrot.slane %v7101_v24, 4 }
 0x392   : > { %v2734_v33 = vrot.slane %v7106_v15, 4  ;;  %v2740_v22 = vrot.slane %v7109_v47, 4  ;;  %v2746_v37 = vrot.slane %v7112_v20, 4  ;;  %v2752_v49 = vrot.slane %v7115_v41, 4 }
 0x393   : > { %v2711_v32 = vadd.f32 %v2710_v28, %v7092_v38  ;;  %v2717_v52 = vadd.f32 %v2716_v27, %v7095_v16  ;;  %v2723_v10 = vadd.f32 %v2722_v1, %v7098_v9  ;;  %v2729_v46 = vadd.f32 %v2728_v44, %v7101_v24 }
 0x394   : > { %v2735_v12 = vadd.f32 %v2734_v33, %v7106_v15  ;;  %v2741_v43 = vadd.f32 %v2740_v22, %v7109_v47  ;;  %v2747_v45 = vadd.f32 %v2746_v37, %v7112_v20  ;;  %v2753_v55 = vadd.f32 %v2752_v49, %v7115_v41 }
 0x395   : > { %v2712_v59 = vrot.slane %v2711_v32, 2  ;;  %v2718_v51 = vrot.slane %v2717_v52, 2  ;;  %v2724_v23 = vrot.slane %v2723_v10, 2  ;;  %v2730_v35 = vrot.slane %v2729_v46, 2 }
 0x396   : > { %v2736_v57 = vrot.slane %v2735_v12, 2  ;;  %v2742_v38 = vrot.slane %v2741_v43, 2  ;;  %v2748_v17 = vrot.slane %v2747_v45, 2  ;;  %v2754_v16 = vrot.slane %v2753_v55, 2 }
 0x397   : > { %v2713_v26 = vadd.f32 %v2712_v59, %v2711_v32  ;;  %v2719_v9 = vadd.f32 %v2718_v51, %v2717_v52  ;;  %v2725_v53 = vadd.f32 %v2724_v23, %v2723_v10  ;;  %v2731_v24 = vadd.f32 %v2730_v35, %v2729_v46  ;;  %v8208_v59 = vld [vmem:[#allocation46_spill] sm:$0xff]  ;;  %v8209_v23 = vld [vmem:[#allocation47_spill] sm:$0xff] }
 0x398   : > { %v2737_v7 = vadd.f32 %v2736_v57, %v2735_v12  ;;  %v2743_v15 = vadd.f32 %v2742_v38, %v2741_v43  ;;  %v2749_v63 = vadd.f32 %v2748_v17, %v2747_v45  ;;  %v2755_v47 = vadd.f32 %v2754_v16, %v2753_v55  ;;  %v8206_v12 = vld [vmem:[#allocation44_spill] sm:$0xff]  ;;  %v8207_v45 = vld [vmem:[#allocation45_spill] sm:$0xff] }
 0x399   : > { %v2714_v30 = vrot.slane %v2713_v26, 1  ;;  %v2720_v20 = vrot.slane %v2719_v9, 1  ;;  %v2726_v19 = vrot.slane %v2725_v53, 1  ;;  %v2732_v41 = vrot.slane %v2731_v24, 1  ;;  %v8210_v57 = vld [vmem:[#allocation48_spill] sm:$0xff]  ;;  %v8211_v17 = vld [vmem:[#allocation49_spill] sm:$0xff] }
 0x39a   : > { %v2738_v28 = vrot.slane %v2737_v7, 1  ;;  %v2744_v27 = vrot.slane %v2743_v15, 1  ;;  %v2750_v1 = vrot.slane %v2749_v63, 1  ;;  %v2756_v44 = vrot.slane %v2755_v47, 1 }
 0x39b   : > { %v2715_v33 = vadd.f32 %v2714_v30, %v2713_v26  ;;  %v2721_v22 = vadd.f32 %v2720_v20, %v2719_v9  ;;  %v2727_v37 = vadd.f32 %v2726_v19, %v2725_v53  ;;  %v2733_v49 = vadd.f32 %v2732_v41, %v2731_v24  ;;  %v8212_v26 = vld [vmem:[#allocation50_spill] sm:$0xff]  ;;  %v8220_v30 = vld [vmem:[#allocation61_spill] sm:$0xff] }
 0x39c   : > { %v2739_v32 = vadd.f32 %v2738_v28, %v2737_v7  ;;  %v2745_v52 = vadd.f32 %v2744_v27, %v2743_v15  ;;  %v2751_v10 = vadd.f32 %v2750_v1, %v2749_v63  ;;  %v2757_v46 = vadd.f32 %v2756_v44, %v2755_v47  ;;  %v8217_v15 = vld [vmem:[#allocation56_spill] sm:$0xff]  ;;  %v8218_v63 = vld [vmem:[#allocation59_spill] sm:$0xff]  ;;  %v8221_v27 = vld [vmem:[#allocation62_spill] sm:$0xff] }
 0x39d   : > { %v7146_v43 = vadd.f32 %v2667_v48, %v8206_v12  ;;  %v7149_v55 = vadd.f32 %v2673_v39, %v8207_v45  ;;  %v7152_v51 = vadd.f32 %v2679_v29, %v8208_v59  ;;  %v7155_v35 = vadd.f32 %v2685_v0, %v8209_v23  ;;  %v8213_v48 = vld [vmem:[#allocation53_spill] sm:$0xff]  ;;  %v8214_v39 = vld [vmem:[#allocation54_spill] sm:$0xff]  ;;  %v8215_v29 = vld [vmem:[#allocation55_spill] sm:$0xff] }
 0x39e   : > { %v7158_v38 = vadd.f32 %v2691_v58, %v8210_v57  ;;  %v7161_v16 = vadd.f32 %v2697_v40, %v8211_v17  ;;  %v7164_v9 = vadd.f32 %v2703_v42, %v8212_v26  ;;  %v7167_v53 = vadd.f32 %v2709_v54, %v8213_v48  ;;  %v8219_v47 = vld [vmem:[#allocation60_spill] sm:$0xff]  ;;  %v8222_v44 = vld [vmem:[#allocation98_spill] sm:$0xff] }
 0x39f   : > { %v7170_v24 = vadd.f32 %v2715_v33, %v8214_v39  ;;  %v7173_v7 = vadd.f32 %v2721_v22, %v8215_v29  ;;  %v8216_v0 = vrot.slane %v7068_v36, 3  ;;  %v7180_v40 = vadd.f32 %v2727_v37, %v8217_v15 }
 0x3a0   : > { %v7183_v42 = vadd.f32 %v2733_v49, %v8218_v63  ;;  %v7186_v54 = vadd.f32 %v2739_v32, %v8219_v47  ;;  %v7189_v20 = vadd.f32 %v2745_v52, %v8220_v30  ;;  %v2774_v19 = vmax.f32 %v7146_v43, %v7158_v38 }
 0x3a1   : > { %v3413_v58 = vsel %vm636_vm4, %v8216_v0, %v7074_v8  ;;  %v2775_v41 = vmax.f32 %v7149_v55, %v7161_v16  ;;  %v2776_v8 = vmax.f32 %v7152_v51, %v7164_v9  ;;  %v2777_v28 = vmax.f32 %v7155_v35, %v7167_v53 }
 0x3a2   : > { %v7200_v1 = vadd.f32 %v2751_v10, %v8221_v27  ;;  %v7203_v33 = vadd.f32 %v2757_v46, %v8222_v44  ;;  %v3418_v22 = vrot.slane %v7103_v60, 7  ;;  %v3420_v37 = vrot.slane %v7117_v62, 6 }
 0x3a3   : > { %v2778_v49 = vmax.f32 %v2774_v19, %v7170_v24  ;;  %v2779_v32 = vmax.f32 %v2775_v41, %v7173_v7  ;;  %v2780_v52 = vmax.f32 %v2776_v8, %v7180_v40  ;;  %v2781_v12 = vmax.f32 %v2777_v28, %v7183_v42 }
 0x3a4   : > { %v3414_v45 = vrot.slane %v7077_v18, 2  ;;  %v3419_v10 = vsel %vm624_vm0, %v3418_v22, %v7089_v56  ;;  %v3422_v46 = vrot.slane %v7119_v6, 5  ;;  %v3424_v39 = vrot.slane %v7121_v31, 4 }
 0x3a5   : > { %v2782_v59 = vmax.f32 %v2778_v49, %v7186_v54  ;;  %v2783_v23 = vmax.f32 %v2779_v32, %v7189_v20  ;;  %v2784_v57 = vmax.f32 %v2780_v52, %v7200_v1  ;;  %v2785_v17 = vmax.f32 %v2781_v12, %v7203_v33 }
 0x3a6   : > { %v3415_v26 = vsel %vm639_vm5, %v3414_v45, %v3413_v58  ;;  %v3421_v48 = vsel %vm627_vm1, %v3420_v37, %v3419_v10  ;;  %v3426_v63 = vrot.slane %v7123_v21, 3  ;;  %v3416_v47 = vrot.slane %v7083_v2, 1 }
 0x3a7   : > { %v2786_v29 = vmax.f32 %v2782_v59, %v2783_v23  ;;  %v2787_v0 = vmax.f32 %v2784_v57, %v2785_v17  ;;  %v3423_v15 = vsel %vm630_vm2, %v3422_v46, %v3421_v48  ;;  %v3428_v19 = vrot.slane %v7125_v34, 2 }
 0x3a8   : > { %v3425_v30 = vsel %vm633_vm3, %v3424_v39, %v3423_v15  ;;  %v3417_v58 = vsel %vm642_vm6, %v3416_v47, %v3415_v26  ;;  %v3430_v27 = vrot.slane %v7127_v13, 1 }
 0x3a9   : > { %v2788_v41 = vmax.f32 %v2786_v29, %v2787_v0  ;;  %v3427_v8 = vsel %vm636_vm4, %v3426_v63, %v3425_v30 }
 0x3aa   : > { %v3429_v28 = vsel %vm639_vm5, %v3428_v19, %v3427_v8 }
 0x3ab   : > { %v2789_v44 = vsub.f32 %v7146_v43, %v2788_v41  ;;  %v2790_v22 = vsub.f32 %v7149_v55, %v2788_v41  ;;  %v2791_v37 = vsub.f32 %v7152_v51, %v2788_v41  ;;  %v2792_v49 = vsub.f32 %v7155_v35, %v2788_v41 }
 0x3ac   : > { %v2793_v32 = vsub.f32 %v7158_v38, %v2788_v41  ;;  %v2794_v52 = vsub.f32 %v7161_v16, %v2788_v41  ;;  %v2795_v12 = vsub.f32 %v7164_v9, %v2788_v41  ;;  %v2796_v45 = vsub.f32 %v7167_v53, %v2788_v41 }
 0x3ad   : > { %v2797_v10 = vsub.f32 %v7170_v24, %v2788_v41  ;;  %v2798_v46 = vsub.f32 %v7173_v7, %v2788_v41  ;;  %v2799_v43 = vsub.f32 %v7180_v40, %v2788_v41  ;;  %v2800_v55 = vsub.f32 %v7183_v42, %v2788_v41 }
 0x3ae   : > { %v2801_v51 = vsub.f32 %v7186_v54, %v2788_v41  ;;  %v2802_v35 = vsub.f32 %v7189_v20, %v2788_v41  ;;  %v2803_v38 = vsub.f32 %v7200_v1, %v2788_v41  ;;  %v2804_v16 = vsub.f32 %v7203_v33, %v2788_v41 }
 0x3af   : > { %v2805_v59 = vmul.f32 1.442695, %v2789_v44  ;;  %v2807_v9 = vmul.f32 1.442695, %v2790_v22  ;;  %v2809_v23 = vmul.f32 1.442695, %v2791_v37  ;;  %v3431_v53 = vsel %vm642_vm6, %v3430_v27, %v3429_v28 }
 0x3b0   : > { %v2811_v24 = vmul.f32 1.442695, %v2792_v49  ;;  %v3434_v57 = vadd.f32 %v3431_v53, %v3417_v58  ;;  %v2813_v7 = vmul.f32 1.442695, %v2793_v32  ;;  %v2815_v40 = vmul.f32 1.442695, %v2794_v52 }
 0x3b1   : > { %4633 = vpow2.f32 %v2805_v59  ;;  %v2817_v42 = vmul.f32 1.442695, %v2795_v12  ;;  %v2819_v54 = vmul.f32 1.442695, %v2796_v45  ;;  %v2821_v1 = vmul.f32 1.442695, %v2797_v10 }
 0x3b2   : > { %4635 = vpow2.f32 %v2807_v9  ;;  %v3435_v20 = vrot.slane %v3434_v57, 4  ;;  %v2823_v33 = vmul.f32 1.442695, %v2798_v46  ;;  %v2825_v26 = vmul.f32 1.442695, %v2799_v43 }
 0x3b3   : > { %4637 = vpow2.f32 %v2809_v23  ;;  %v2827_v48 = vmul.f32 1.442695, %v2800_v55  ;;  %v2829_v29 = vmul.f32 1.442695, %v2801_v51  ;;  %v2831_v0 = vmul.f32 1.442695, %v2802_v35 }
 0x3b4   : > { %4639 = vpow2.f32 %v2811_v24  ;;  %v3436_v17 = vadd.f32 %v3435_v20, %v3434_v57  ;;  %v2833_v47 = vmul.f32 1.442695, %v2803_v38  ;;  %v2835_v19 = vmul.f32 1.442695, %v2804_v16 }
 0x3b5   : > { %4641 = vpow2.f32 %v2813_v7 }
 0x3b6   : > { %4643 = vpow2.f32 %v2815_v40  ;;  %v3437_v39 = vrot.slane %v3436_v17, 2 }
 0x3b7   : > { %4645 = vpow2.f32 %v2817_v42 }
 0x3b8   : > { %4647 = vpow2.f32 %v2819_v54  ;;  %v3438_v15 = vadd.f32 %v3437_v39, %v3436_v17 }
 0x3b9   : > { %4649 = vpow2.f32 %v2821_v1 }
 0x3ba   : > { %4651 = vpow2.f32 %v2823_v33  ;;  %v3439_v41 = vrot.slane %v3438_v15, 1 }
 0x3bb   : > { %v7248_v63 = vpop.eup %4633  ;;  %4653 = vpow2.f32 %v2825_v26 }
 0x3bc   : > { %v7250_v30 = vpop.eup %4635  ;;  %4655 = vpow2.f32 %v2827_v48  ;;  %v3440_v44 = vadd.f32 %v3439_v41, %v3438_v15 }
 0x3bd   : > { %v7252_v8 = vpop.eup %4637  ;;  %4657 = vpow2.f32 %v2829_v29  ;;  %v2853_v58 = vrot.slane %v7250_v30, 7 }
 0x3be   : > { %v7255_v28 = vpop.eup %4639  ;;  %4659 = vpow2.f32 %v2831_v0  ;;  %v2855_v27 = vrot.slane %v7252_v8, 6 }
 0x3bf   : > { %v7258_v22 = vpop.eup %4641  ;;  %4661 = vpow2.f32 %v2833_v47  ;;  %v2854_v37 = vsel %vm624_vm0, %v2853_v58, %v7248_v63  ;;  %v2857_v49 = vrot.slane %v7255_v28, 5  ;;  %v8223_v58 = vld [vmem:[#allocation108_spill] sm:$0xff] }
 0x3c0   : > { %v7263_v32 = vpop.eup %4643  ;;  %4663 = vpow2.f32 %v2835_v19  ;;  %v2856_v52 = vsel %vm627_vm1, %v2855_v27, %v2854_v37  ;;  %v2859_v12 = vrot.slane %v7258_v22, 4 }
 0x3c1   : > { %v7267_v45 = vpop.eup %4645  ;;  %v2858_v10 = vsel %vm630_vm2, %v2857_v49, %v2856_v52  ;;  %v2861_v46 = vrot.slane %v7263_v32, 3  ;;  %4665 = vrcp.f32 %v3440_v44 }
 0x3c2   : > { %v7271_v43 = vpop.eup %4647  ;;  %v2860_v55 = vsel %vm633_vm3, %v2859_v12, %v2858_v10  ;;  %v2863_v51 = vrot.slane %v7267_v45, 2 }
 0x3c3   : > { %v7275_v35 = vpop.eup %4649  ;;  %v2862_v38 = vsel %vm636_vm4, %v2861_v46, %v2860_v55  ;;  %v2865_v16 = vrot.slane %v7271_v43, 1 }
 0x3c4   : > { %v7279_v59 = vpop.eup %4651  ;;  %v2864_v9 = vsel %vm639_vm5, %v2863_v51, %v2862_v38 }
 0x3c5   : > { %v7282_v23 = vpop.eup %4653  ;;  %v2866_v53 = vsel %vm642_vm6, %v2865_v16, %v2864_v9  ;;  %v2867_v24 = vrot.slane %v7279_v59, 7 }
 0x3c6   : > { %v7286_v57 = vpop.eup %4655  ;;  %v2869_v7 = vrot.slane %v7282_v23, 6 }
 0x3c7   : > { %v7289_v40 = vpop.eup %4657  ;;  %v2868_v42 = vsel %vm624_vm0, %v2867_v24, %v7275_v35  ;;  %v2871_v54 = vrot.slane %v7286_v57, 5 }
 0x3c8   : > { %v7294_v20 = vpop.eup %4659  ;;  %v2870_v1 = vsel %vm627_vm1, %v2869_v7, %v2868_v42  ;;  %v2873_v33 = vrot.slane %v7289_v40, 4 }
 0x3c9   : > { %v7298_v17 = vpop.eup %4661  ;;  %v2872_v26 = vsel %vm630_vm2, %v2871_v54, %v2870_v1  ;;  %v2875_v48 = vrot.slane %v7294_v20, 3  ;;  %v8224_v54 = vld [vmem:[#allocation58_spill] sm:$0xff] }
 0x3ca   : > { %v7302_v39 = vpop.eup %4663  ;;  %v2874_v29 = vsel %vm633_vm3, %v2873_v33, %v2872_v26  ;;  %v2877_v0 = vrot.slane %v7298_v17, 2  ;;  %v8225_v33 = vld [vmem:[#allocation66_spill] sm:$0xff] }
 0x3cb   : > { %v4666_v15 = vpop.eup %4665  ;;  %v2876_v47 = vsel %vm636_vm4, %v2875_v48, %v2874_v29  ;;  %v2879_v19 = vrot.slane %v7302_v39, 1 }
 0x3cc   : > { %v2878_v41 = vsel %vm639_vm5, %v2877_v0, %v2876_v47  ;;  %v3445_v27 = vrot.slane %v4666_v15, %v8223_v58  ;;  %v8226_v47 = vld [vmem:[#allocation52_spill] sm:$0xff] }
 0x3cd   : > { %v2880_v44 = vsel %vm642_vm6, %v2879_v19, %v2878_v41  ;;  %v8227_v41 = vld [vmem:[#allocation80_spill] sm:$0xff] }
 0x3ce   : > { %v2883_v37 = vadd.f32 %v2880_v44, %v2866_v53  ;;  %v3446_v49 = vmul.f32 %v7046_v5, %v3445_v27  ;;  %v3447_v52 = vmul.f32 %v7052_v3, %v3445_v27  ;;  %v3448_v10 = vmul.f32 %v7054_v4, %v3445_v27 }
 0x3cf   : > { %v3457_v55 = vmul.f32 %v7119_v6, %v3445_v27  ;;  %v3458_v51 = vmul.f32 %v7121_v31, %v3445_v27  ;;  %v3459_v38 = vmul.f32 %v7123_v21, %v3445_v27  ;;  %v3460_v16 = vmul.f32 %v7125_v34, %v3445_v27 }
 0x3d0   : > { %v2884_v12 = vrot.slane %v2883_v37, 4  ;;  %v3461_v9 = vmul.f32 %v7127_v13, %v3445_v27  ;;  %v3465_v53 = vrot.slane %v3446_v49, %v8223_v58  ;;  %v3469_v5 = vrot.slane %v3447_v52, %v8223_v58  ;;  %v8229_v52 = vld [vmem:[#allocation43_spill] sm:$0xff] }
 0x3d1   : > { %v3449_v3 = vmul.f32 %v7059_v25, %v3445_v27  ;;  %v3450_v4 = vmul.f32 %v7064_v11, %v3445_v27  ;;  %v3473_v7 = vrot.slane %v3448_v10, %v8223_v58  ;;  %v3509_v31 = vrot.slane %v3457_v55, %v8223_v58  ;;  %v8230_v10 = vld [vmem:[#allocation84_spill] sm:$0xff] }
 0x3d2   : > { %v2885_v46 = vadd.f32 %v2884_v12, %v2883_v37  ;;  %v3513_v21 = vrot.slane %v3458_v51, %v8223_v58  ;;  %v3517_v34 = vrot.slane %v3459_v38, %v8223_v58  ;;  %v3521_v13 = vrot.slane %v3460_v16, %v8223_v58  ;;  %v8228_v37 = vld [vmem:[#allocation86_spill] sm:$0xff]  ;;  %v8232_v16 = vld [vmem:[#allocation64_spill] sm:$0xff] }
 0x3d3   : > { %v3525_v42 = vrot.slane %v3461_v9, %v8223_v58  ;;  %v3526_v1 = vmul.f32 %v3465_v53, %v8224_v54  ;;  %v3527_v26 = vmul.f32 %v3469_v5, %v8225_v33  ;;  %v3451_v11 = vmul.f32 %v7068_v36, %v3445_v27 }
 0x3d4   : > { %v2886_v24 = vrot.slane %v2885_v46, 2  ;;  %v3452_v48 = vmul.f32 %v7077_v18, %v3445_v27  ;;  %v3477_v29 = vrot.slane %v3449_v3, %v8223_v58  ;;  %v3481_v0 = vrot.slane %v3450_v4, %v8223_v58  ;;  %v8231_v18 = vld [vmem:[#allocation88_spill] sm:$0xff] }
 0x3d5   : > { %v3528_v19 = vmul.f32 %v8226_v47, %v3473_v7  ;;  %v7337_v44 = vmul.f32 %v8227_v41, %v3509_v31  ;;  %v7340_v49 = vmul.f32 %v3513_v21, %v8228_v37  ;;  %v7343_v12 = vmul.f32 %v3517_v34, %v8229_v52  ;;  %v8234_v31 = vld [vmem:[#allocation74_spill] sm:$0xff] }
 0x3d6   : > { %v2887_v6 = vadd.f32 %v2886_v24, %v2885_v46  ;;  %v7346_v36 = vmul.f32 %v8230_v10, %v3521_v13  ;;  %v7349_v46 = vmul.f32 %v8231_v18, %v3525_v42  ;;  %v3542_v55 = vadd.f32 %v3527_v26, %v3526_v1  ;;  %v8233_v24 = vld [vmem:[#allocation70_spill] sm:$0xff]  ;;  %v8235_v13 = vld [vmem:[#allocation68_spill] sm:$0xff] }
 0x3d7   : > { %v3453_v51 = vmul.f32 %v7083_v2, %v3445_v27  ;;  %v3485_v38 = vrot.slane %v3451_v11, %v8223_v58  ;;  %v3529_v9 = vmul.f32 %v8232_v16, %v3477_v29  ;;  %v3489_v5 = vrot.slane %v3452_v48, %v8223_v58  ;;  %v8236_v11 = vld [vmem:[#allocation72_spill] sm:$0xff] }
 0x3d8   : > { %v2888_v25 = vrot.slane %v2887_v6, 1  ;;  %v3543_v53 = vadd.f32 %v3542_v55, %v3528_v19  ;;  %v3530_v3 = vmul.f32 %v3481_v0, %v8233_v24  ;;  %v3454_v7 = vmul.f32 %v7089_v56, %v3445_v27 }
 0x3d9   : > { %v3531_v21 = vmul.f32 %v3485_v38, %v8234_v31  ;;  %v3532_v42 = vmul.f32 %v8235_v13, %v3489_v5  ;;  %v3455_v1 = vmul.f32 %v7103_v60, %v3445_v27  ;;  %v7362_v26 = vmul.f32 %v7117_v62, %v3445_v27 }
 0x3da   : > { %v2889_v15 = vadd.f32 %v2888_v25, %v2887_v6  ;;  %v3544_v4 = vadd.f32 %v3543_v53, %v3529_v9  ;;  %v3493_v6 = vrot.slane %v3453_v51, %v8223_v58  ;;  %v3497_v25 = vrot.slane %v3454_v7, %v8223_v58  ;;  %v8237_v51 = vld [vmem:[#allocation78_spill] sm:$0xff] }
 0x3db   : > { %v3501_v19 = vrot.slane %v3455_v1, %v8223_v58  ;;  %v3505_v55 = vrot.slane %v7362_v26, %v8223_v58 }
 0x3dc   : > { %4667 = vrcp.f32 %v2889_v15  ;;  %v3545_v34 = vadd.f32 %v3544_v4, %v3530_v3  ;;  %v3533_v48 = vmul.f32 %v8236_v11, %v3493_v6  ;;  %v3534_v38 = vmul.f32 %v3497_v25, %v8237_v51 }
 0x3de   : > { %v3546_v2 = vadd.f32 %v3545_v34, %v3531_v21 }
 0x3e0   : > { %v3547_v29 = vadd.f32 %v3546_v2, %v3532_v42 }
 0x3e2   : > { %v3548_v15 = vadd.f32 %v3547_v29, %v3533_v48 }
 0x3e6   : > { %v4668_v0 = vpop.eup %4667 }
 0x3e7   : > { %v2894_v56 = vrot.slane %v4668_v0, %v8223_v58  ;;  %v8238_v0 = vld [vmem:[#allocation63_spill] sm:$0xff] }
 0x3e9   : > { %v2895_v60 = vmul.f32 %v7248_v63, %v2894_v56  ;;  %v2896_v62 = vmul.f32 %v7250_v30, %v2894_v56  ;;  %v2897_v27 = vmul.f32 %v7252_v8, %v2894_v56  ;;  %v2898_v9 = vmul.f32 %v7255_v28, %v2894_v56 }
 0x3ea   : > { %v2899_v53 = vmul.f32 %v7258_v22, %v2894_v56  ;;  %v2900_v5 = vmul.f32 %v7263_v32, %v2894_v56  ;;  %v2901_v3 = vmul.f32 %v7267_v45, %v2894_v56  ;;  %v2902_v4 = vmul.f32 %v7271_v43, %v2894_v56 }
 0x3eb   : > { %v2903_v7 = vmul.f32 %v7275_v35, %v2894_v56  ;;  %v2904_v6 = vmul.f32 %v7279_v59, %v2894_v56  ;;  %v2905_v63 = vmul.f32 %v7282_v23, %v2894_v56  ;;  %v2906_v30 = vmul.f32 %v7286_v57, %v2894_v56 }
 0x3ec   : > { %v2907_v8 = vmul.f32 %v7289_v40, %v2894_v56  ;;  %v2908_v28 = vmul.f32 %v7294_v20, %v2894_v56  ;;  %v2909_v22 = vmul.f32 %v7298_v17, %v2894_v56  ;;  %v2910_v32 = vmul.f32 %v7302_v39, %v2894_v56 }
 0x3ed   : > { %v2914_v45 = vrot.slane %v2895_v60, %v8223_v58  ;;  %v2918_v43 = vrot.slane %v2896_v62, %v8223_v58  ;;  %v2922_v35 = vrot.slane %v2897_v27, %v8223_v58  ;;  %v2926_v59 = vrot.slane %v2898_v9, %v8223_v58  ;;  %v8239_v60 = vld [vmem:[#allocation69_spill] sm:$0xff] }
 0x3ee   : > { %v2930_v23 = vrot.slane %v2899_v53, %v8223_v58  ;;  %v2934_v57 = vrot.slane %v2900_v5, %v8223_v58  ;;  %v2938_v40 = vrot.slane %v2901_v3, %v8223_v58  ;;  %v2942_v20 = vrot.slane %v2902_v4, %v8223_v58  ;;  %v8240_v27 = vld [vmem:[#allocation73_spill] sm:$0xff]  ;;  %v8241_v53 = vld [vmem:[#allocation67_spill] sm:$0xff] }
 0x3ef   : > { %v2946_v17 = vrot.slane %v2903_v7, %v8223_v58  ;;  %v2950_v39 = vrot.slane %v2904_v6, %v8223_v58  ;;  %v2954_v21 = vrot.slane %v2905_v63, %v8223_v58  ;;  %v2958_v34 = vrot.slane %v2906_v30, %v8223_v58  ;;  %v8242_v3 = vld [vmem:[#allocation71_spill] sm:$0xff]  ;;  %v8243_v7 = vld [vmem:[#allocation77_spill] sm:$0xff] }
 0x3f0   : > { %v2962_v42 = vrot.slane %v2907_v8, %v8223_v58  ;;  %v2966_v2 = vrot.slane %v2908_v28, %v8223_v58  ;;  %v2970_v1 = vrot.slane %v2909_v22, %v8223_v58  ;;  %v2974_v26 = vrot.slane %v2910_v32, %v8223_v58  ;;  %v8244_v63 = vld [vmem:[#allocation81_spill] sm:$0xff]  ;;  %v8245_v8 = vld [vmem:[#allocation75_spill] sm:$0xff] }
 0x3f1   : > { %v2975_v25 = vmul.f32 %v2914_v45, %v8164_v61  ;;  %v2976_v48 = vmul.f32 %v2918_v43, %v8165_v14  ;;  %v2977_v29 = vmul.f32 %v8166_v50, %v2922_v35  ;;  %v2978_v56 = vmul.f32 %v8238_v0, %v2926_v59  ;;  %v8246_v28 = vld [vmem:[#allocation79_spill] sm:$0xff]  ;;  %v8247_v22 = vld [vmem:[#allocation85_spill] sm:$0xff] }
 0x3f2   : > { %v2979_v62 = vmul.f32 %v2930_v23, %v8239_v60  ;;  %v2980_v9 = vmul.f32 %v2934_v57, %v8240_v27  ;;  %v2981_v5 = vmul.f32 %v8241_v53, %v2938_v40  ;;  %v2982_v4 = vmul.f32 %v8242_v3, %v2942_v20  ;;  %v8248_v32 = vld [vmem:[#allocation91_spill] sm:$0xff]  ;;  %v8251_v40 = vld [vmem:[#allocation82_spill] sm:$0xff] }
 0x3f3   : > { %v2983_v6 = vmul.f32 %v2946_v17, %v8243_v7  ;;  %v2984_v30 = vmul.f32 %v2950_v39, %v8244_v63  ;;  %v2985_v61 = vmul.f32 %v8245_v8, %v2954_v21  ;;  %v2986_v14 = vmul.f32 %v8246_v28, %v2958_v34  ;;  %v8249_v43 = vld [vmem:[#allocation83_spill] sm:$0xff]  ;;  %v8252_v17 = vld [vmem:[#allocation76_spill] sm:$0xff] }
 0x3f4   : > { %v2987_v50 = vmul.f32 %v2962_v42, %v8247_v22  ;;  %v2988_v45 = vmul.f32 %v2966_v2, %v8248_v32  ;;  %v2989_v35 = vmul.f32 %v8249_v43, %v2970_v1  ;;  %v8250_v59 = vld [vmem:[#allocation87_spill] sm:$0xff]  ;;  %v2991_v57 = vadd.f32 %v2976_v48, %v2975_v25 }
 0x3f5   : > { %v2990_v23 = vmul.f32 %v8250_v59, %v2974_v26  ;;  %v3535_v0 = vmul.f32 %v3501_v19, %v8251_v40  ;;  %v3549_v20 = vadd.f32 %v3548_v15, %v3534_v38  ;;  %v3536_v27 = vmul.f32 %v8252_v17, %v3505_v55 }
 0x3f6   : > { %v2992_v60 = vadd.f32 %v2991_v57, %v2977_v29 }
 0x3f7   : > { %v3550_v39 = vadd.f32 %v3549_v20, %v3535_v0 }
 0x3f8   : > { %v2993_v53 = vadd.f32 %v2992_v60, %v2978_v56 }
 0x3f9   : > { %v3551_v21 = vadd.f32 %v3550_v39, %v3536_v27 }
 0x3fa   : > { %v2994_v3 = vadd.f32 %v2993_v53, %v2979_v62 }
 0x3fb   : > { %v3552_v34 = vadd.f32 %v3551_v21, %v7337_v44 }
 0x3fc   : > { %v2995_v42 = vadd.f32 %v2994_v3, %v2980_v9 }
 0x3fd   : > { %v3553_v2 = vadd.f32 %v3552_v34, %v7340_v49 }
 0x3fe   : > { %v2996_v7 = vadd.f32 %v2995_v42, %v2981_v5 }
 0x3ff   : > { %v3554_v1 = vadd.f32 %v3553_v2, %v7343_v12 }
 0x400   : > { %v2997_v26 = vadd.f32 %v2996_v7, %v2982_v4 }
 0x401   : > { %v3555_v25 = vadd.f32 %v3554_v1, %v7346_v36 }
 0x402   : > { %v2998_v19 = vadd.f32 %v2997_v26, %v2983_v6 }
 0x403   : > { %v3556_v15 = vadd.f32 %v3555_v25, %v7349_v46 }
 0x404   : > { %v2999_v38 = vadd.f32 %v2998_v19, %v2984_v30 }
 0x405   : > { %v3557_v55 = vmul.f32 %v3556_v15, %v3556_v15 }
 0x406   : > { %v3000_v48 = vadd.f32 %v2999_v38, %v2985_v61 }
 0x407   : > { %v3558_v29 = vrot.slane %v3557_v55, 4 }
 0x408   : > { %v3001_v56 = vadd.f32 %v3000_v48, %v2986_v14 }
 0x409   : > { %v3559_v62 = vadd.f32 %v3558_v29, %v3557_v55 }
 0x40a   : > { %v3002_v63 = vadd.f32 %v3001_v56, %v2987_v50 }
 0x40b   : > { %v3560_v44 = vrot.slane %v3559_v62, 2 }
 0x40c   : > { %v3003_v9 = vadd.f32 %v3002_v63, %v2988_v45 }
 0x40d   : > { %v3561_v8 = vadd.f32 %v3560_v44, %v3559_v62 }
 0x40e   : > { %v3004_v49 = vadd.f32 %v3003_v9, %v2989_v35 }
 0x40f   : > { %v3562_v5 = vrot.slane %v3561_v8, 1 }
 0x410   : > { %v7426_v28 = vadd.f32 %v3004_v49, %v2990_v23 }
 0x411   : > { %v3563_v12 = vadd.f32 %v3562_v5, %v3561_v8 }
 0x412   : > { %v3006_v36 = vmul.f32 %v7426_v28, %v7426_v28 }
 0x413   : > { %v3564_v4 = vadd.f32 1e-08, %v3563_v12 }
 0x414   : > { %v3007_v46 = vrot.slane %v3006_v36, 4 }
 0x415   : > { %4669 = vrsqrt.f32 %v3564_v4  ;;  %v3567_v6 = vadd.f32 1.0, %v3564_v4 }
 0x416   : > { %v3008_v30 = vadd.f32 %v3007_v46, %v3006_v36 }
 0x417   : > { %4671 = vrcp.f32 %v3567_v6 }
 0x418   : > { %v3009_v61 = vrot.slane %v3008_v30, 2 }
 0x41a   : > { %v3010_v14 = vadd.f32 %v3009_v61, %v3008_v30 }
 0x41c   : > { %v3011_v22 = vrot.slane %v3010_v14, 1 }
 0x41e   : > { %v3012_v32 = vadd.f32 %v3011_v22, %v3010_v14 }
 0x41f   : > { %v4670_v50 = vpop.eup %4669 }
 0x420   : > { %v3566_v45 = vmul.f32 %v4670_v50, %v3564_v4  ;;  %v3013_v35 = vadd.f32 1e-08, %v3012_v32 }
 0x421   : > { %v4672_v43 = vpop.eup %4671 }
 0x422   : > { %v3569_v59 = vmul.f32 %v4672_v43, %v3566_v45  ;;  %4673 = vrsqrt.f32 %v3013_v35  ;;  %v3016_v23 = vadd.f32 1.0, %v3013_v35 }
 0x424   : > { %v3570_v57 = vmul.f32 %v3569_v59, %v3556_v15  ;;  %4675 = vrcp.f32 %v3016_v23 }
 0x426   : > { %v3571_v0 = vmul.f32 %v3570_v57, %v8224_v54  ;;  %v3572_v20 = vmul.f32 %v3570_v57, %v8225_v33  ;;  %v3573_v60 = vmul.f32 %v8226_v47, %v3570_v57  ;;  %v3574_v27 = vmul.f32 %v8232_v16, %v3570_v57 }
 0x427   : > { %v3575_v39 = vmul.f32 %v3570_v57, %v8233_v24  ;;  %v3576_v53 = vmul.f32 %v3570_v57, %v8234_v31  ;;  %v3577_v21 = vmul.f32 %v8235_v13, %v3570_v57  ;;  %v3578_v3 = vmul.f32 %v8236_v11, %v3570_v57 }
 0x428   : > { %v7439_v34 = vmul.f32 %v3570_v57, %v8237_v51  ;;  %v7442_v42 = vmul.f32 %v3570_v57, %v8251_v40  ;;  %v7445_v2 = vmul.f32 %v8252_v17, %v3570_v57  ;;  %v7448_v7 = vmul.f32 %v8227_v41, %v3570_v57 }
 0x429   : > { %v7451_v1 = vmul.f32 %v3570_v57, %v8228_v37  ;;  %v7454_v26 = vmul.f32 %v3570_v57, %v8229_v52  ;;  %v7457_v25 = vmul.f32 %v8230_v10, %v3570_v57  ;;  %v7460_v19 = vmul.f32 %v8231_v18, %v3570_v57 }
 0x42a   : > { %v3587_v15 = vrot.slane %v3571_v0, 4  ;;  %v3593_v38 = vrot.slane %v3572_v20, 4  ;;  %v3599_v55 = vrot.slane %v3573_v60, 4  ;;  %v3605_v48 = vrot.slane %v3574_v27, 4 }
 0x42b   : > { %v3611_v29 = vrot.slane %v3575_v39, 4  ;;  %v3617_v56 = vrot.slane %v3576_v53, 4  ;;  %v3623_v62 = vrot.slane %v3577_v21, 4  ;;  %v3629_v63 = vrot.slane %v3578_v3, 4 }
 0x42c   : > { %v3588_v44 = vadd.f32 %v3587_v15, %v3571_v0  ;;  %v3594_v9 = vadd.f32 %v3593_v38, %v3572_v20  ;;  %v3600_v8 = vadd.f32 %v3599_v55, %v3573_v60  ;;  %v3606_v49 = vadd.f32 %v3605_v48, %v3574_v27  ;;  %v4674_v5 = vpop.eup %4673 }
 0x42d   : > { %v3612_v12 = vadd.f32 %v3611_v29, %v3575_v39  ;;  %v3618_v36 = vadd.f32 %v3617_v56, %v3576_v53  ;;  %v3624_v4 = vadd.f32 %v3623_v62, %v3577_v21  ;;  %v3630_v46 = vadd.f32 %v3629_v63, %v3578_v3 }
 0x42e   : > { %v3015_v6 = vmul.f32 %v4674_v5, %v3013_v35  ;;  %v3589_v30 = vrot.slane %v3588_v44, 2  ;;  %v3595_v61 = vrot.slane %v3594_v9, 2  ;;  %v3601_v14 = vrot.slane %v3600_v8, 2  ;;  %v4676_v22 = vpop.eup %4675 }
 0x42f   : > { %v3607_v50 = vrot.slane %v3606_v49, 2  ;;  %v3613_v32 = vrot.slane %v3612_v12, 2  ;;  %v3619_v45 = vrot.slane %v3618_v36, 2  ;;  %v3625_v43 = vrot.slane %v3624_v4, 2 }
 0x430   : > { %v3018_v59 = vmul.f32 %v4676_v22, %v3015_v6  ;;  %v3590_v23 = vadd.f32 %v3589_v30, %v3588_v44  ;;  %v3596_v57 = vadd.f32 %v3595_v61, %v3594_v9  ;;  %v3602_v0 = vadd.f32 %v3601_v14, %v3600_v8 }
 0x431   : > { %v3608_v20 = vadd.f32 %v3607_v50, %v3606_v49  ;;  %v3614_v60 = vadd.f32 %v3613_v32, %v3612_v12  ;;  %v3620_v27 = vadd.f32 %v3619_v45, %v3618_v36  ;;  %v3626_v39 = vadd.f32 %v3625_v43, %v3624_v4 }
 0x432   : > { %v3019_v53 = vmul.f32 %v3018_v59, %v7426_v28  ;;  %v3591_v35 = vrot.slane %v3590_v23, 1  ;;  %v3597_v21 = vrot.slane %v3596_v57, 1  ;;  %v3603_v3 = vrot.slane %v3602_v0, 1 }
 0x433   : > { %v3609_v15 = vrot.slane %v3608_v20, 1  ;;  %v3615_v38 = vrot.slane %v3614_v60, 1  ;;  %v3621_v55 = vrot.slane %v3620_v27, 1  ;;  %v3627_v48 = vrot.slane %v3626_v39, 1 }
 0x434   : > { %4086 = vst [vmem:[%s6570_s23 + $0x10] sm:$0xff] %v3019_v53  ;;  %v3631_v29 = vrot.slane %v3630_v46, 2  ;;  %v3592_v56 = vadd.f32 %v3591_v35, %v3590_v23  ;;  %v3598_v62 = vadd.f32 %v3597_v21, %v3596_v57  ;;  %v3604_v63 = vadd.f32 %v3603_v3, %v3602_v0 }
 0x435   : > { %v3610_v44 = vadd.f32 %v3609_v15, %v3608_v20  ;;  %v3635_v8 = vrot.slane %v7439_v34, 4  ;;  %v3641_v49 = vrot.slane %v7442_v42, 4  ;;  %v3647_v28 = vrot.slane %v7445_v2, 4 }
 0x436   : > { %v3632_v9 = vadd.f32 %v3631_v29, %v3630_v46  ;;  %v3653_v5 = vrot.slane %v7448_v7, 4  ;;  %v3659_v12 = vrot.slane %v7451_v1, 4  ;;  %v3665_v36 = vrot.slane %v7454_v26, 4 }
 0x437   : > { %v3671_v4 = vrot.slane %v7457_v25, 4  ;;  %v3616_v6 = vadd.f32 %v3615_v38, %v3614_v60  ;;  %v3636_v30 = vadd.f32 %v3635_v8, %v7439_v34  ;;  %v3642_v61 = vadd.f32 %v3641_v49, %v7442_v42 }
 0x438   : > { %v3648_v46 = vadd.f32 %v3647_v28, %v7445_v2  ;;  %v3654_v14 = vadd.f32 %v3653_v5, %v7448_v7  ;;  %v3660_v22 = vadd.f32 %v3659_v12, %v7451_v1  ;;  %v3666_v50 = vadd.f32 %v3665_v36, %v7454_v26 }
 0x439   : > { %v3672_v32 = vadd.f32 %v3671_v4, %v7457_v25  ;;  %v3633_v45 = vrot.slane %v3632_v9, 1  ;;  %v3637_v43 = vrot.slane %v3636_v30, 2  ;;  %v3643_v59 = vrot.slane %v3642_v61, 2 }
 0x43a   : > { %v3649_v23 = vrot.slane %v3648_v46, 2  ;;  %v3655_v57 = vrot.slane %v3654_v14, 2  ;;  %v3661_v0 = vrot.slane %v3660_v22, 2  ;;  %v3667_v20 = vrot.slane %v3666_v50, 2 }
 0x43b   : > { %v3673_v34 = vrot.slane %v3672_v32, 2  ;;  %v3638_v60 = vadd.f32 %v3637_v43, %v3636_v30  ;;  %v3644_v42 = vadd.f32 %v3643_v59, %v3642_v61  ;;  %v3677_v2 = vrot.slane %v7460_v19, 4  ;;  %v8255_v59 = vld [vmem:[#allocation27_spill] sm:$0xff] }
 0x43c   : > { %v3650_v53 = vadd.f32 %v3649_v23, %v3648_v46  ;;  %v3656_v7 = vadd.f32 %v3655_v57, %v3654_v14  ;;  %v3662_v35 = vadd.f32 %v3661_v0, %v3660_v22  ;;  %v3668_v1 = vadd.f32 %v3667_v20, %v3666_v50  ;;  %v8253_v22 = vld [vmem:[#allocation29_spill] sm:$0xff] }
 0x43d   : > { %v3674_v21 = vadd.f32 %v3673_v34, %v3672_v32  ;;  %v3639_v26 = vrot.slane %v3638_v60, 1  ;;  %v3645_v3 = vrot.slane %v3644_v42, 1  ;;  %v3678_v15 = vadd.f32 %v3677_v2, %v7460_v19  ;;  %v8254_v32 = vld [vmem:[#allocation33_spill] sm:$0xff]  ;;  %v8256_v19 = vld [vmem:[#allocation31_spill] sm:$0xff] }
 0x43e   : > { %v3651_v25 = vrot.slane %v3650_v53, 1  ;;  %v3622_v38 = vadd.f32 %v3621_v55, %v3620_v27  ;;  %v3628_v29 = vadd.f32 %v3627_v48, %v3626_v39  ;;  %v3634_v8 = vadd.f32 %v3633_v45, %v3632_v9  ;;  %v8257_v39 = vld [vmem:[#allocation37_spill] sm:$0xff]  ;;  %v8259_v45 = vld [vmem:[#allocation35_spill] sm:$0xff] }
 0x43f   : > { %v3657_v49 = vrot.slane %v3656_v7, 1  ;;  %v3663_v28 = vrot.slane %v3662_v35, 1  ;;  %v3669_v5 = vrot.slane %v3668_v1, 1  ;;  %v3675_v12 = vrot.slane %v3674_v21, 1  ;;  %v8258_v48 = vld [vmem:[#allocation41_spill] sm:$0xff] }
 0x440   : > { %v3679_v36 = vrot.slane %v3678_v15, 2  ;;  %v3640_v4 = vadd.f32 %v3639_v26, %v3638_v60  ;;  %v3646_v30 = vadd.f32 %v3645_v3, %v3644_v42  ;;  %v3652_v61 = vadd.f32 %v3651_v25, %v3650_v53  ;;  %v8260_v60 = vld [vmem:[#allocation39_spill] sm:$0xff]  ;;  %v8261_v2 = vld [vmem:[#allocation89_spill] sm:$0xff] }
 0x441   : > { %v3658_v46 = vadd.f32 %v3657_v49, %v3656_v7  ;;  %v3683_v50 = vadd.f32 %v3592_v56, %v8253_v22  ;;  %v3684_v43 = vadd.f32 %v3598_v62, %v8254_v32  ;;  %v3685_v23 = vadd.f32 %v3604_v63, %v8255_v59  ;;  %v8262_v62 = vld [vmem:[#allocation90_spill] sm:$0xff] }
 0x442   : > { %v3680_v14 = vadd.f32 %v3679_v36, %v3678_v15  ;;  %v3686_v27 = vadd.f32 %v3610_v44, %v8256_v19  ;;  %v3687_v55 = vadd.f32 %v3616_v6, %v8257_v39  ;;  %v3688_v9 = vadd.f32 %v3622_v38, %v8258_v48  ;;  %v8263_v44 = vld [vmem:[#allocation92_spill] sm:$0xff]  ;;  %v8264_v6 = vld [vmem:[#allocation93_spill] sm:$0xff]  ;;  %v8268_v36 = vld [vmem:[#allocation99_spill] sm:$0xff] }
 0x443   : > { %v3689_v57 = vadd.f32 %v3628_v29, %v8259_v45  ;;  %v3664_v0 = vadd.f32 %v3663_v28, %v3662_v35  ;;  %v3670_v20 = vadd.f32 %v3669_v5, %v3668_v1  ;;  %v3690_v42 = vadd.f32 %v3634_v8, %v8260_v60  ;;  %v8265_v29 = vld [vmem:[#allocation94_spill] sm:$0xff]  ;;  %v8266_v1 = vld [vmem:[#allocation95_spill] sm:$0xff] }
 0x444   : > { %v3681_v34 = vrot.slane %v3680_v14, 1  ;;  %v3676_v53 = vadd.f32 %v3675_v12, %v3674_v21  ;;  %v3691_v56 = vadd.f32 %v3640_v4, %v8261_v2  ;;  %v3692_v26 = vadd.f32 %v3646_v30, %v8262_v62  ;;  %v8267_v21 = vld [vmem:[#allocation97_spill] sm:$0xff] }
 0x445   : > { %v3699_v63 = vmax.f32 %v3683_v50, %v3687_v55  ;;  %v3700_v3 = vmax.f32 %v3684_v43, %v3688_v9  ;;  %v3693_v25 = vadd.f32 %v3652_v61, %v8263_v44  ;;  %v3694_v15 = vadd.f32 %v3658_v46, %v8264_v6 }
 0x446   : > { %v3682_v7 = vadd.f32 %v3681_v34, %v3680_v14  ;;  %v3701_v38 = vmax.f32 %v3685_v23, %v3689_v57  ;;  %v3702_v49 = vmax.f32 %v3686_v27, %v3690_v42  ;;  %v3695_v35 = vadd.f32 %v3664_v0, %v8265_v29 }
 0x447   : > { %v3696_v28 = vadd.f32 %v3670_v20, %v8266_v1  ;;  %v3703_v5 = vmax.f32 %v3699_v63, %v3691_v56  ;;  %v3704_v8 = vmax.f32 %v3700_v3, %v3692_v26  ;;  %v3697_v12 = vadd.f32 %v3676_v53, %v8267_v21 }
 0x448   : > { %v3698_v4 = vadd.f32 %v3682_v7, %v8268_v36  ;;  %v3705_v14 = vmax.f32 %v3701_v38, %v3693_v25  ;;  %v3706_v30 = vmax.f32 %v3702_v49, %v3694_v15 }
 0x449   : > { %v3707_v22 = vmax.f32 %v3703_v5, %v3695_v35  ;;  %v3708_v32 = vmax.f32 %v3704_v8, %v3696_v28 }
 0x44a   : > { %v3709_v59 = vmax.f32 %v3705_v14, %v3697_v12  ;;  %v3710_v61 = vmax.f32 %v3706_v30, %v3698_v4 }
 0x44b   : > { %v3711_v19 = vmax.f32 %v3707_v22, %v3708_v32 }
 0x44c   : > { %v3712_v46 = vmax.f32 %v3709_v59, %v3710_v61 }
 0x44e   : > { %v3713_v39 = vmax.f32 %v3711_v19, %v3712_v46 }
 0x450   : > { %v3714_v48 = vsub.f32 %v3683_v50, %v3713_v39  ;;  %v3715_v45 = vsub.f32 %v3684_v43, %v3713_v39  ;;  %v3716_v0 = vsub.f32 %v3685_v23, %v3713_v39  ;;  %v3717_v34 = vsub.f32 %v3686_v27, %v3713_v39 }
 0x451   : > { %v3718_v20 = vsub.f32 %v3687_v55, %v3713_v39  ;;  %v3719_v60 = vsub.f32 %v3688_v9, %v3713_v39  ;;  %v3720_v2 = vsub.f32 %v3689_v57, %v3713_v39  ;;  %v3721_v62 = vsub.f32 %v3690_v42, %v3713_v39 }
 0x452   : > { %v3722_v53 = vsub.f32 %v3691_v56, %v3713_v39  ;;  %v3723_v63 = vsub.f32 %v3692_v26, %v3713_v39  ;;  %v3724_v7 = vsub.f32 %v3693_v25, %v3713_v39  ;;  %v3725_v3 = vsub.f32 %v3694_v15, %v3713_v39 }
 0x453   : > { %v3726_v44 = vsub.f32 %v3695_v35, %v3713_v39  ;;  %v3727_v6 = vsub.f32 %v3696_v28, %v3713_v39  ;;  %v3728_v38 = vsub.f32 %v3697_v12, %v3713_v39  ;;  %v3729_v49 = vsub.f32 %v3698_v4, %v3713_v39 }
 0x454   : > { %v3730_v29 = vmul.f32 1.442695, %v3714_v48  ;;  %v3732_v1 = vmul.f32 1.442695, %v3715_v45  ;;  %v3734_v5 = vmul.f32 1.442695, %v3716_v0 }
 0x455   : > { %v3736_v8 = vmul.f32 1.442695, %v3717_v34  ;;  %v3738_v50 = vmul.f32 1.442695, %v3718_v20  ;;  %v3740_v43 = vmul.f32 1.442695, %v3719_v60 }
 0x456   : > { %4677 = vpow2.f32 %v3730_v29  ;;  %v3742_v23 = vmul.f32 1.442695, %v3720_v2  ;;  %v3744_v27 = vmul.f32 1.442695, %v3721_v62  ;;  %v3746_v55 = vmul.f32 1.442695, %v3722_v53 }
 0x457   : > { %4679 = vpow2.f32 %v3732_v1  ;;  %v3748_v9 = vmul.f32 1.442695, %v3723_v63  ;;  %v3750_v57 = vmul.f32 1.442695, %v3724_v7  ;;  %v3752_v42 = vmul.f32 1.442695, %v3725_v3 }
 0x458   : > { %4681 = vpow2.f32 %v3734_v5  ;;  %v3754_v56 = vmul.f32 1.442695, %v3726_v44  ;;  %v3756_v26 = vmul.f32 1.442695, %v3727_v6  ;;  %v3758_v15 = vmul.f32 1.442695, %v3728_v38 }
 0x459   : > { %4683 = vpow2.f32 %v3736_v8  ;;  %v3760_v28 = vmul.f32 1.442695, %v3729_v49 }
 0x45a   : > { %4685 = vpow2.f32 %v3738_v50 }
 0x45b   : > { %4687 = vpow2.f32 %v3740_v43 }
 0x45c   : > { %4689 = vpow2.f32 %v3742_v23 }
 0x45d   : > { %4691 = vpow2.f32 %v3744_v27 }
 0x45e   : > { %4693 = vpow2.f32 %v3746_v55 }
 0x45f   : > { %4695 = vpow2.f32 %v3748_v9 }
 0x460   : > { %v4678_v25 = vpop.eup %4677  ;;  %4697 = vpow2.f32 %v3750_v57 }
 0x461   : > { %v4680_v35 = vpop.eup %4679  ;;  %4699 = vpow2.f32 %v3752_v42 }
 0x462   : > { %v4682_v21 = vpop.eup %4681  ;;  %4701 = vpow2.f32 %v3754_v56  ;;  %v3778_v12 = vrot.slane %v4680_v35, 7 }
 0x463   : > { %v4684_v36 = vpop.eup %4683  ;;  %4703 = vpow2.f32 %v3756_v26  ;;  %v3780_v4 = vrot.slane %v4682_v21, 6 }
 0x464   : > { %v4686_v14 = vpop.eup %4685  ;;  %4705 = vpow2.f32 %v3758_v15  ;;  %v3779_v30 = vsel %vm624_vm0, %v3778_v12, %v4678_v25  ;;  %v3782_v22 = vrot.slane %v4684_v36, 5 }
 0x465   : > { %v4688_v32 = vpop.eup %4687  ;;  %4707 = vpow2.f32 %v3760_v28  ;;  %v3781_v59 = vsel %vm627_vm1, %v3780_v4, %v3779_v30  ;;  %v3784_v61 = vrot.slane %v4686_v14, 4 }
 0x466   : > { %v4690_v19 = vpop.eup %4689  ;;  %v3783_v46 = vsel %vm630_vm2, %v3782_v22, %v3781_v59  ;;  %v3786_v39 = vrot.slane %v4688_v32, 3 }
 0x467   : > { %v4692_v48 = vpop.eup %4691  ;;  %v3785_v45 = vsel %vm633_vm3, %v3784_v61, %v3783_v46  ;;  %v3788_v0 = vrot.slane %v4690_v19, 2 }
 0x468   : > { %v4694_v34 = vpop.eup %4693  ;;  %v3787_v20 = vsel %vm636_vm4, %v3786_v39, %v3785_v45  ;;  %v3790_v60 = vrot.slane %v4692_v48, 1 }
 0x469   : > { %v4696_v2 = vpop.eup %4695  ;;  %v3789_v62 = vsel %vm639_vm5, %v3788_v0, %v3787_v20 }
 0x46a   : > { %v4698_v53 = vpop.eup %4697  ;;  %v3791_v63 = vsel %vm642_vm6, %v3790_v60, %v3789_v62  ;;  %v3792_v7 = vrot.slane %v4696_v2, 7 }
 0x46b   : > { %v4700_v3 = vpop.eup %4699  ;;  %v3794_v44 = vrot.slane %v4698_v53, 6 }
 0x46c   : > { %v4702_v6 = vpop.eup %4701  ;;  %v3793_v38 = vsel %vm624_vm0, %v3792_v7, %v4694_v34  ;;  %v3796_v49 = vrot.slane %v4700_v3, 5 }
 0x46d   : > { %v4704_v29 = vpop.eup %4703  ;;  %v3795_v1 = vsel %vm627_vm1, %v3794_v44, %v3793_v38  ;;  %v3798_v5 = vrot.slane %v4702_v6, 4 }
 0x46e   : > { %v4706_v8 = vpop.eup %4705  ;;  %v3797_v50 = vsel %vm630_vm2, %v3796_v49, %v3795_v1  ;;  %v3800_v43 = vrot.slane %v4704_v29, 3 }
 0x46f   : > { %v4708_v23 = vpop.eup %4707  ;;  %v3799_v27 = vsel %vm633_vm3, %v3798_v5, %v3797_v50  ;;  %v3802_v55 = vrot.slane %v4706_v8, 2 }
 0x470   : > { %v3801_v9 = vsel %vm636_vm4, %v3800_v43, %v3799_v27  ;;  %v3804_v57 = vrot.slane %v4708_v23, 1 }
 0x471   : > { %v3803_v42 = vsel %vm639_vm5, %v3802_v55, %v3801_v9 }
 0x472   : > { %v3805_v56 = vsel %vm642_vm6, %v3804_v57, %v3803_v42 }
 0x473   : > { %v3808_v26 = vadd.f32 %v3805_v56, %v3791_v63 }
 0x475   : > { %v3809_v15 = vrot.slane %v3808_v26, 4 }
 0x477   : > { %v3810_v28 = vadd.f32 %v3809_v15, %v3808_v26 }
 0x479   : > { %v3811_v12 = vrot.slane %v3810_v28, 2 }
 0x47b   : > { %v3812_v4 = vadd.f32 %v3811_v12, %v3810_v28 }
 0x47d   : > { %v3813_v30 = vrot.slane %v3812_v4, 1 }
 0x47f   : > { %v3814_v22 = vadd.f32 %v3813_v30, %v3812_v4 }
 0x481   : > { %4709 = vrcp.f32 %v3814_v22 }
 0x48b   : > { %v4710_v59 = vpop.eup %4709 }
 0x48c   : > { %v3819_v61 = vrot.slane %v4710_v59, %v8223_v58 }
 0x48e   : > { %v3820_v46 = vmul.f32 %v4678_v25, %v3819_v61  ;;  %v3821_v39 = vmul.f32 %v4680_v35, %v3819_v61  ;;  %v3822_v45 = vmul.f32 %v4682_v21, %v3819_v61  ;;  %v3823_v0 = vmul.f32 %v4684_v36, %v3819_v61 }
 0x48f   : > { %v3824_v20 = vmul.f32 %v4686_v14, %v3819_v61  ;;  %v3825_v60 = vmul.f32 %v4688_v32, %v3819_v61  ;;  %v3826_v62 = vmul.f32 %v4690_v19, %v3819_v61  ;;  %v3827_v7 = vmul.f32 %v4692_v48, %v3819_v61 }
 0x490   : > { %v3828_v44 = vmul.f32 %v4694_v34, %v3819_v61  ;;  %v3829_v63 = vmul.f32 %v4696_v2, %v3819_v61  ;;  %v3830_v38 = vmul.f32 %v4698_v53, %v3819_v61  ;;  %v3831_v49 = vmul.f32 %v4700_v3, %v3819_v61 }
 0x491   : > { %v3832_v1 = vmul.f32 %v4702_v6, %v3819_v61  ;;  %v3833_v5 = vmul.f32 %v4704_v29, %v3819_v61  ;;  %v3834_v50 = vmul.f32 %v4706_v8, %v3819_v61  ;;  %v3835_v43 = vmul.f32 %v4708_v23, %v3819_v61 }
 0x492   : > { %v3839_v27 = vrot.slane %v3820_v46, %v8223_v58  ;;  %v3843_v55 = vrot.slane %v3821_v39, %v8223_v58  ;;  %v3847_v25 = vrot.slane %v3822_v45, %v8223_v58  ;;  %v3851_v35 = vrot.slane %v3823_v0, %v8223_v58 }
 0x493   : > { %v3855_v21 = vrot.slane %v3824_v20, %v8223_v58  ;;  %v3859_v36 = vrot.slane %v3825_v60, %v8223_v58  ;;  %v3863_v14 = vrot.slane %v3826_v62, %v8223_v58  ;;  %v3867_v32 = vrot.slane %v3827_v7, %v8223_v58 }
 0x494   : > { %v3871_v19 = vrot.slane %v3828_v44, %v8223_v58  ;;  %v3875_v48 = vrot.slane %v3829_v63, %v8223_v58  ;;  %v3879_v34 = vrot.slane %v3830_v38, %v8223_v58  ;;  %v3883_v2 = vrot.slane %v3831_v49, %v8223_v58 }
 0x495   : > { %v3887_v53 = vrot.slane %v3832_v1, %v8223_v58  ;;  %v3891_v3 = vrot.slane %v3833_v5, %v8223_v58  ;;  %v3895_v6 = vrot.slane %v3834_v50, %v8223_v58  ;;  %v3899_v29 = vrot.slane %v3835_v43, %v8223_v58 }
 0x496   : > { %v3900_v8 = vmul.f32 %v3839_v27, %v8224_v54  ;;  %v3901_v23 = vmul.f32 %v3843_v55, %v8225_v33  ;;  %v3902_v9 = vmul.f32 %v8226_v47, %v3847_v25  ;;  %v3903_v57 = vmul.f32 %v8232_v16, %v3851_v35 }
 0x497   : > { %v3904_v42 = vmul.f32 %v3855_v21, %v8233_v24  ;;  %v3905_v56 = vmul.f32 %v3859_v36, %v8234_v31  ;;  %v3906_v26 = vmul.f32 %v8235_v13, %v3863_v14  ;;  %v3907_v15 = vmul.f32 %v8236_v11, %v3867_v32 }
 0x498   : > { %v3908_v28 = vmul.f32 %v3871_v19, %v8237_v51  ;;  %v3909_v58 = vmul.f32 %v3875_v48, %v8251_v40  ;;  %v3910_v54 = vmul.f32 %v8252_v17, %v3879_v34  ;;  %v3911_v33 = vmul.f32 %v8227_v41, %v3883_v2 }
 0x499   : > { %v3912_v47 = vmul.f32 %v3887_v53, %v8228_v37  ;;  %v3913_v16 = vmul.f32 %v3891_v3, %v8229_v52  ;;  %v3914_v24 = vmul.f32 %v8230_v10, %v3895_v6  ;;  %v3915_v31 = vmul.f32 %v8231_v18, %v3899_v29 }
 0x49a   : > { %v3916_v12 = vadd.f32 %v3901_v23, %v3900_v8 }
 0x49c   : > { %v3917_v13 = vadd.f32 %v3916_v12, %v3902_v9 }
 0x49e   : > { %v3918_v4 = vadd.f32 %v3917_v13, %v3903_v57 }
 0x4a0   : > { %v3919_v11 = vadd.f32 %v3918_v4, %v3904_v42 }
 0x4a2   : > { %v3920_v30 = vadd.f32 %v3919_v11, %v3905_v56 }
 0x4a4   : > { %v3921_v51 = vadd.f32 %v3920_v30, %v3906_v26 }
 0x4a6   : > { %v3922_v22 = vadd.f32 %v3921_v51, %v3907_v15 }
 0x4a8   : > { %v3923_v40 = vadd.f32 %v3922_v22, %v3908_v28 }
 0x4aa   : > { %v3924_v59 = vadd.f32 %v3923_v40, %v3909_v58 }
 0x4ac   : > { %v3925_v17 = vadd.f32 %v3924_v59, %v3910_v54 }
 0x4ae   : > { %v3926_v61 = vadd.f32 %v3925_v17, %v3911_v33 }
 0x4b0   : > { %v3927_v41 = vadd.f32 %v3926_v61, %v3912_v47 }
 0x4b2   : > { %v3928_v37 = vadd.f32 %v3927_v41, %v3913_v16 }
 0x4b4   : > { %v3929_v46 = vadd.f32 %v3928_v37, %v3914_v24 }
 0x4b6   : > { %v3930_v52 = vadd.f32 %v3929_v46, %v3915_v31 }
 0x4b8   : > { %v3931_v10 = vmul.f32 %v3930_v52, %v3930_v52 }
 0x4ba   : > { %v3932_v39 = vrot.slane %v3931_v10, 4 }
 0x4bc   : > { %v3933_v18 = vadd.f32 %v3932_v39, %v3931_v10 }
 0x4be   : > { %v3934_v45 = vrot.slane %v3933_v18, 2 }
 0x4c0   : > { %v3935_v0 = vadd.f32 %v3934_v45, %v3933_v18 }
 0x4c2   : > { %v3936_v20 = vrot.slane %v3935_v0, 1 }
 0x4c4   : > { %v3937_v60 = vadd.f32 %v3936_v20, %v3935_v0 }
 0x4c6   : > { %v3938_v62 = vadd.f32 1e-08, %v3937_v60 }
 0x4c8   : > { %4711 = vrsqrt.f32 %v3938_v62  ;;  %v3941_v7 = vadd.f32 1.0, %v3938_v62 }
 0x4ca   : > { %4713 = vrcp.f32 %v3941_v7 }
 0x4d2   : > { %v4712_v44 = vpop.eup %4711 }
 0x4d3   : > { %v3940_v63 = vmul.f32 %v4712_v44, %v3938_v62 }
 0x4d4   : > { %v4714_v38 = vpop.eup %4713 }
 0x4d5   : > { %v3943_v49 = vmul.f32 %v4714_v38, %v3940_v63 }
 0x4d7   : > { %v3944_v1 = vmul.f32 %v3943_v49, %v3930_v52 }
 0x4d9   : > { %4095 = vst [vmem:[%s6570_s23 + $0x18] sm:$0xff] %v3944_v1 }
 0x4da   : > { %4786 = shalt.err (!%p4783_p11)
}
 0x4db   : > { %s4787_s28 = scalar_lea.hbm %s7548_s19, 512  ;;  %s4791_s25 = scalar_lea.hbm %s7597_s2, 1024 }
 0x4dc   : > { %p4788_p13 = scmp.ne.s32.totalorder %s7548_s19, %s4787_s28  ;;  %p4792_p12 = scmp.lt.u32.totalorder %s7548_s19, %s7597_s2 }
 0x4dd   : > { %p4793_p3 = scmp.lt.u32.totalorder %s4791_s25, %s4787_s28  ;;  %p4795_p8 = scmp.lt.u32.totalorder %s4787_s28, %s7548_s19 }
 0x4de   : > { %p4789_p2 = pnand %p4788_p13, %p8269_p9 }
 0x4df   : > { %p4794_p7 = por %p4793_p3, %p4792_p12 }
 0x4e0   : > { %p4790_p6 = pneg %p4789_p2 }
 0x4e1   : > { %p4796_p10 = por %p4795_p8, %p4794_p7 }
 0x4e3   : > { %p4797_p1 = pnand %p4796_p10, %p4790_p6 }
 0x4e5   : > { %4800 = shalt.err (!%p4797_p1)
}
 0x4e6   : > { %s4851_s16 = smov 128   ;;  %s4852_s20 = smov 256  }
 0x4e7   : > { %s4853_s23 = smov 8  }
 0x4e8   : > { %4298 = dma.vmem_to_hbm [thread:$0]  (%p8269_p9), %s7550_s14, 512, %s7548_s19, %s3948_s4, %s4851_s16, %s4852_s20, %s4853_s23  }
 0x4e9 PF: > { %s3975_s8 = sand.u32 1, %s4831_s9   ;;  %p8270_p4 = scmp.ne.s32.totalorder %s7838_s22, 0 }
 0x4ea   : > { %p8271_p0 = scmp.ge.s32.totalorder %s4843_s12, 2  ;;  %s3976_s24 = scalar_lea.sflag [#allocation4], %s3975_s8 }
 0x4ec   : > { %p4309_p5 = pnand %p8271_p0, %p8270_p4 }
 0x4ee   : > { %4826 = dma.done.wait (!%p4309_p5), %s3976_s24, 512  }
 0x4ef   : > { %4828 = vsyncadd (!%p4309_p5), %s3976_s24, 4294966784  ;;  %p16_p11 = scmp.ge.s32.totalorder %s4894_s15, 4   ;;  %s8272_s9 = smov %s4835_s10 }
 0x4f0   : > { %s8273_s10 = smov %s4839_s11  ;;  %s8274_s11 = smov %s4906_s18 }
 0x4f1   : > { %s8275_s12 = smov %s4894_s15  ;;  %18 = sbr.rel (!%p16_p11) target bundleno = 6 (0x6), region = 80 }
 0x4f8   :  { %3981 = vsyncpa [#allocation3], 1 }
 0x4f9   :  { %3983 = vsyncpa [#allocation3 + $0x1], 1 }
 0x4fa   :  { %3984 = vsyncpa [#allocation6], 1 }
 0x4fb   :  { %3985 = vsyncpa [#allocation4], 1 }
 0x4fc   :  { %3987 = vsyncpa [#allocation4 + $0x1], 1 }

</bundles_post_ra>
